<compile_context>
chip_gen: v6e
topology: v6e:2x2x1
jax: 0.10.0
libtpu: 0.0.40
codegen_flags: <defaults>
</compile_context>

<pallas_src>
import jax
import jax.numpy as jnp
from jax.experimental import pallas as pl
from jax.experimental.pallas import tpu as pltpu

TB = 128        # batch tile (rows per grid step)
F_PAD = 8       # input features padded 7 -> 8
OUT_PAD = 128   # fc4 output padded 2 -> 128 (lane-dense stores)


def mlp_kernel(x_ref, w1_ref, b1_ref, w2_ref, b2_ref, w3_ref, b3_ref,
               w4_ref, b4_ref, out_ref):
    # Whole weight set (~2.2 MiB bf16) is VMEM-resident (constant index_map);
    # all four matmuls run on the MXU with bf16 inputs / f32 accumulation.
    x = x_ref[...]                                                   # (TB, 8) bf16

    h1 = jnp.dot(x, w1_ref[...], preferred_element_type=jnp.float32) + b1_ref[...]
    h1 = jnp.maximum(h1, 0.0)
    # TODO(synk): dropout (p=0.5) is identity in eval mode; training-mode RNG mask not implemented.

    h2 = jnp.dot(h1.astype(jnp.bfloat16), w2_ref[...],
                 preferred_element_type=jnp.float32) + b2_ref[...]
    h2 = jnp.maximum(h2, 0.0)

    h3 = jnp.dot(h2.astype(jnp.bfloat16), w3_ref[...],
                 preferred_element_type=jnp.float32) + b3_ref[...]
    h3 = jnp.maximum(h3, 0.0)

    out = jnp.dot(h3.astype(jnp.bfloat16), w4_ref[...],
                  preferred_element_type=jnp.float32) + b4_ref[...]
    out_ref[...] = out.astype(out_ref.dtype)                         # (TB, 128) f32


def net_forward(x, params):
    """x: (B, 7) float32.  params: w1..w4 bf16 stored (in, out); b1..b4 f32 (1, out)."""
    B = x.shape[0]
    Bp = pl.cdiv(B, TB) * TB

    # Host-side padding / casting (pure plumbing, no extra FLOPs of consequence).
    xp = jnp.zeros((Bp, F_PAD), jnp.bfloat16).at[:B, :7].set(x.astype(jnp.bfloat16))
    w1 = jnp.zeros((F_PAD, 512), jnp.bfloat16).at[:7, :].set(params["w1"])
    b1 = params["b1"]
    w2, b2 = params["w2"], params["b2"]
    w3, b3 = params["w3"], params["b3"]
    w4 = jnp.zeros((512, OUT_PAD), jnp.bfloat16).at[:, :2].set(params["w4"])
    b4 = jnp.zeros((1, OUT_PAD), jnp.float32).at[:, :2].set(params["b4"])

    # Weights/biases: constant block index across the batch grid -> stay resident.
    const = lambda a: pl.BlockSpec(a.shape, lambda i: (0,) * a.ndim)

    out = pl.pallas_call(
        mlp_kernel,
        out_shape=jax.ShapeDtypeStruct((Bp, OUT_PAD), jnp.float32),
        grid=(Bp // TB,),
        in_specs=[pl.BlockSpec((TB, F_PAD), lambda i: (i, 0)),
                  const(w1), const(b1),
                  const(w2), const(b2),
                  const(w3), const(b3),
                  const(w4), const(b4)],
        out_specs=pl.BlockSpec((TB, OUT_PAD), lambda i: (i, 0)),
        compiler_params=pltpu.CompilerParams(
            dimension_semantics=("parallel",),
            vmem_limit_bytes=16 << 20),
    )(xp, w1, b1, w2, b2, w3, b3, w4, b4)

    return out[:B, :2]


def init_params(key):
    """Deterministic init mimicking nn.Linear default (uniform +/- 1/sqrt(fan_in)).
    Weights stored (in_features, out_features) == W.T relative to PyTorch, in bf16."""
    dims = [(7, 512), (512, 1024), (1024, 512), (512, 2)]
    params = {}
    for i, (fan_in, fan_out) in enumerate(dims, start=1):
        key, kw, kb = jax.random.split(key, 3)
        bound = 1.0 / jnp.sqrt(float(fan_in))
        params[f"w{i}"] = jax.random.uniform(
            kw, (fan_in, fan_out), jnp.float32,
            minval=-bound, maxval=bound).astype(jnp.bfloat16)
        params[f"b{i}"] = jax.random.uniform(
            kb, (1, fan_out), jnp.float32, minval=-bound, maxval=bound)
    return params


def reference_forward(x, params):
    """Pure-JAX reference matching the kernel's bf16-input / f32-accumulate math."""
    def lin(h, w, b):
        return jnp.dot(h.astype(jnp.bfloat16), w,
                       preferred_element_type=jnp.float32) + b
    h = jnp.maximum(lin(x, params["w1"], params["b1"]), 0.0)
    h = jnp.maximum(lin(h, params["w2"], params["b2"]), 0.0)
    h = jnp.maximum(lin(h, params["w3"], params["b3"]), 0.0)
    return lin(h, params["w4"], params["b4"])


if __name__ == "__main__":
    key = jax.random.PRNGKey(0)
    key, kx = jax.random.split(key)

    B = 8
    x = jax.random.normal(kx, (B, 7), dtype=jnp.float32)
    params = init_params(key)

    out = net_forward(x, params)
    out = jax.block_until_ready(out)

    ref = reference_forward(x, params)
    assert out.shape == (B, 2), out.shape
    assert jnp.allclose(out, ref, atol=5e-3, rtol=5e-3), "mismatch vs reference"

    print("KERNEL_OK")
</pallas_src>

<mosaic_0001>
module attributes {stable_mosaic.version = 11 : i64} {
  func.func @mlp_kernel(%arg0: i32, %arg1: memref<128x8xbf16, #tpu.memory_space<vmem>>, %arg2: memref<8x512xbf16, #tpu.memory_space<vmem>>, %arg3: memref<1x512xf32, #tpu.memory_space<vmem>>, %arg4: memref<512x1024xbf16, #tpu.memory_space<vmem>>, %arg5: memref<1x1024xf32, #tpu.memory_space<vmem>>, %arg6: memref<1024x512xbf16, #tpu.memory_space<vmem>>, %arg7: memref<1x512xf32, #tpu.memory_space<vmem>>, %arg8: memref<512x128xbf16, #tpu.memory_space<vmem>>, %arg9: memref<1x128xf32, #tpu.memory_space<vmem>>, %arg10: memref<128x128xf32, #tpu.memory_space<vmem>>) attributes {dimension_semantics = [#tpu.dimension_semantics<parallel>], iteration_bounds = array<i64: 1>, scalar_prefetch = 0 : i64, scratch_operands = 0 : i64, tpu.core_type = #tpu.core_type<tc>, window_params = [{transform_indices = @transform_0, window_bounds = array<i64: 128, 8>}, {pipeline_mode = #tpu.pipeline_mode<synchronous>, transform_indices = @transform_1, window_bounds = array<i64: 8, 512>}, {pipeline_mode = #tpu.pipeline_mode<synchronous>, transform_indices = @transform_2, window_bounds = array<i64: 1, 512>}, {pipeline_mode = #tpu.pipeline_mode<synchronous>, transform_indices = @transform_3, window_bounds = array<i64: 512, 1024>}, {pipeline_mode = #tpu.pipeline_mode<synchronous>, transform_indices = @transform_4, window_bounds = array<i64: 1, 1024>}, {pipeline_mode = #tpu.pipeline_mode<synchronous>, transform_indices = @transform_5, window_bounds = array<i64: 1024, 512>}, {pipeline_mode = #tpu.pipeline_mode<synchronous>, transform_indices = @transform_6, window_bounds = array<i64: 1, 512>}, {pipeline_mode = #tpu.pipeline_mode<synchronous>, transform_indices = @transform_7, window_bounds = array<i64: 512, 128>}, {pipeline_mode = #tpu.pipeline_mode<synchronous>, transform_indices = @transform_8, window_bounds = array<i64: 1, 128>}, {transform_indices = @transform_9, window_bounds = array<i64: 128, 128>}]} {
    %c0 = arith.constant 0 : index
    %c0_0 = arith.constant 0 : index
    %0 = vector.load %arg1[%c0, %c0_0] : memref<128x8xbf16, #tpu.memory_space<vmem>>, vector<128x8xbf16>
    %c0_1 = arith.constant 0 : index
    %c0_2 = arith.constant 0 : index
    %1 = vector.load %arg2[%c0_1, %c0_2] : memref<8x512xbf16, #tpu.memory_space<vmem>>, vector<8x512xbf16>
    %cst = arith.constant dense<0.000000e+00> : vector<128x512xf32>
    %2 = tpu.matmul %0, %1, %cst {dimension_numbers = #tpu.dot_dimension_numbers<[1], [0], [0], [1], [0, 0, 1, 1], [], []>} : vector<128x8xbf16>, vector<8x512xbf16>, vector<128x512xf32> -> vector<128x512xf32>
    %c0_3 = arith.constant 0 : index
    %c0_4 = arith.constant 0 : index
    %3 = vector.load %arg3[%c0_3, %c0_4] : memref<1x512xf32, #tpu.memory_space<vmem>>, vector<1x512xf32>
    %4 = vector.broadcast %3 : vector<1x512xf32> to vector<128x512xf32>
    %5 = arith.addf %2, %4 : vector<128x512xf32>
    %cst_5 = arith.constant 0.000000e+00 : f32
    %6 = vector.broadcast %cst_5 : f32 to vector<128x512xf32>
    %7 = arith.maximumf %5, %6 : vector<128x512xf32>
    %8 = arith.truncf %7 : vector<128x512xf32> to vector<128x512xbf16>
    %c0_6 = arith.constant 0 : index
    %c0_7 = arith.constant 0 : index
    %9 = vector.load %arg4[%c0_6, %c0_7] : memref<512x1024xbf16, #tpu.memory_space<vmem>>, vector<512x1024xbf16>
    %cst_8 = arith.constant dense<0.000000e+00> : vector<128x1024xf32>
    %10 = tpu.matmul %8, %9, %cst_8 {dimension_numbers = #tpu.dot_dimension_numbers<[1], [0], [0], [1], [0, 0, 1, 1], [], []>} : vector<128x512xbf16>, vector<512x1024xbf16>, vector<128x1024xf32> -> vector<128x1024xf32>
    %c0_9 = arith.constant 0 : index
    %c0_10 = arith.constant 0 : index
    %11 = vector.load %arg5[%c0_9, %c0_10] : memref<1x1024xf32, #tpu.memory_space<vmem>>, vector<1x1024xf32>
    %12 = vector.broadcast %11 : vector<1x1024xf32> to vector<128x1024xf32>
    %13 = arith.addf %10, %12 : vector<128x1024xf32>
    %cst_11 = arith.constant 0.000000e+00 : f32
    %14 = vector.broadcast %cst_11 : f32 to vector<128x1024xf32>
    %15 = arith.maximumf %13, %14 : vector<128x1024xf32>
    %16 = arith.truncf %15 : vector<128x1024xf32> to vector<128x1024xbf16>
    %c0_12 = arith.constant 0 : index
    %c0_13 = arith.constant 0 : index
    %17 = vector.load %arg6[%c0_12, %c0_13] : memref<1024x512xbf16, #tpu.memory_space<vmem>>, vector<1024x512xbf16>
    %cst_14 = arith.constant dense<0.000000e+00> : vector<128x512xf32>
    %18 = tpu.matmul %16, %17, %cst_14 {dimension_numbers = #tpu.dot_dimension_numbers<[1], [0], [0], [1], [0, 0, 1, 1], [], []>} : vector<128x1024xbf16>, vector<1024x512xbf16>, vector<128x512xf32> -> vector<128x512xf32>
    %c0_15 = arith.constant 0 : index
    %c0_16 = arith.constant 0 : index
    %19 = vector.load %arg7[%c0_15, %c0_16] : memref<1x512xf32, #tpu.memory_space<vmem>>, vector<1x512xf32>
    %20 = vector.broadcast %19 : vector<1x512xf32> to vector<128x512xf32>
    %21 = arith.addf %18, %20 : vector<128x512xf32>
    %cst_17 = arith.constant 0.000000e+00 : f32
    %22 = vector.broadcast %cst_17 : f32 to vector<128x512xf32>
    %23 = arith.maximumf %21, %22 : vector<128x512xf32>
    %24 = arith.truncf %23 : vector<128x512xf32> to vector<128x512xbf16>
    %c0_18 = arith.constant 0 : index
    %c0_19 = arith.constant 0 : index
    %25 = vector.load %arg8[%c0_18, %c0_19] : memref<512x128xbf16, #tpu.memory_space<vmem>>, vector<512x128xbf16>
    %cst_20 = arith.constant dense<0.000000e+00> : vector<128x128xf32>
    %26 = tpu.matmul %24, %25, %cst_20 {dimension_numbers = #tpu.dot_dimension_numbers<[1], [0], [0], [1], [0, 0, 1, 1], [], []>} : vector<128x512xbf16>, vector<512x128xbf16>, vector<128x128xf32> -> vector<128x128xf32>
    %c0_21 = arith.constant 0 : index
    %c0_22 = arith.constant 0 : index
    %27 = vector.load %arg9[%c0_21, %c0_22] : memref<1x128xf32, #tpu.memory_space<vmem>>, vector<1x128xf32>
    %28 = vector.broadcast %27 : vector<1x128xf32> to vector<128x128xf32>
    %29 = arith.addf %26, %28 : vector<128x128xf32>
    %c0_23 = arith.constant 0 : index
    %c0_24 = arith.constant 0 : index
    %30 = vector.load %arg10[%c0_23, %c0_24] : memref<128x128xf32, #tpu.memory_space<vmem>>, vector<128x128xf32>
    tpu.vector_store %arg10[%c0_23, %c0_24], %29 {strides = array<i32>} : memref<128x128xf32, #tpu.memory_space<vmem>>, vector<128x128xf32>,
    return
  }
  func.func @transform_0(%arg0: i32) -> (i32, i32) {
    %c0_i32 = arith.constant 0 : i32
    %c0_i32_0 = arith.constant 0 : i32
    return %arg0, %c0_i32 : i32, i32
  }
  func.func @transform_1(%arg0: i32) -> (i32, i32) {
    %c0_i32 = arith.constant 0 : i32
    %c0_i32_0 = arith.constant 0 : i32
    %c0_i32_1 = arith.constant 0 : i32
    return %c0_i32, %c0_i32_0 : i32, i32
  }
  func.func @transform_2(%arg0: i32) -> (i32, i32) {
    %c0_i32 = arith.constant 0 : i32
    %c0_i32_0 = arith.constant 0 : i32
    %c0_i32_1 = arith.constant 0 : i32
    return %c0_i32, %c0_i32_0 : i32, i32
  }
  func.func @transform_3(%arg0: i32) -> (i32, i32) {
    %c0_i32 = arith.constant 0 : i32
    %c0_i32_0 = arith.constant 0 : i32
    %c0_i32_1 = arith.constant 0 : i32
    return %c0_i32, %c0_i32_0 : i32, i32
  }
  func.func @transform_4(%arg0: i32) -> (i32, i32) {
    %c0_i32 = arith.constant 0 : i32
    %c0_i32_0 = arith.constant 0 : i32
    %c0_i32_1 = arith.constant 0 : i32
    return %c0_i32, %c0_i32_0 : i32, i32
  }
  func.func @transform_5(%arg0: i32) -> (i32, i32) {
    %c0_i32 = arith.constant 0 : i32
    %c0_i32_0 = arith.constant 0 : i32
    %c0_i32_1 = arith.constant 0 : i32
    return %c0_i32, %c0_i32_0 : i32, i32
  }
  func.func @transform_6(%arg0: i32) -> (i32, i32) {
    %c0_i32 = arith.constant 0 : i32
    %c0_i32_0 = arith.constant 0 : i32
    %c0_i32_1 = arith.constant 0 : i32
    return %c0_i32, %c0_i32_0 : i32, i32
  }
  func.func @transform_7(%arg0: i32) -> (i32, i32) {
    %c0_i32 = arith.constant 0 : i32
    %c0_i32_0 = arith.constant 0 : i32
    %c0_i32_1 = arith.constant 0 : i32
    return %c0_i32, %c0_i32_0 : i32, i32
  }
  func.func @transform_8(%arg0: i32) -> (i32, i32) {
    %c0_i32 = arith.constant 0 : i32
    %c0_i32_0 = arith.constant 0 : i32
    %c0_i32_1 = arith.constant 0 : i32
    return %c0_i32, %c0_i32_0 : i32, i32
  }
  func.func @transform_9(%arg0: i32) -> (i32, i32) {
    %c0_i32 = arith.constant 0 : i32
    %c0_i32_0 = arith.constant 0 : i32
    return %arg0, %c0_i32 : i32, i32
  }
}

</mosaic_0001>

<bundles_post_ra>
// kernel: tpu_custom_call.1
= control target key start
LH: loop header
LB: loop body
LE: loop exit
PB: predicated region body
PF: predicated region fallthrough
CT: control target
= control target key end

     0   :  { %14 = vsyncpa [#allocation3], 0  ;;  %s9314_s0 = inlined_call_operand.vmem [shape: bf16[128,8], index: 0, kind: input, shape index: {}]   ;;  %s9315_s1 = inlined_call_operand.vmem [shape: bf16[8,512], index: 1, kind: input, shape index: {}]   ;;  %s9316_s2 = inlined_call_operand.vmem [shape: f32[1,512], index: 2, kind: input, shape index: {}]   ;;  %s9317_s3 = inlined_call_operand.hbm [shape: bf16[512,1024], index: 3, kind: input, shape index: {}]   ;;  %s9318_s4 = inlined_call_operand.vmem [shape: f32[1,1024], index: 4, kind: input, shape index: {}]   ;;  %s9319_s5 = inlined_call_operand.hbm [shape: bf16[1024,512], index: 5, kind: input, shape index: {}]   ;;  %s9320_s6 = inlined_call_operand.vmem [shape: f32[1,512], index: 6, kind: input, shape index: {}]   ;;  %s9321_s7 = inlined_call_operand.hbm [shape: bf16[512,128], index: 7, kind: input, shape index: {}]   ;;  %s9322_s8 = inlined_call_operand.vmem [shape: f32[1,128], index: 8, kind: input, shape index: {}]   ;;  %s9323_s9 = inlined_call_operand.hbm [shape: f32[128,128], index: 9, kind: output, shape index: {}]  }
   0x1   :  { %15 = vsyncpa [#allocation6], 0 }
   0x2   :  { %16 = vsyncpa [#allocation4], 0  ;;  %s7480_s30 = smov [#allocation5]  }
   0x3   :  { %s42_s10 = sshll.u32 %s7480_s30, 4  ;;  %s43_s10 = int_to_ptr.vmem [resolvable:$true] %s42_s10 }
   0x4   :  { %s7402_s11 = scalar_lea.vmem %s43_s10, 32768  ;;  %p7407_p1 = scmp.lt.s32.totalorder %s43_s10, %s43_s10 }
   0x5   :  { %p7403_p0 = scmp.ne.s32.totalorder %s43_s10, %s7402_s11  ;;  %p7408_p2 = scmp.lt.s32.totalorder %s7402_s11, %s7402_s11 }
   0x7   :  { %p7409_p3 = por %p7408_p2, %p7407_p1 }
   0x9   :  { %p7410_p4 = pnand %p7409_p3, %p7403_p0 }
   0xb   :  { %7413 = shalt.err (!%p7410_p4)
}
   0xc   :  { %s7481_s12 = smov 256   ;;  %s7482_s13 = smov 16  }
   0xd   :  { %48 = dma.hbm_to_vmem [thread:$0]  %s9319_s5, 32768, %s43_s10, [#allocation6], %s7481_s12, %s7481_s12, %s7482_s13  }
   0xe   :  { %s7483_s16 = smov [#allocation2]  }
   0xf   :  { %s28_s17 = sshll.u32 %s7483_s16, 4  ;;  %s29_s17 = int_to_ptr.vmem [resolvable:$true] %s28_s17 }
  0x10   :  { %s7422_s18 = scalar_lea.vmem %s29_s17, 32768  ;;  %p7427_p6 = scmp.lt.s32.totalorder %s29_s17, %s29_s17 }
  0x11   :  { %p7423_p5 = scmp.ne.s32.totalorder %s29_s17, %s7422_s18  ;;  %p7428_p7 = scmp.lt.s32.totalorder %s7422_s18, %s7422_s18 }
  0x13   :  { %p7429_p8 = por %p7428_p7, %p7427_p6 }
  0x15   :  { %p7430_p9 = pnand %p7429_p8, %p7423_p5 }
  0x17   :  { %7433 = shalt.err (!%p7430_p9)
}
  0x18   :  { %s7484_s19 = smov 512   ;;  %s7485_s20 = smov 32  }
  0x19   :  { %34 = dma.hbm_to_vmem [thread:$0]  %s9317_s3, 32768, %s29_s17, [#allocation3], %s7484_s19, %s7484_s19, %s7485_s20  }
  0x1a   :  { %s7486_s23 = smov [#allocation7]  }
  0x1b   :  { %s56_s24 = sshll.u32 %s7486_s23, 4  ;;  %s57_s24 = int_to_ptr.vmem [resolvable:$true] %s56_s24 }
  0x1c   :  { %s7442_s5 = scalar_lea.vmem %s57_s24, 4096  ;;  %p7447_p11 = scmp.lt.s32.totalorder %s57_s24, %s57_s24 }
  0x1d   :  { %p7443_p10 = scmp.ne.s32.totalorder %s57_s24, %s7442_s5  ;;  %p7448_p12 = scmp.lt.s32.totalorder %s7442_s5, %s7442_s5 }
  0x1f   :  { %p7449_p13 = por %p7448_p12, %p7447_p11 }
  0x21   :  { %p7450_p0 = pnand %p7449_p13, %p7443_p10 }
  0x23   :  { %7453 = shalt.err (!%p7450_p0)
}
  0x24   :  { %s7487_s25 = smov 64   ;;  %s7488_s26 = smov 4  }
  0x25   :  { %62 = dma.hbm_to_vmem [thread:$0]  %s9321_s7, 4096, %s57_s24, [#allocation6], %s7487_s25, %s7487_s25, %s7488_s26  }
  0x26   :  { %7474 = dma.done.wait [#allocation3], 32768  }
  0x27   :  { %7475 = vsyncadd [#allocation3], 4294934528 }
  0x28   :  { %7476 = dma.done.wait [#allocation6], 36864  }
  0x29   :  { %7477 = vsyncadd [#allocation6], 4294930432  ;;  %v7489_v0 = vmov 0   ;;  %v91_v1 = vld [vmem:[%s9315_s1] sm:$0xff]  ;;  %vm190_vm0 = vcmask 1043456   ;;  %v92_v2 = vld [vmem:[%s9315_s1 + $0x8] sm:$0xff] }
  0x2a   :  { %235 = vmatprep.mubr.bf16.mxu0 %v7489_v0  ;;  %348 = vmatprep.mubr.bf16.mxu1 %v7489_v0  ;;  %v6257_v3 = vcombine.high %v91_v1, %v91_v1  ;;  %v6259_v4 = vcombine.high %v92_v2, %v92_v2  ;;  %v6256_v5 = vcombine.low %v91_v1, %v91_v1  ;;  %v6968_v9 = vld [vmem:[%s9314_s0] sm:$0xff]   ;;  %vm165_vm1 = vcmask 64512   ;;  %v6969_v11 = vld [vmem:[%s9314_s0 + $0x8] sm:$0xff]   ;;  %v6970_v39 = vld [vmem:[%s9314_s0 + $0x10] sm:$0xff]  }
  0x2b   :  { %v6258_v6 = vcombine.low %v92_v2, %v92_v2  ;;  %v581_v10 = vld [vmem:[#allocation2 + $0x1c0] sm:$0xff]  ;;  %v6971_v54 = vld [vmem:[%s9314_s0 + $0x18] sm:$0xff]  }
  0x2c   :  { %6260 = vmatprep.subr.msk.bf16.mxu0 %vm190_vm0, %v6257_v3  ;;  %6269 = vmatprep.subr.msk.bf16.mxu1 %vm190_vm0, %v6259_v4  ;;  %v192_v7 = vsel %vm190_vm0, %v6256_v5, 0  ;;  %v585_v12 = vld [vmem:[#allocation2 + $0x1e0] sm:$0xff] }
  0x2d   :  { %v198_v8 = vsel %vm190_vm0, %v6258_v6, 0  ;;  %218 = vmatpush1.bf16.msra.mxu0 %v192_v7  ;;  %v709_v13 = vld [vmem:[#allocation2 + $0x5c0] sm:$0xff]  ;;  %v6334_v15 = vcombine.low %v581_v10, %v585_v12  ;;  %v6335_v16 = vcombine.high %v581_v10, %v585_v12 }
  0x2e   :  { %331 = vmatpush1.bf16.msra.mxu1 %v198_v8  ;;  %v713_v14 = vld [vmem:[#allocation2 + $0x5e0] sm:$0xff] }
  0x2f   :  { %v6462_v17 = vcombine.low %v709_v13, %v713_v14  ;;  %v6463_v18 = vcombine.high %v709_v13, %v713_v14  ;;  %v573_v19 = vld [vmem:[#allocation2 + $0x180] sm:$0xff]  ;;  %2103 = vmatprep.subr.bf16.mxu0 %v6335_v16 }
  0x30   :  { %6261 = vmatmul.mubr.msk.bf16.vlgmr.msra.gmra.mxu0 %vm165_vm1, %v6968_v9  ;;  %v577_v20 = vld [vmem:[#allocation2 + $0x1a0] sm:$0xff] }
  0x31   :  { %6270 = vmatmul.mubr.msk.bf16.vlgmr.msra.gmra.mxu1 %vm165_vm1, %v6968_v9  ;;  %245 = vmatprep.mubr.bf16.mxu0 %v7489_v0  ;;  %v701_v21 = vld [vmem:[#allocation2 + $0x580] sm:$0xff]  ;;  %v6327_v22 = vcombine.high %v573_v19, %v577_v20  ;;  %v6326_v29 = vcombine.low %v573_v19, %v577_v20 }
  0x32   :  { %358 = vmatprep.mubr.bf16.mxu1 %v7489_v0  ;;  %v705_v23 = vld [vmem:[#allocation2 + $0x5a0] sm:$0xff]  ;;  %2216 = vmatprep.subr.bf16.mxu1 %v6463_v18 }
  0x33   :  { %v565_v24 = vld [vmem:[#allocation2 + $0x140] sm:$0xff]  ;;  %v6455_v26 = vcombine.high %v701_v21, %v705_v23  ;;  %2104 = vmatpush1.bf16.msra.mxu0 %v6334_v15  ;;  %2217 = vmatpush1.bf16.msra.mxu1 %v6462_v17  ;;  %v6454_v30 = vcombine.low %v701_v21, %v705_v23 }
  0x34   :  { %v569_v25 = vld [vmem:[#allocation2 + $0x160] sm:$0xff]  ;;  %2105 = vmatprep.subr.bf16.mxu0 %v6327_v22 }
  0x35   :  { %v693_v27 = vld [vmem:[#allocation2 + $0x540] sm:$0xff]  ;;  %2218 = vmatprep.subr.bf16.mxu1 %v6455_v26  ;;  %v6319_v31 = vcombine.high %v565_v24, %v569_v25  ;;  %v6318_v37 = vcombine.low %v565_v24, %v569_v25  ;;  %v6973_v25 = vld [vmem:[%s9314_s0 + $0x28] sm:$0xff]  }
  0x36   :  { %v697_v28 = vld [vmem:[#allocation2 + $0x560] sm:$0xff] }
  0x37   :  { %v6447_v32 = vcombine.high %v693_v27, %v697_v28  ;;  %v557_v33 = vld [vmem:[#allocation2 + $0x100] sm:$0xff]  ;;  %2106 = vmatpush1.bf16.msra.mxu0 %v6326_v29  ;;  %2219 = vmatpush1.bf16.msra.mxu1 %v6454_v30  ;;  %v6446_v38 = vcombine.low %v693_v27, %v697_v28 }
  0x38   :  { %6262 = vmatmul.mubr.msk.bf16.gmra.mxu0 %vm165_vm1, %v6969_v11  ;;  %v561_v34 = vld [vmem:[#allocation2 + $0x120] sm:$0xff]  ;;  %2107 = vmatprep.subr.bf16.mxu0 %v6319_v31 }
  0x39   :  { %6271 = vmatmul.mubr.msk.bf16.gmra.mxu1 %vm165_vm1, %v6969_v11  ;;  %v685_v35 = vld [vmem:[#allocation2 + $0x500] sm:$0xff]  ;;  %255 = vmatprep.mubr.bf16.mxu0 %v7489_v0  ;;  %v6311_v40 = vcombine.high %v557_v33, %v561_v34  ;;  %v6310_v46 = vcombine.low %v557_v33, %v561_v34 }
  0x3a   :  { %v689_v36 = vld [vmem:[#allocation2 + $0x520] sm:$0xff]  ;;  %368 = vmatprep.mubr.bf16.mxu1 %v7489_v0  ;;  %2220 = vmatprep.subr.bf16.mxu1 %v6447_v32 }
  0x3b   :  { %v6439_v41 = vcombine.high %v685_v35, %v689_v36  ;;  %v549_v42 = vld [vmem:[#allocation2 + $0xc0] sm:$0xff]  ;;  %2108 = vmatpush1.bf16.msra.mxu0 %v6318_v37  ;;  %2221 = vmatpush1.bf16.msra.mxu1 %v6446_v38  ;;  %v6438_v47 = vcombine.low %v685_v35, %v689_v36 }
  0x3c   :  { %v553_v43 = vld [vmem:[#allocation2 + $0xe0] sm:$0xff]  ;;  %2109 = vmatprep.subr.bf16.mxu0 %v6311_v40 }
  0x3d   :  { %v677_v44 = vld [vmem:[#allocation2 + $0x4c0] sm:$0xff]  ;;  %2222 = vmatprep.subr.bf16.mxu1 %v6439_v41  ;;  %v6303_v48 = vcombine.high %v549_v42, %v553_v43  ;;  %v6302_v55 = vcombine.low %v549_v42, %v553_v43  ;;  %v6974_v42 = vld [vmem:[%s9314_s0 + $0x30] sm:$0xff]  }
  0x3e   :  { %v681_v45 = vld [vmem:[#allocation2 + $0x4e0] sm:$0xff] }
  0x3f   :  { %v6431_v49 = vcombine.high %v677_v44, %v681_v45  ;;  %v541_v50 = vld [vmem:[#allocation2 + $0x80] sm:$0xff]  ;;  %2110 = vmatpush1.bf16.msra.mxu0 %v6310_v46  ;;  %2223 = vmatpush1.bf16.msra.mxu1 %v6438_v47  ;;  %v6430_v56 = vcombine.low %v677_v44, %v681_v45 }
  0x40   :  { %6263 = vmatmul.mubr.msk.bf16.gmra.mxu0 %vm165_vm1, %v6970_v39  ;;  %v545_v51 = vld [vmem:[#allocation2 + $0xa0] sm:$0xff]  ;;  %2111 = vmatprep.subr.bf16.mxu0 %v6303_v48 }
  0x41   :  { %6272 = vmatmul.mubr.msk.bf16.gmra.mxu1 %vm165_vm1, %v6970_v39  ;;  %v669_v52 = vld [vmem:[#allocation2 + $0x480] sm:$0xff]  ;;  %265 = vmatprep.mubr.bf16.mxu0 %v7489_v0  ;;  %v6295_v60 = vcombine.high %v541_v50, %v545_v51  ;;  %v6294_v63 = vcombine.low %v541_v50, %v545_v51 }
  0x42   :  { %v673_v53 = vld [vmem:[#allocation2 + $0x4a0] sm:$0xff]  ;;  %378 = vmatprep.mubr.bf16.mxu1 %v7489_v0  ;;  %2224 = vmatprep.subr.bf16.mxu1 %v6431_v49 }
  0x43   :  { %v533_v57 = vld [vmem:[#allocation2 + $0x40] sm:$0xff]  ;;  %v6423_v61 = vcombine.high %v669_v52, %v673_v53  ;;  %2112 = vmatpush1.bf16.msra.mxu0 %v6302_v55  ;;  %2225 = vmatpush1.bf16.msra.mxu1 %v6430_v56  ;;  %v6422_v1 = vcombine.low %v669_v52, %v673_v53  ;;  %v6975_v55 = vld [vmem:[%s9314_s0 + $0x38] sm:$0xff]  }
  0x44   :  { %v537_v58 = vld [vmem:[#allocation2 + $0x60] sm:$0xff]  ;;  %2113 = vmatprep.subr.bf16.mxu0 %v6295_v60 }
  0x45   :  { %v661_v59 = vld [vmem:[#allocation2 + $0x440] sm:$0xff]  ;;  %2226 = vmatprep.subr.bf16.mxu1 %v6423_v61  ;;  %v6287_v6 = vcombine.high %v533_v57, %v537_v58  ;;  %v6286_v9 = vcombine.low %v533_v57, %v537_v58 }
  0x46   :  { %v665_v62 = vld [vmem:[#allocation2 + $0x460] sm:$0xff] }
  0x47   :  { %v525_v2 = vld [vmem:[#allocation2] sm:$0xff]  ;;  %v6415_v7 = vcombine.high %v661_v59, %v665_v62  ;;  %2114 = vmatpush1.bf16.msra.mxu0 %v6294_v63  ;;  %2227 = vmatpush1.bf16.msra.mxu1 %v6422_v1  ;;  %v6414_v10 = vcombine.low %v661_v59, %v665_v62 }
  0x48   :  { %v529_v3 = vld [vmem:[#allocation2 + $0x20] sm:$0xff]  ;;  %6264 = vmatmul.mubr.msk.bf16.gmra.mxu0 %vm165_vm1, %v6971_v54  ;;  %2115 = vmatprep.subr.bf16.mxu0 %v6287_v6 }
  0x49   :  { %v653_v4 = vld [vmem:[#allocation2 + $0x400] sm:$0xff]  ;;  %6273 = vmatmul.mubr.msk.bf16.gmra.mxu1 %vm165_vm1, %v6971_v54  ;;  %275 = vmatprep.mubr.bf16.mxu0 %v7489_v0  ;;  %v6279_v15 = vcombine.high %v525_v2, %v529_v3  ;;  %v6278_v17 = vcombine.low %v525_v2, %v529_v3 }
  0x4a   :  { %v657_v5 = vld [vmem:[#allocation2 + $0x420] sm:$0xff]  ;;  %388 = vmatprep.mubr.bf16.mxu1 %v7489_v0  ;;  %2228 = vmatprep.subr.bf16.mxu1 %v6415_v7 }
  0x4b   :  { %v6972_v8 = vld [vmem:[%s9314_s0 + $0x20] sm:$0xff]   ;;  %v6407_v16 = vcombine.high %v653_v4, %v657_v5  ;;  %2116 = vmatpush1.bf16.msra.mxu0 %v6286_v9  ;;  %2229 = vmatpush1.bf16.msra.mxu1 %v6414_v10  ;;  %v6406_v18 = vcombine.low %v653_v4, %v657_v5 }
  0x4c   :  { %v645_v11 = vld [vmem:[#allocation2 + $0x3c0] sm:$0xff]  ;;  %2117 = vmatprep.subr.bf16.mxu0 %v6279_v15 }
  0x4d   :  { %v649_v12 = vld [vmem:[#allocation2 + $0x3e0] sm:$0xff]  ;;  %2230 = vmatprep.subr.bf16.mxu1 %v6407_v16 }
  0x4e   :  { %v773_v13 = vld [vmem:[#allocation2 + $0x7c0] sm:$0xff]  ;;  %v6399_v23 = vcombine.high %v645_v11, %v649_v12  ;;  %v6398_v26 = vcombine.low %v645_v11, %v649_v12 }
  0x4f   :  { %v777_v14 = vld [vmem:[#allocation2 + $0x7e0] sm:$0xff]  ;;  %2118 = vmatpush1.bf16.msra.mxu0 %v6278_v17  ;;  %2231 = vmatpush1.bf16.msra.mxu1 %v6406_v18  ;;  %v7614_v18 = vld [vmem:[#allocation2 + $0x1c8] sm:$0xff] }
  0x50   :  { %v637_v19 = vld [vmem:[#allocation2 + $0x380] sm:$0xff]  ;;  %v6527_v24 = vcombine.high %v773_v13, %v777_v14  ;;  %6265 = vmatmul.mubr.msk.bf16.gmra.mxu0 %vm165_vm1, %v6972_v8  ;;  %v6526_v27 = vcombine.low %v773_v13, %v777_v14  ;;  %2119 = vmatprep.subr.bf16.mxu0 %v6399_v23 }
  0x51   :  { %v641_v20 = vld [vmem:[#allocation2 + $0x3a0] sm:$0xff]  ;;  %6274 = vmatmul.mubr.msk.bf16.gmra.mxu1 %vm165_vm1, %v6972_v8  ;;  %285 = vmatprep.mubr.bf16.mxu0 %v7489_v0 }
  0x52   :  { %v765_v21 = vld [vmem:[#allocation2 + $0x780] sm:$0xff]  ;;  %398 = vmatprep.mubr.bf16.mxu1 %v7489_v0  ;;  %2232 = vmatprep.subr.bf16.mxu1 %v6527_v24  ;;  %v6391_v32 = vcombine.high %v637_v19, %v641_v20  ;;  %v6390_v34 = vcombine.low %v637_v19, %v641_v20  ;;  %v7616_v19 = vld [vmem:[#allocation2 + $0x1e8] sm:$0xff] }
  0x53   :  { %v769_v22 = vld [vmem:[#allocation2 + $0x7a0] sm:$0xff]  ;;  %2120 = vmatpush2.bf16.msra.mxu0 %v6398_v26  ;;  %2233 = vmatpush2.bf16.msra.mxu1 %v6526_v27  ;;  %v7618_v20 = vld [vmem:[#allocation2 + $0x5c8] sm:$0xff]  ;;  %v6336_v23 = vcombine.low %v7614_v18, %v7616_v19  ;;  %v95_v26 = vlaneseq }
  0x54   :  { %v629_v28 = vld [vmem:[#allocation2 + $0x340] sm:$0xff]  ;;  %v6519_v33 = vcombine.high %v765_v21, %v769_v22  ;;  %v6518_v35 = vcombine.low %v765_v21, %v769_v22  ;;  %2121 = vmatprep.subr.bf16.mxu0 %v6391_v32  ;;  %v6337_v21 = vcombine.high %v7614_v18, %v7616_v19  ;;  %v7622_v22 = vld [vmem:[#allocation2 + $0x5e8] sm:$0xff] }
  0x55   :  { %v633_v29 = vld [vmem:[#allocation2 + $0x360] sm:$0xff]  ;;  %v6464_v24 = vcombine.low %v7618_v20, %v7622_v22  ;;  %v7630_v27 = vshrl.u32 %v95_v26, 7 }
  0x56   :  { %v757_v30 = vld [vmem:[#allocation2 + $0x740] sm:$0xff]  ;;  %2234 = vmatprep.subr.bf16.mxu1 %v6519_v33  ;;  %v6383_v40 = vcombine.high %v629_v28, %v633_v29  ;;  %v6382_v43 = vcombine.low %v629_v28, %v633_v29 }
  0x57   :  { %v761_v31 = vld [vmem:[#allocation2 + $0x760] sm:$0xff]  ;;  %2122 = vmatpush2.bf16.msra.mxu0 %v6390_v34  ;;  %2235 = vmatpush2.bf16.msra.mxu1 %v6518_v35  ;;  %9344 = vst [vmem:[#allocation12_spill] sm:$0xff] %v7630_v27  ;;  %v7633_v28 = vsub.s32 1, %v7630_v27  ;;  %v7636_v29 = vsub.s32 3, %v7630_v27 }
  0x58   :  { %v621_v36 = vld [vmem:[#allocation2 + $0x300] sm:$0xff]  ;;  %v6511_v41 = vcombine.high %v757_v30, %v761_v31  ;;  %6266 = vmatmul.mubr.msk.bf16.gmra.mxu0 %vm165_vm1, %v6973_v25  ;;  %v6510_v44 = vcombine.low %v757_v30, %v761_v31  ;;  %2123 = vmatprep.subr.bf16.mxu0 %v6383_v40  ;;  %v7639_v30 = vsub.s32 0, %v7630_v27  ;;  %v7642_v31 = vsub.s32 2, %v7630_v27 }
  0x59   :  { %v625_v37 = vld [vmem:[#allocation2 + $0x320] sm:$0xff]  ;;  %6275 = vmatmul.mubr.msk.bf16.gmra.mxu1 %vm165_vm1, %v6973_v25  ;;  %295 = vmatprep.mubr.bf16.mxu0 %v7489_v0  ;;  %v6465_v25 = vcombine.high %v7618_v20, %v7622_v22  ;;  %9345 = vst [vmem:[#allocation13_spill] sm:$0xff] %v7633_v28  ;;  %9346 = vst [vmem:[#allocation14_spill] sm:$0xff] %v7636_v29  ;;  %v7719_v20 = vld [vmem:[#allocation2 + $0x128] sm:$0xff] }
  0x5a   :  { %v749_v38 = vld [vmem:[#allocation2 + $0x700] sm:$0xff]  ;;  %408 = vmatprep.mubr.bf16.mxu1 %v7489_v0  ;;  %2236 = vmatprep.subr.bf16.mxu1 %v6511_v41  ;;  %v6375_v49 = vcombine.high %v621_v36, %v625_v37  ;;  %v6374_v51 = vcombine.low %v621_v36, %v625_v37  ;;  %9347 = vst [vmem:[#allocation15_spill] sm:$0xff] %v7639_v30  ;;  %9348 = vst [vmem:[#allocation16_spill] sm:$0xff] %v7642_v31  ;;  %v7721_v22 = vld [vmem:[#allocation2 + $0x508] sm:$0xff] }
  0x5b   :  { %v753_v39 = vld [vmem:[#allocation2 + $0x720] sm:$0xff]  ;;  %2124 = vmatpush2.bf16.msra.mxu0 %v6382_v43  ;;  %2237 = vmatpush2.bf16.msra.mxu1 %v6510_v44 }
  0x5c   :  { %v613_v45 = vld [vmem:[#allocation2 + $0x2c0] sm:$0xff]  ;;  %v6503_v50 = vcombine.high %v749_v38, %v753_v39  ;;  %v6502_v52 = vcombine.low %v749_v38, %v753_v39  ;;  %2125 = vmatprep.subr.bf16.mxu0 %v6375_v49 }
  0x5d   :  { %v617_v46 = vld [vmem:[#allocation2 + $0x2e0] sm:$0xff] }
  0x5e   :  { %v741_v47 = vld [vmem:[#allocation2 + $0x6c0] sm:$0xff]  ;;  %2238 = vmatprep.subr.bf16.mxu1 %v6503_v50  ;;  %v6367_v53 = vcombine.high %v613_v45, %v617_v46  ;;  %v6366_v56 = vcombine.low %v613_v45, %v617_v46 }
  0x5f   :  { %v745_v48 = vld [vmem:[#allocation2 + $0x6e0] sm:$0xff]  ;;  %2126 = vmatpush2.bf16.msra.mxu0 %v6374_v51  ;;  %2239 = vmatpush2.bf16.msra.mxu1 %v6502_v52 }
  0x60   :  { %v6495_v54 = vcombine.high %v741_v47, %v745_v48  ;;  %6267 = vmatmul.mubr.msk.bf16.gmra.mxu0 %vm165_vm1, %v6974_v42  ;;  %v6494_v57 = vcombine.low %v741_v47, %v745_v48  ;;  %2127 = vmatprep.subr.bf16.mxu0 %v6367_v53  ;;  %v605_v58 = vld [vmem:[#allocation2 + $0x280] sm:$0xff] }
  0x61   :  { %6276 = vmatmul.mubr.msk.bf16.gmra.mxu1 %vm165_vm1, %v6974_v42  ;;  %305 = vmatprep.mubr.bf16.mxu0 %v7489_v0  ;;  %v609_v59 = vld [vmem:[#allocation2 + $0x2a0] sm:$0xff] }
  0x62   :  { %418 = vmatprep.mubr.bf16.mxu1 %v7489_v0  ;;  %2240 = vmatprep.subr.bf16.mxu1 %v6495_v54  ;;  %v733_v60 = vld [vmem:[#allocation2 + $0x680] sm:$0xff]  ;;  %v6359_v0 = vcombine.high %v605_v58, %v609_v59  ;;  %v6358_v62 = vcombine.low %v605_v58, %v609_v59  ;;  %v7669_v58 = vld [vmem:[#allocation2 + $0x1a8] sm:$0xff] }
  0x63   :  { %2128 = vmatpush2.bf16.msra.mxu0 %v6366_v56  ;;  %2241 = vmatpush2.bf16.msra.mxu1 %v6494_v57  ;;  %v737_v61 = vld [vmem:[#allocation2 + $0x6a0] sm:$0xff]  ;;  %v7667_v57 = vld [vmem:[#allocation2 + $0x188] sm:$0xff] }
  0x64   :  { %2129 = vmatprep.subr.bf16.mxu0 %v6359_v0  ;;  %v6486_v63 = vcombine.low %v733_v60, %v737_v61  ;;  %v6487_v1 = vcombine.high %v733_v60, %v737_v61  ;;  %v597_v2 = vld [vmem:[#allocation2 + $0x240] sm:$0xff] }
  0x65   :  { %v601_v3 = vld [vmem:[#allocation2 + $0x260] sm:$0xff] }
  0x66   :  { %v725_v4 = vld [vmem:[#allocation2 + $0x640] sm:$0xff]  ;;  %2242 = vmatprep.subr.bf16.mxu1 %v6487_v1  ;;  %v6351_v5 = vcombine.high %v597_v2, %v601_v3  ;;  %v6350_v7 = vcombine.low %v597_v2, %v601_v3 }
  0x67   :  { %2130 = vmatpush2.bf16.msra.mxu0 %v6358_v62  ;;  %v729_v6 = vld [vmem:[#allocation2 + $0x660] sm:$0xff]  ;;  %2243 = vmatpush2.bf16.msra.mxu1 %v6486_v63  ;;  %v7671_v62 = vld [vmem:[#allocation2 + $0x588] sm:$0xff] }
  0x68   :  { %6268 = vmatmul.mubr.msk.bf16.gmra.mxu0 %vm165_vm1, %v6975_v55  ;;  %v6478_v8 = vcombine.low %v725_v4, %v729_v6  ;;  %v6479_v9 = vcombine.high %v725_v4, %v729_v6  ;;  %2131 = vmatprep.subr.bf16.mxu0 %v6351_v5  ;;  %v589_v10 = vld [vmem:[#allocation2 + $0x200] sm:$0xff]  ;;  %v7673_v63 = vld [vmem:[#allocation2 + $0x5a8] sm:$0xff] }
  0x69   :  { %6277 = vmatmul.mubr.msk.bf16.gmra.mxu1 %vm165_vm1, %v6975_v55  ;;  %v593_v11 = vld [vmem:[#allocation2 + $0x220] sm:$0xff] }
  0x6a   :  { %2244 = vmatprep.subr.bf16.mxu1 %v6479_v9  ;;  %v717_v12 = vld [vmem:[#allocation2 + $0x600] sm:$0xff]  ;;  %v6343_v13 = vcombine.high %v589_v10, %v593_v11  ;;  %v6342_v15 = vcombine.low %v589_v10, %v593_v11 }
  0x6b   :  { %2132 = vmatpush2.bf16.msra.mxu0 %v6350_v7  ;;  %2245 = vmatpush2.bf16.msra.mxu1 %v6478_v8  ;;  %v721_v14 = vld [vmem:[#allocation2 + $0x620] sm:$0xff]  ;;  %v6329_v7 = vcombine.high %v7667_v57, %v7669_v58 }
  0x6c   :  { %v6470_v16 = vcombine.low %v717_v12, %v721_v14  ;;  %v6471_v17 = vcombine.high %v717_v12, %v721_v14  ;;  %2133 = vmatprep.subr.bf16.mxu0 %v6343_v13  ;;  %v93_v32 = vld [vmem:[%s9316_s2] sm:$0xf]  ;;  %v6457_v13 = vcombine.high %v7671_v62, %v7673_v63 }
  0x6d   :  { %v7648_v35 = vrot.slane %v93_v32, %v7633_v28  ;;  %v7651_v36 = vrot.slane %v93_v32, %v7636_v29  ;;  %v7654_v37 = vrot.slane %v93_v32, %v7639_v30  ;;  %v7657_v38 = vrot.slane %v93_v32, %v7642_v31 }
  0x6e   :  { %2246 = vmatprep.subr.bf16.mxu1 %v6471_v17  ;;  %v7693_v17 = vld [vmem:[#allocation2 + $0x148] sm:$0xff] }
  0x6f   :  { %2134 = vmatpush2.bf16.msra.mxu0 %v6342_v15  ;;  %2247 = vmatpush2.bf16.msra.mxu1 %v6470_v16 }
  0x70   :  { %2329 = vmatprep.subr.bf16.mxu0 %v6337_v21  ;;  %2442 = vmatprep.subr.bf16.mxu1 %v6465_v25  ;;  %v7695_v21 = vld [vmem:[#allocation2 + $0x168] sm:$0xff] }
  0x71   :  { %v6320_v18 = vcombine.low %v7693_v17, %v7695_v21  ;;  %v6321_v19 = vcombine.high %v7693_v17, %v7695_v21 }
  0xf0   :  { %v237_v33 = vpop.f32.mrf.mxu0 }
  0xf1   :  { %v350_v34 = vpop.f32.mrf.mxu1  ;;  %v238_v47 = vadd.f32 %v237_v33, %v7654_v37 }
  0xf2   :  { %v239_v39 = vpop.f32.mrf.mxu0  ;;  %v351_v48 = vadd.f32 %v350_v34, %v7657_v38  ;;  %v6328_v34 = vcombine.low %v7667_v57, %v7669_v58 }
  0xf3   :  { %v352_v40 = vpop.f32.mrf.mxu1  ;;  %v240_v43 = vadd.f32 %v239_v39, %v7648_v35  ;;  %v429_v1 = vmax.f32 %v238_v47, 0.0 }
  0xf4   :  { %v241_v41 = vpop.f32.mrf.mxu0  ;;  %v353_v44 = vadd.f32 %v352_v40, %v7651_v36  ;;  %v431_v2 = vmax.f32 %v351_v48, 0.0 }
  0xf5   :  { %v354_v42 = vpop.f32.mrf.mxu1  ;;  %v242_v45 = vadd.f32 %v241_v41, %v7654_v37  ;;  %v430_v59 = vmax.f32 %v240_v43, 0.0  ;;  %v6456_v41 = vcombine.low %v7671_v62, %v7673_v63  ;;  %v698_v43 = vld [vmem:[#allocation2 + $0x568] sm:$0xff] }
  0xf6   :  { %v355_v46 = vadd.f32 %v354_v42, %v7657_v38  ;;  %v243_v49 = vpop.f32.mrf.mxu0  ;;  %v432_v60 = vmax.f32 %v353_v44, 0.0  ;;  %v694_v42 = vld [vmem:[#allocation2 + $0x548] sm:$0xff] }
  0xf7   :  { %v356_v50 = vpop.f32.mrf.mxu1  ;;  %v244_v51 = vadd.f32 %v243_v49, %v7648_v35  ;;  %v433_v53 = vmax.f32 %v242_v45, 0.0  ;;  %v7713_v44 = vld [vmem:[#allocation2 + $0x108] sm:$0xff]  ;;  %v6449_v57 = vcombine.high %v694_v42, %v698_v43 }
  0xf8   :  { %v357_v52 = vadd.f32 %v356_v50, %v7651_v36  ;;  %v435_v54 = vmax.f32 %v355_v46, 0.0  ;;  %v247_v55 = vpop.f32.mrf.mxu0 }
  0xf9   :  { %v360_v56 = vpop.f32.mrf.mxu1  ;;  %v434_v0 = vmax.f32 %v244_v51, 0.0  ;;  %v7681_v8 = vpack.c.bf16 %v433_v53, %v429_v1  ;;  %v248_v25 = vadd.f32 %v247_v55, %v7654_v37 }
  0xfa   :  { %v436_v61 = vmax.f32 %v357_v52, 0.0  ;;  %v249_v3 = vpop.f32.mrf.mxu0  ;;  %v7683_v9 = vpack.c.bf16 %v435_v54, %v431_v2  ;;  %v361_v26 = vadd.f32 %v360_v56, %v7657_v38  ;;  %v6448_v56 = vcombine.low %v694_v42, %v698_v43 }
  0xfb   :  { %v362_v4 = vpop.f32.mrf.mxu1  ;;  %v7675_v5 = vpack.c.bf16 %v434_v0, %v430_v59  ;;  %v250_v10 = vadd.f32 %v249_v3, %v7648_v35  ;;  %v437_v52 = vmax.f32 %v248_v25, 0.0 }
  0xfc   :  { %v7677_v6 = vpack.c.bf16 %v436_v61, %v432_v60  ;;  %v251_v11 = vpop.f32.mrf.mxu0  ;;  %v363_v14 = vadd.f32 %v362_v4, %v7651_v36  ;;  %v439_v53 = vmax.f32 %v361_v26, 0.0  ;;  %v6313_v60 = vcombine.high %v7713_v44, %v7719_v20  ;;  %v678_v26 = vld [vmem:[#allocation2 + $0x4c8] sm:$0xff] }
  0xfd   :  { %v364_v12 = vpop.f32.mrf.mxu1  ;;  %v252_v15 = vadd.f32 %v251_v11, %v7654_v37  ;;  %2135 = vmatprep.mubr.bf16.mxu0 %v7675_v5  ;;  %v7745_v11 = vld [vmem:[#allocation2 + $0xe8] sm:$0xff] }
  0xfe   :  { %v365_v16 = vadd.f32 %v364_v12, %v7657_v38  ;;  %2248 = vmatprep.mubr.bf16.mxu1 %v7677_v6  ;;  %v253_v32 = vpop.f32.mrf.mxu0  ;;  %2136 = vmatmul.mubr.bf16.vlgmr.msra.gmra.mxu0 %v7681_v8  ;;  %v440_v49 = vmax.f32 %v363_v14, 0.0 }
  0xff   :  { %v366_v33 = vpop.f32.mrf.mxu1  ;;  %2249 = vmatmul.mubr.bf16.vlgmr.msra.gmra.mxu1 %v7683_v9  ;;  %v254_v39 = vadd.f32 %v253_v32, %v7648_v35  ;;  %2330 = vmatpush1.bf16.msra.mxu0 %v6336_v23  ;;  %v441_v45 = vmax.f32 %v252_v15, 0.0  ;;  %v7723_v23 = vld [vmem:[#allocation2 + $0x528] sm:$0xff] }
 0x100   :  { %v367_v40 = vadd.f32 %v366_v33, %v7651_v36  ;;  %2443 = vmatpush1.bf16.msra.mxu1 %v6464_v24  ;;  %v443_v46 = vmax.f32 %v365_v16, 0.0  ;;  %v257_v47 = vpop.f32.mrf.mxu0  ;;  %2331 = vmatprep.subr.bf16.mxu0 %v6329_v7  ;;  %v438_v24 = vmax.f32 %v250_v10, 0.0  ;;  %v6441_v0 = vcombine.high %v7721_v22, %v7723_v23  ;;  %v7743_v10 = vld [vmem:[#allocation2 + $0xc8] sm:$0xff] }
 0x101   :  { %v370_v48 = vpop.f32.mrf.mxu1  ;;  %2444 = vmatprep.subr.bf16.mxu1 %v6457_v13  ;;  %v442_v50 = vmax.f32 %v254_v39, 0.0  ;;  %v7733_v61 = vpack.c.bf16 %v441_v45, %v437_v52  ;;  %v258_v12 = vadd.f32 %v257_v47, %v7654_v37  ;;  %v6312_v16 = vcombine.low %v7713_v44, %v7719_v20  ;;  %v682_v32 = vld [vmem:[#allocation2 + $0x4e8] sm:$0xff] }
 0x102   :  { %v444_v51 = vmax.f32 %v367_v40, 0.0  ;;  %v259_v54 = vpop.f32.mrf.mxu0  ;;  %v7735_v62 = vpack.c.bf16 %v443_v46, %v439_v53  ;;  %v371_v13 = vadd.f32 %v370_v48, %v7657_v38  ;;  %v6440_v25 = vcombine.low %v7721_v22, %v7723_v23  ;;  %v7757_v33 = vld [vmem:[#allocation2 + $0x88] sm:$0xff] }
 0x103   :  { %v372_v55 = vpop.f32.mrf.mxu1  ;;  %v7725_v58 = vpack.c.bf16 %v442_v50, %v438_v24  ;;  %2332 = vmatpush1.bf16.msra.mxu0 %v6328_v34  ;;  %v260_v63 = vadd.f32 %v259_v54, %v7648_v35  ;;  %v6304_v42 = vcombine.low %v7743_v10, %v7745_v11  ;;  %v6305_v43 = vcombine.high %v7743_v10, %v7745_v11  ;;  %v7763_v44 = vld [vmem:[#allocation2 + $0xa8] sm:$0xff] }
 0x104   :  { %v7727_v59 = vpack.c.bf16 %v444_v51, %v440_v49  ;;  %2445 = vmatpush1.bf16.msra.mxu1 %v6456_v41  ;;  %v261_v1 = vpop.f32.mrf.mxu0  ;;  %2333 = vmatprep.subr.bf16.mxu0 %v6321_v19  ;;  %v373_v3 = vadd.f32 %v372_v55, %v7651_v36  ;;  %v7765_v45 = vld [vmem:[#allocation2 + $0x488] sm:$0xff]  ;;  %v445_v20 = vmax.f32 %v258_v12, 0.0  ;;  %v447_v22 = vmax.f32 %v371_v13, 0.0 }
 0x105   :  { %v374_v2 = vpop.f32.mrf.mxu1  ;;  %v262_v4 = vadd.f32 %v261_v1, %v7654_v37  ;;  %2145 = vmatprep.mubr.bf16.mxu0 %v7725_v58  ;;  %2446 = vmatprep.subr.bf16.mxu1 %v6449_v57  ;;  %v7767_v46 = vld [vmem:[#allocation2 + $0x4a8] sm:$0xff]  ;;  %v446_v47 = vmax.f32 %v260_v63, 0.0  ;;  %v6432_v49 = vcombine.low %v678_v26, %v682_v32  ;;  %v6433_v50 = vcombine.high %v678_v26, %v682_v32 }
 0x106   :  { %v375_v7 = vadd.f32 %v374_v2, %v7657_v38  ;;  %2258 = vmatprep.mubr.bf16.mxu1 %v7727_v59  ;;  %v263_v14 = vpop.f32.mrf.mxu0  ;;  %2146 = vmatmul.mubr.bf16.gmra.mxu0 %v7733_v61  ;;  %v448_v48 = vmax.f32 %v373_v3, 0.0  ;;  %v6297_v53 = vcombine.high %v7757_v33, %v7763_v44  ;;  %v6425_v54 = vcombine.high %v7765_v45, %v7767_v46  ;;  %v7787_v3 = vld [vmem:[#allocation2 + $0x48] sm:$0xff] }
 0x107   :  { %v376_v15 = vpop.f32.mrf.mxu1  ;;  %2259 = vmatmul.mubr.bf16.gmra.mxu1 %v7735_v62  ;;  %v264_v17 = vadd.f32 %v263_v14, %v7648_v35  ;;  %2334 = vmatpush1.bf16.msra.mxu0 %v6320_v18  ;;  %v449_v34 = vmax.f32 %v262_v4, 0.0  ;;  %v7789_v4 = vld [vmem:[#allocation2 + $0x68] sm:$0xff]  ;;  %v6296_v13 = vcombine.low %v7757_v33, %v7763_v44 }
 0x108   :  { %v377_v21 = vadd.f32 %v376_v15, %v7651_v36  ;;  %v451_v39 = vmax.f32 %v375_v7, 0.0  ;;  %2447 = vmatpush1.bf16.msra.mxu1 %v6448_v56  ;;  %v267_v40 = vpop.f32.mrf.mxu0  ;;  %2335 = vmatprep.subr.bf16.mxu0 %v6313_v60  ;;  %v6288_v33 = vcombine.low %v7787_v3, %v7789_v4 }
 0x109   :  { %v380_v41 = vpop.f32.mrf.mxu1  ;;  %v450_v18 = vmax.f32 %v264_v17, 0.0  ;;  %2448 = vmatprep.subr.bf16.mxu1 %v6441_v0  ;;  %v7777_v55 = vpack.c.bf16 %v449_v34, %v445_v20  ;;  %v268_v7 = vadd.f32 %v267_v40, %v7654_v37  ;;  %v662_v17 = vld [vmem:[#allocation2 + $0x448] sm:$0xff]  ;;  %v6289_v40 = vcombine.high %v7787_v3, %v7789_v4 }
 0x10a   :  { %v452_v19 = vmax.f32 %v377_v21, 0.0  ;;  %v269_v23 = vpop.f32.mrf.mxu0  ;;  %v7779_v56 = vpack.c.bf16 %v451_v39, %v447_v22  ;;  %v381_v10 = vadd.f32 %v380_v41, %v7657_v38  ;;  %v666_v21 = vld [vmem:[#allocation2 + $0x468] sm:$0xff] }
 0x10b   :  { %v382_v24 = vpop.f32.mrf.mxu1  ;;  %v7769_v51 = vpack.c.bf16 %v450_v18, %v446_v47  ;;  %2336 = vmatpush1.bf16.msra.mxu0 %v6312_v16  ;;  %v270_v57 = vadd.f32 %v269_v23, %v7648_v35  ;;  %v6424_v16 = vcombine.low %v7765_v45, %v7767_v46  ;;  %v7807_v41 = vld [vmem:[#allocation2 + $0x28] sm:$0xff]  ;;  %v6416_v22 = vcombine.low %v662_v17, %v666_v21 }
 0x10c   :  { %v7771_v52 = vpack.c.bf16 %v452_v19, %v448_v48  ;;  %2449 = vmatpush1.bf16.msra.mxu1 %v6440_v25  ;;  %v271_v60 = vpop.f32.mrf.mxu0  ;;  %2337 = vmatprep.subr.bf16.mxu0 %v6305_v43  ;;  %v383_v63 = vadd.f32 %v382_v24, %v7651_v36  ;;  %v7801_v25 = vld [vmem:[#allocation2 + $0x8] sm:$0xff]  ;;  %v453_v48 = vmax.f32 %v268_v7, 0.0  ;;  %v455_v18 = vmax.f32 %v381_v10, 0.0 }
 0x10d   :  { %v384_v0 = vpop.f32.mrf.mxu1  ;;  %v272_v1 = vadd.f32 %v271_v60, %v7654_v37  ;;  %2155 = vmatprep.mubr.bf16.mxu0 %v7769_v51  ;;  %2450 = vmatprep.subr.bf16.mxu1 %v6433_v50  ;;  %v7811_v43 = vld [vmem:[#allocation2 + $0x428] sm:$0xff]  ;;  %v454_v44 = vmax.f32 %v270_v57, 0.0  ;;  %v6417_v23 = vcombine.high %v662_v17, %v666_v21  ;;  %v6281_v50 = vcombine.high %v7801_v25, %v7807_v41 }
 0x10e   :  { %v385_v2 = vadd.f32 %v384_v0, %v7657_v38  ;;  %2268 = vmatprep.mubr.bf16.mxu1 %v7771_v52  ;;  %v273_v11 = vpop.f32.mrf.mxu0  ;;  %2156 = vmatmul.mubr.bf16.gmra.mxu0 %v7777_v55  ;;  %v456_v45 = vmax.f32 %v383_v63, 0.0  ;;  %v7831_v4 = vld [vmem:[#allocation2 + $0x3c8] sm:$0xff] }
 0x10f   :  { %v386_v12 = vpop.f32.mrf.mxu1  ;;  %2269 = vmatmul.mubr.bf16.gmra.mxu1 %v7779_v56  ;;  %v274_v14 = vadd.f32 %v273_v11, %v7648_v35  ;;  %2338 = vmatpush1.bf16.msra.mxu0 %v6304_v42  ;;  %v457_v26 = vmax.f32 %v272_v1, 0.0  ;;  %v7809_v42 = vld [vmem:[#allocation2 + $0x408] sm:$0xff] }
 0x110   :  { %v387_v15 = vadd.f32 %v386_v12, %v7651_v36  ;;  %v459_v32 = vmax.f32 %v385_v2, 0.0  ;;  %2451 = vmatpush1.bf16.msra.mxu1 %v6432_v49  ;;  %v277_v34 = vpop.f32.mrf.mxu0  ;;  %2339 = vmatprep.subr.bf16.mxu0 %v6297_v53  ;;  %v6409_v53 = vcombine.high %v7809_v42, %v7811_v43  ;;  %v7833_v7 = vld [vmem:[#allocation2 + $0x3e8] sm:$0xff]  ;;  %v6408_v17 = vcombine.low %v7809_v42, %v7811_v43 }
 0x111   :  { %v390_v39 = vpop.f32.mrf.mxu1  ;;  %v458_v46 = vmax.f32 %v274_v14, 0.0  ;;  %2452 = vmatprep.subr.bf16.mxu1 %v6425_v54  ;;  %v7821_v57 = vpack.c.bf16 %v457_v26, %v453_v48  ;;  %v278_v10 = vadd.f32 %v277_v34, %v7654_v37  ;;  %v6280_v14 = vcombine.low %v7801_v25, %v7807_v41  ;;  %v774_v21 = vld [vmem:[#allocation2 + $0x7c8] sm:$0xff] }
 0x112   :  { %v460_v47 = vmax.f32 %v387_v15, 0.0  ;;  %v279_v19 = vpop.f32.mrf.mxu0  ;;  %v7823_v54 = vpack.c.bf16 %v459_v32, %v455_v18  ;;  %v391_v11 = vadd.f32 %v390_v39, %v7657_v38  ;;  %v778_v26 = vld [vmem:[#allocation2 + $0x7e8] sm:$0xff]  ;;  %v6400_v25 = vcombine.low %v7831_v4, %v7833_v7 }
 0x113   :  { %v392_v20 = vpop.f32.mrf.mxu1  ;;  %v7813_v24 = vpack.c.bf16 %v458_v46, %v454_v44  ;;  %2340 = vmatpush1.bf16.msra.mxu0 %v6296_v13  ;;  %v280_v60 = vadd.f32 %v279_v19, %v7648_v35  ;;  %v7845_v32 = vld [vmem:[#allocation2 + $0x388] sm:$0xff]  ;;  %v461_v18 = vmax.f32 %v278_v10, 0.0 }
 0x114   :  { %v7815_v49 = vpack.c.bf16 %v460_v47, %v456_v45  ;;  %2453 = vmatpush1.bf16.msra.mxu1 %v6424_v16  ;;  %v281_v0 = vpop.f32.mrf.mxu0  ;;  %2341 = vmatprep.subr.bf16.mxu0 %v6289_v40  ;;  %v393_v1 = vadd.f32 %v392_v20, %v7651_v36  ;;  %v7851_v41 = vld [vmem:[#allocation2 + $0x3a8] sm:$0xff]  ;;  %v463_v19 = vmax.f32 %v391_v11, 0.0 }
 0x115   :  { %v394_v63 = vpop.f32.mrf.mxu1  ;;  %v282_v2 = vadd.f32 %v281_v0, %v7654_v37  ;;  %2165 = vmatprep.mubr.bf16.mxu0 %v7813_v24  ;;  %2454 = vmatprep.subr.bf16.mxu1 %v6417_v23  ;;  %v7853_v45 = vld [vmem:[#allocation2 + $0x788] sm:$0xff]  ;;  %v462_v43 = vmax.f32 %v280_v60, 0.0  ;;  %v6528_v23 = vcombine.low %v774_v21, %v778_v26 }
 0x116   :  { %v395_v3 = vadd.f32 %v394_v63, %v7657_v38  ;;  %2278 = vmatprep.mubr.bf16.mxu1 %v7815_v49  ;;  %v283_v12 = vpop.f32.mrf.mxu0  ;;  %2166 = vmatmul.mubr.bf16.gmra.mxu0 %v7821_v57  ;;  %v7855_v42 = vld [vmem:[#allocation2 + $0x7a8] sm:$0xff]  ;;  %v464_v46 = vmax.f32 %v393_v1, 0.0 }
 0x117   :  { %v396_v13 = vpop.f32.mrf.mxu1  ;;  %2279 = vmatmul.mubr.bf16.gmra.mxu1 %v7823_v54  ;;  %v284_v15 = vadd.f32 %v283_v12, %v7648_v35  ;;  %2342 = vmatpush1.bf16.msra.mxu0 %v6288_v33  ;;  %v465_v34 = vmax.f32 %v282_v2, 0.0  ;;  %v6401_v33 = vcombine.high %v7831_v4, %v7833_v7  ;;  %v6393_v2 = vcombine.high %v7845_v32, %v7851_v41 }
 0x118   :  { %v397_v16 = vadd.f32 %v396_v13, %v7651_v36  ;;  %v467_v39 = vmax.f32 %v395_v3, 0.0  ;;  %2455 = vmatpush1.bf16.msra.mxu1 %v6416_v22  ;;  %v287_v40 = vpop.f32.mrf.mxu0  ;;  %2343 = vmatprep.subr.bf16.mxu0 %v6281_v50  ;;  %v6529_v50 = vcombine.high %v774_v21, %v778_v26  ;;  %v6521_v60 = vcombine.high %v7853_v45, %v7855_v42  ;;  %v7875_v13 = vld [vmem:[#allocation2 + $0x348] sm:$0xff] }
 0x119   :  { %v400_v44 = vpop.f32.mrf.mxu1  ;;  %v466_v47 = vmax.f32 %v284_v15, 0.0  ;;  %2456 = vmatprep.subr.bf16.mxu1 %v6409_v53  ;;  %v7865_v1 = vpack.c.bf16 %v465_v34, %v461_v18  ;;  %v288_v15 = vadd.f32 %v287_v40, %v7654_v37  ;;  %v6392_v26 = vcombine.low %v7845_v32, %v7851_v41  ;;  %v7895_v41 = vld [vmem:[#allocation2 + $0x328] sm:$0xff] }
 0x11a   :  { %v468_v48 = vmax.f32 %v397_v16, 0.0  ;;  %v289_v20 = vpop.f32.mrf.mxu0  ;;  %v7867_v53 = vpack.c.bf16 %v467_v39, %v463_v19  ;;  %v401_v16 = vadd.f32 %v400_v44, %v7657_v38  ;;  %v6520_v40 = vcombine.low %v7853_v45, %v7855_v42  ;;  %v762_v44 = vld [vmem:[#allocation2 + $0x768] sm:$0xff] }
 0x11b   :  { %v402_v22 = vpop.f32.mrf.mxu1  ;;  %v7857_v0 = vpack.c.bf16 %v466_v47, %v462_v43  ;;  %2344 = vmatpush1.bf16.msra.mxu0 %v6280_v14  ;;  %v290_v3 = vadd.f32 %v289_v20, %v7648_v35  ;;  %v7877_v14 = vld [vmem:[#allocation2 + $0x368] sm:$0xff] }
 0x11c   :  { %v7859_v63 = vpack.c.bf16 %v468_v48, %v464_v46  ;;  %2457 = vmatpush1.bf16.msra.mxu1 %v6408_v17  ;;  %v291_v4 = vpop.f32.mrf.mxu0  ;;  %2345 = vmatprep.subr.bf16.mxu0 %v6401_v33  ;;  %v403_v10 = vadd.f32 %v402_v22, %v7651_v36  ;;  %v758_v33 = vld [vmem:[#allocation2 + $0x748] sm:$0xff]  ;;  %v6384_v32 = vcombine.low %v7875_v13, %v7877_v14 }
 0x11d   :  { %v404_v7 = vpop.f32.mrf.mxu1  ;;  %v292_v11 = vadd.f32 %v291_v4, %v7654_v37  ;;  %2175 = vmatprep.mubr.bf16.mxu0 %v7857_v0  ;;  %2458 = vmatprep.subr.bf16.mxu1 %v6529_v50  ;;  %v7889_v43 = vld [vmem:[#allocation2 + $0x308] sm:$0xff]  ;;  %v470_v42 = vmax.f32 %v290_v3, 0.0  ;;  %v471_v4 = vmax.f32 %v401_v16, 0.0 }
 0x11e   :  { %v405_v12 = vadd.f32 %v404_v7, %v7657_v38  ;;  %2288 = vmatprep.mubr.bf16.mxu1 %v7859_v63  ;;  %v293_v17 = vpop.f32.mrf.mxu0  ;;  %2176 = vmatmul.mubr.bf16.gmra.mxu0 %v7865_v1  ;;  %v7897_v19 = vld [vmem:[#allocation2 + $0x708] sm:$0xff]  ;;  %v472_v20 = vmax.f32 %v403_v10, 0.0 }
 0x11f   :  { %v406_v21 = vpop.f32.mrf.mxu1  ;;  %2289 = vmatmul.mubr.bf16.gmra.mxu1 %v7867_v53  ;;  %v294_v34 = vadd.f32 %v293_v17, %v7648_v35  ;;  %2346 = vmatpush2.bf16.msra.mxu0 %v6400_v25  ;;  %v473_v46 = vmax.f32 %v292_v11, 0.0  ;;  %v6385_v25 = vcombine.high %v7875_v13, %v7877_v14  ;;  %v7899_v45 = vld [vmem:[#allocation2 + $0x728] sm:$0xff]  ;;  %v6512_v11 = vcombine.low %v758_v33, %v762_v44 }
 0x120   :  { %v407_v39 = vadd.f32 %v406_v21, %v7651_v36  ;;  %v475_v47 = vmax.f32 %v405_v12, 0.0  ;;  %2459 = vmatpush2.bf16.msra.mxu1 %v6528_v23  ;;  %v297_v48 = vpop.f32.mrf.mxu0  ;;  %2347 = vmatprep.subr.bf16.mxu0 %v6393_v2  ;;  %v469_v23 = vmax.f32 %v288_v15, 0.0  ;;  %v6513_v12 = vcombine.high %v758_v33, %v762_v44  ;;  %v7919_v33 = vld [vmem:[#allocation2 + $0x2c8] sm:$0xff] }
 0x121   :  { %v410_v18 = vpop.f32.mrf.mxu1  ;;  %v474_v22 = vmax.f32 %v294_v34, 0.0  ;;  %2460 = vmatprep.subr.bf16.mxu1 %v6521_v60  ;;  %v6377_v14 = vcombine.high %v7889_v43, %v7895_v41  ;;  %v6505_v3 = vcombine.high %v7897_v19, %v7899_v45  ;;  %v7921_v44 = vld [vmem:[#allocation2 + $0x2e8] sm:$0xff] }
 0x122   :  { %v476_v50 = vmax.f32 %v407_v39, 0.0  ;;  %v299_v2 = vpop.f32.mrf.mxu0  ;;  %v7909_v10 = vpack.c.bf16 %v473_v46, %v469_v23  ;;  %v7911_v60 = vpack.c.bf16 %v475_v47, %v471_v4  ;;  %v298_v46 = vadd.f32 %v297_v48, %v7654_v37  ;;  %v7933_v23 = vld [vmem:[#allocation2 + $0x288] sm:$0xff] }
 0x123   :  { %v412_v7 = vpop.f32.mrf.mxu1  ;;  %v7901_v17 = vpack.c.bf16 %v474_v22, %v470_v42  ;;  %2348 = vmatpush2.bf16.msra.mxu0 %v6392_v26  ;;  %v300_v15 = vadd.f32 %v299_v2, %v7648_v35  ;;  %v6376_v42 = vcombine.low %v7889_v43, %v7895_v41  ;;  %v6504_v48 = vcombine.low %v7897_v19, %v7899_v45  ;;  %v7939_v41 = vld [vmem:[#allocation2 + $0x2a8] sm:$0xff] }
 0x124   :  { %v7903_v13 = vpack.c.bf16 %v476_v50, %v472_v20  ;;  %2461 = vmatpush2.bf16.msra.mxu1 %v6520_v40  ;;  %v301_v16 = vpop.f32.mrf.mxu0  ;;  %2349 = vmatprep.subr.bf16.mxu0 %v6385_v25  ;;  %v413_v34 = vadd.f32 %v412_v7, %v7651_v36  ;;  %v411_v40 = vadd.f32 %v410_v18, %v7657_v38  ;;  %v742_v50 = vld [vmem:[#allocation2 + $0x6c8] sm:$0xff] }
 0x125   :  { %v414_v21 = vpop.f32.mrf.mxu1  ;;  %v302_v26 = vadd.f32 %v301_v16, %v7654_v37  ;;  %2185 = vmatprep.mubr.bf16.mxu0 %v7901_v17  ;;  %2462 = vmatprep.subr.bf16.mxu1 %v6513_v12  ;;  %v746_v18 = vld [vmem:[#allocation2 + $0x6e8] sm:$0xff]  ;;  %v6368_v43 = vcombine.low %v7919_v33, %v7921_v44  ;;  %v478_v45 = vmax.f32 %v300_v15, 0.0 }
 0x126   :  { %v415_v39 = vadd.f32 %v414_v21, %v7657_v38  ;;  %2298 = vmatprep.mubr.bf16.mxu1 %v7903_v13  ;;  %v303_v47 = vpop.f32.mrf.mxu0  ;;  %2186 = vmatmul.mubr.bf16.gmra.mxu0 %v7909_v10  ;;  %v7941_v12 = vld [vmem:[#allocation2 + $0x688] sm:$0xff]  ;;  %v480_v21 = vmax.f32 %v413_v34, 0.0  ;;  %v6496_v27 = vcombine.low %v742_v50, %v746_v18  ;;  %v6497_v31 = vcombine.high %v742_v50, %v746_v18 }
 0x127   :  { %v416_v25 = vpop.f32.mrf.mxu1  ;;  %2299 = vmatmul.mubr.bf16.gmra.mxu1 %v7911_v60  ;;  %v304_v20 = vadd.f32 %v303_v47, %v7648_v35  ;;  %2350 = vmatpush2.bf16.msra.mxu0 %v6384_v32  ;;  %v481_v4 = vmax.f32 %v302_v26, 0.0  ;;  %v6369_v32 = vcombine.high %v7919_v33, %v7921_v44  ;;  %v7943_v19 = vld [vmem:[#allocation2 + $0x6a8] sm:$0xff]  ;;  %v479_v47 = vmax.f32 %v411_v40, 0.0 }
 0x128   :  { %v417_v22 = vadd.f32 %v416_v25, %v7651_v36  ;;  %v483_v2 = vmax.f32 %v415_v39, 0.0  ;;  %2463 = vmatpush2.bf16.msra.mxu1 %v6512_v11  ;;  %v307_v7 = vpop.f32.mrf.mxu0  ;;  %2351 = vmatprep.subr.bf16.mxu0 %v6377_v14  ;;  %v477_v11 = vmax.f32 %v298_v46, 0.0  ;;  %v6361_v44 = vcombine.high %v7933_v23, %v7939_v41  ;;  %v598_v18 = vld [vmem:[#allocation2 + $0x248] sm:$0xff] }
 0x129   :  { %v420_v16 = vpop.f32.mrf.mxu1  ;;  %v482_v26 = vmax.f32 %v304_v20, 0.0  ;;  %2464 = vmatprep.subr.bf16.mxu1 %v6505_v3  ;;  %v6489_v15 = vcombine.high %v7941_v12, %v7943_v19 }
 0x12a   :  { %v484_v39 = vmax.f32 %v417_v22, 0.0  ;;  %v309_v14 = vpop.f32.mrf.mxu0  ;;  %v7953_v34 = vpack.c.bf16 %v481_v4, %v477_v11  ;;  %v7955_v3 = vpack.c.bf16 %v483_v2, %v479_v47  ;;  %v602_v4 = vld [vmem:[#allocation2 + $0x268] sm:$0xff]  ;;  %v308_v2 = vadd.f32 %v307_v7, %v7654_v37 }
 0x12b   :  { %v422_v25 = vpop.f32.mrf.mxu1  ;;  %v7945_v29 = vpack.c.bf16 %v482_v26, %v478_v45  ;;  %2352 = vmatpush2.bf16.msra.mxu0 %v6376_v42  ;;  %v310_v46 = vadd.f32 %v309_v14, %v7648_v35  ;;  %v421_v45 = vadd.f32 %v420_v16, %v7657_v38  ;;  %v726_v7 = vld [vmem:[#allocation2 + $0x648] sm:$0xff] }
 0x12c   :  { %v7947_v33 = vpack.c.bf16 %v484_v39, %v480_v21  ;;  %2465 = vmatpush2.bf16.msra.mxu1 %v6504_v48  ;;  %v311_v40 = vpop.f32.mrf.mxu0  ;;  %2353 = vmatprep.subr.bf16.mxu0 %v6369_v32  ;;  %v423_v22 = vadd.f32 %v422_v25, %v7651_v36  ;;  %v6360_v39 = vcombine.low %v7933_v23, %v7939_v41  ;;  %v730_v16 = vld [vmem:[#allocation2 + $0x668] sm:$0xff] }
 0x12d   :  { %v424_v20 = vpop.f32.mrf.mxu1  ;;  %v312_v42 = vadd.f32 %v311_v40, %v7654_v37  ;;  %2195 = vmatprep.mubr.bf16.mxu0 %v7945_v29  ;;  %2466 = vmatprep.subr.bf16.mxu1 %v6497_v31  ;;  %v6488_v37 = vcombine.low %v7941_v12, %v7943_v19  ;;  %v486_v14 = vmax.f32 %v310_v46, 0.0  ;;  %v487_v31 = vmax.f32 %v421_v45, 0.0  ;;  %v718_v12 = vld [vmem:[#allocation2 + $0x608] sm:$0xff]  ;;  %v715_v45 = vld [vmem:[#allocation2 + $0x5f0] sm:$0xff] }
 0x12e   :  { %v425_v50 = vadd.f32 %v424_v20, %v7657_v38  ;;  %2308 = vmatprep.mubr.bf16.mxu1 %v7947_v33  ;;  %v313_v48 = vpop.f32.mrf.mxu0  ;;  %2196 = vmatmul.mubr.bf16.gmra.mxu0 %v7953_v34  ;;  %v6353_v38 = vcombine.high %v598_v18, %v602_v4  ;;  %v488_v25 = vmax.f32 %v423_v22, 0.0  ;;  %v594_v20 = vld [vmem:[#allocation2 + $0x228] sm:$0xff] }
 0x12f   :  { %v426_v21 = vpop.f32.mrf.mxu1  ;;  %2309 = vmatmul.mubr.bf16.gmra.mxu1 %v7955_v3  ;;  %v314_v32 = vadd.f32 %v313_v48, %v7648_v35  ;;  %2354 = vmatpush2.bf16.msra.mxu0 %v6368_v43  ;;  %v489_v11 = vmax.f32 %v312_v42, 0.0  ;;  %v590_v43 = vld [vmem:[#allocation2 + $0x208] sm:$0xff] }
 0x130   :  { %v427_v26 = vadd.f32 %v426_v21, %v7651_v36  ;;  %v491_v47 = vmax.f32 %v425_v50, 0.0  ;;  %2467 = vmatpush2.bf16.msra.mxu1 %v6496_v27  ;;  %2355 = vmatprep.subr.bf16.mxu0 %v6361_v44  ;;  %v485_v36 = vmax.f32 %v308_v2, 0.0  ;;  %v6352_v27 = vcombine.low %v598_v18, %v602_v4  ;;  %v722_v19 = vld [vmem:[#allocation2 + $0x628] sm:$0xff]  ;;  %v583_v50 = vld [vmem:[#allocation2 + $0x1d0] sm:$0xff] }
 0x131   :  { %v490_v35 = vmax.f32 %v314_v32, 0.0  ;;  %2468 = vmatprep.subr.bf16.mxu1 %v6489_v15  ;;  %v6481_v44 = vcombine.high %v726_v7, %v730_v16  ;;  %v6480_v15 = vcombine.low %v726_v7, %v730_v16  ;;  %v6345_v22 = vcombine.high %v590_v43, %v594_v20  ;;  %v587_v2 = vld [vmem:[#allocation2 + $0x1f0] sm:$0xff] }
 0x132   :  { %v492_v40 = vmax.f32 %v427_v26, 0.0  ;;  %v7977_v42 = vpack.c.bf16 %v489_v11, %v485_v36  ;;  %v7979_v46 = vpack.c.bf16 %v491_v47, %v487_v31  ;;  %v6473_v18 = vcombine.high %v718_v12, %v722_v19  ;;  %v711_v4 = vld [vmem:[#allocation2 + $0x5d0] sm:$0xff] }
 0x133   :  { %v7973_v23 = vpack.c.bf16 %v490_v35, %v486_v14  ;;  %2356 = vmatpush2.bf16.msra.mxu0 %v6360_v39  ;;  %v6344_v48 = vcombine.low %v590_v43, %v594_v20  ;;  %v6472_v21 = vcombine.low %v718_v12, %v722_v19  ;;  %v6339_v32 = vcombine.high %v583_v50, %v587_v2  ;;  %v575_v39 = vld [vmem:[#allocation2 + $0x190] sm:$0xff] }
 0x134   :  { %v7975_v41 = vpack.c.bf16 %v492_v40, %v488_v25  ;;  %2469 = vmatpush2.bf16.msra.mxu1 %v6488_v37  ;;  %2357 = vmatprep.subr.bf16.mxu0 %v6353_v38  ;;  %v6467_v26 = vcombine.high %v711_v4, %v715_v45  ;;  %v579_v11 = vld [vmem:[#allocation2 + $0x1b0] sm:$0xff]  ;;  %v6338_v47 = vcombine.low %v583_v50, %v587_v2 }
 0x135   :  { %2205 = vmatprep.mubr.bf16.mxu0 %v7973_v23  ;;  %2470 = vmatprep.subr.bf16.mxu1 %v6481_v44  ;;  %v703_v37 = vld [vmem:[#allocation2 + $0x590] sm:$0xff]  ;;  %v6466_v7 = vcombine.low %v711_v4, %v715_v45  ;;  %v6331_v16 = vcombine.high %v575_v39, %v579_v11  ;;  %v6330_v40 = vcombine.low %v575_v39, %v579_v11 }
 0x136   :  { %2318 = vmatprep.mubr.bf16.mxu1 %v7975_v41  ;;  %2206 = vmatmul.mubr.bf16.gmra.mxu0 %v7977_v42  ;;  %v707_v38 = vld [vmem:[#allocation2 + $0x5b0] sm:$0xff] }
 0x137   :  { %2319 = vmatmul.mubr.bf16.gmra.mxu1 %v7979_v46  ;;  %2358 = vmatpush2.bf16.msra.mxu0 %v6352_v27  ;;  %v567_v14 = vld [vmem:[#allocation2 + $0x150] sm:$0xff]  ;;  %v6459_v35 = vcombine.high %v703_v37, %v707_v38  ;;  %v6458_v20 = vcombine.low %v703_v37, %v707_v38 }
 0x138   :  { %2361 = vmatprep.mubr.bf16.mxu0 %v7675_v5  ;;  %2471 = vmatpush2.bf16.msra.mxu1 %v6480_v15  ;;  %v571_v25 = vld [vmem:[#allocation2 + $0x170] sm:$0xff] }
 0x139   :  { %2474 = vmatprep.mubr.bf16.mxu1 %v7677_v6  ;;  %2359 = vmatprep.subr.bf16.mxu0 %v6345_v22  ;;  %v695_v36 = vld [vmem:[#allocation2 + $0x550] sm:$0xff]  ;;  %v6323_v43 = vcombine.high %v567_v14, %v571_v25  ;;  %v6322_v19 = vcombine.low %v567_v14, %v571_v25 }
 0x13a   :  { %2472 = vmatprep.subr.bf16.mxu1 %v6473_v18  ;;  %v699_v31 = vld [vmem:[#allocation2 + $0x570] sm:$0xff] }
 0x13b   :  { %2360 = vmatpush2.bf16.msra.mxu0 %v6344_v48  ;;  %v6451_v27 = vcombine.high %v695_v36, %v699_v31  ;;  %v559_v44 = vld [vmem:[#allocation2 + $0x110] sm:$0xff]  ;;  %v6450_v50 = vcombine.low %v695_v36, %v699_v31 }
 0x13c   :  { %2473 = vmatpush2.bf16.msra.mxu1 %v6472_v21  ;;  %2555 = vmatprep.subr.bf16.mxu0 %v6339_v32  ;;  %v563_v12 = vld [vmem:[#allocation2 + $0x130] sm:$0xff] }
 0x13d   :  { %2668 = vmatprep.subr.bf16.mxu1 %v6467_v26  ;;  %v687_v15 = vld [vmem:[#allocation2 + $0x510] sm:$0xff]  ;;  %v6315_v2 = vcombine.high %v559_v44, %v563_v12  ;;  %v6314_v48 = vcombine.low %v559_v44, %v563_v12 }
 0x13e   :  { %2362 = vmatmul.mubr.bf16.vlgmr.msra.gmra.mxu0 %v7681_v8  ;;  %v691_v22 = vld [vmem:[#allocation2 + $0x530] sm:$0xff] }
 0x13f   :  { %2475 = vmatmul.mubr.bf16.vlgmr.msra.gmra.mxu1 %v7683_v9  ;;  %2556 = vmatpush1.bf16.msra.mxu0 %v6338_v47  ;;  %v551_v18 = vld [vmem:[#allocation2 + $0xd0] sm:$0xff]  ;;  %v6443_v45 = vcombine.high %v687_v15, %v691_v22  ;;  %v6442_v39 = vcombine.low %v687_v15, %v691_v22 }
 0x140   :  { %2371 = vmatprep.mubr.bf16.mxu0 %v7725_v58  ;;  %2484 = vmatprep.mubr.bf16.mxu1 %v7727_v59  ;;  %v555_v4 = vld [vmem:[#allocation2 + $0xf0] sm:$0xff] }
 0x141   :  { %2669 = vmatpush1.bf16.msra.mxu1 %v6466_v7  ;;  %2557 = vmatprep.subr.bf16.mxu0 %v6331_v16  ;;  %v679_v21 = vld [vmem:[#allocation2 + $0x4d0] sm:$0xff]  ;;  %v6307_v26 = vcombine.high %v551_v18, %v555_v4  ;;  %v6306_v38 = vcombine.low %v551_v18, %v555_v4 }
 0x142   :  { %2670 = vmatprep.subr.bf16.mxu1 %v6459_v35  ;;  %v683_v32 = vld [vmem:[#allocation2 + $0x4f0] sm:$0xff] }
 0x143   :  { %2558 = vmatpush1.bf16.msra.mxu0 %v6330_v40  ;;  %v6435_v11 = vcombine.high %v679_v21, %v683_v32  ;;  %v543_v47 = vld [vmem:[#allocation2 + $0x90] sm:$0xff]  ;;  %v6434_v14 = vcombine.low %v679_v21, %v683_v32 }
 0x144   :  { %2559 = vmatprep.subr.bf16.mxu0 %v6323_v43  ;;  %v547_v37 = vld [vmem:[#allocation2 + $0xb0] sm:$0xff] }
 0x145   :  { %2671 = vmatpush1.bf16.msra.mxu1 %v6458_v20  ;;  %v671_v7 = vld [vmem:[#allocation2 + $0x490] sm:$0xff]  ;;  %v6299_v25 = vcombine.high %v543_v47, %v547_v37  ;;  %v6298_v31 = vcombine.low %v543_v47, %v547_v37 }
 0x146   :  { %2372 = vmatmul.mubr.bf16.gmra.mxu0 %v7733_v61  ;;  %2672 = vmatprep.subr.bf16.mxu1 %v6451_v27  ;;  %v675_v16 = vld [vmem:[#allocation2 + $0x4b0] sm:$0xff] }
 0x147   :  { %2485 = vmatmul.mubr.bf16.gmra.mxu1 %v7735_v62  ;;  %2560 = vmatpush1.bf16.msra.mxu0 %v6322_v19  ;;  %v535_v35 = vld [vmem:[#allocation2 + $0x50] sm:$0xff]  ;;  %v6427_v36 = vcombine.high %v671_v7, %v675_v16  ;;  %v6426_v44 = vcombine.low %v671_v7, %v675_v16 }
 0x148   :  { %2381 = vmatprep.mubr.bf16.mxu0 %v7769_v51  ;;  %2494 = vmatprep.mubr.bf16.mxu1 %v7771_v52  ;;  %v539_v40 = vld [vmem:[#allocation2 + $0x70] sm:$0xff] }
 0x149   :  { %2673 = vmatpush1.bf16.msra.mxu1 %v6450_v50  ;;  %2561 = vmatprep.subr.bf16.mxu0 %v6315_v2  ;;  %v663_v43 = vld [vmem:[#allocation2 + $0x450] sm:$0xff]  ;;  %v6291_v27 = vcombine.high %v535_v35, %v539_v40  ;;  %v6290_v22 = vcombine.low %v535_v35, %v539_v40 }
 0x14a   :  { %2674 = vmatprep.subr.bf16.mxu1 %v6443_v45  ;;  %v667_v20 = vld [vmem:[#allocation2 + $0x470] sm:$0xff] }
 0x14b   :  { %2562 = vmatpush1.bf16.msra.mxu0 %v6314_v48  ;;  %v6419_v12 = vcombine.high %v663_v43, %v667_v20  ;;  %v527_v19 = vld [vmem:[#allocation2 + $0x10] sm:$0xff]  ;;  %v6418_v18 = vcombine.low %v663_v43, %v667_v20 }
 0x14c   :  { %2563 = vmatprep.subr.bf16.mxu0 %v6307_v26  ;;  %v531_v15 = vld [vmem:[#allocation2 + $0x30] sm:$0xff] }
 0x14d   :  { %2675 = vmatpush1.bf16.msra.mxu1 %v6442_v39  ;;  %v655_v50 = vld [vmem:[#allocation2 + $0x410] sm:$0xff]  ;;  %v6283_v4 = vcombine.high %v527_v19, %v531_v15  ;;  %v6282_v32 = vcombine.low %v527_v19, %v531_v15 }
 0x14e   :  { %2382 = vmatmul.mubr.bf16.gmra.mxu0 %v7777_v55  ;;  %2676 = vmatprep.subr.bf16.mxu1 %v6435_v11  ;;  %v659_v2 = vld [vmem:[#allocation2 + $0x430] sm:$0xff] }
 0x14f   :  { %2495 = vmatmul.mubr.bf16.gmra.mxu1 %v7779_v56  ;;  %2564 = vmatpush1.bf16.msra.mxu0 %v6306_v38  ;;  %v647_v45 = vld [vmem:[#allocation2 + $0x3d0] sm:$0xff]  ;;  %v6411_v21 = vcombine.high %v655_v50, %v659_v2  ;;  %v6410_v47 = vcombine.low %v655_v50, %v659_v2 }
 0x150   :  { %2391 = vmatprep.mubr.bf16.mxu0 %v7813_v24  ;;  %2504 = vmatprep.mubr.bf16.mxu1 %v7815_v49  ;;  %v651_v48 = vld [vmem:[#allocation2 + $0x3f0] sm:$0xff] }
 0x151   :  { %2677 = vmatpush1.bf16.msra.mxu1 %v6434_v14  ;;  %2565 = vmatprep.subr.bf16.mxu0 %v6299_v25  ;;  %v775_v26 = vld [vmem:[#allocation2 + $0x7d0] sm:$0xff]  ;;  %v6403_v11 = vcombine.high %v647_v45, %v651_v48  ;;  %v6402_v16 = vcombine.low %v647_v45, %v651_v48 }
 0x152   :  { %2678 = vmatprep.subr.bf16.mxu1 %v6427_v36  ;;  %v779_v39 = vld [vmem:[#allocation2 + $0x7f0] sm:$0xff] }
 0x153   :  { %2566 = vmatpush1.bf16.msra.mxu0 %v6298_v31  ;;  %v6531_v37 = vcombine.high %v775_v26, %v779_v39  ;;  %v639_v38 = vld [vmem:[#allocation2 + $0x390] sm:$0xff]  ;;  %v6530_v35 = vcombine.low %v775_v26, %v779_v39 }
 0x154   :  { %2567 = vmatprep.subr.bf16.mxu0 %v6291_v27  ;;  %v643_v7 = vld [vmem:[#allocation2 + $0x3b0] sm:$0xff] }
 0x155   :  { %2679 = vmatpush1.bf16.msra.mxu1 %v6426_v44  ;;  %v767_v14 = vld [vmem:[#allocation2 + $0x790] sm:$0xff]  ;;  %v6395_v40 = vcombine.high %v639_v38, %v643_v7  ;;  %v6394_v20 = vcombine.low %v639_v38, %v643_v7 }
 0x156   :  { %2392 = vmatmul.mubr.bf16.gmra.mxu0 %v7821_v57  ;;  %2680 = vmatprep.subr.bf16.mxu1 %v6419_v12  ;;  %v771_v25 = vld [vmem:[#allocation2 + $0x7b0] sm:$0xff] }
 0x157   :  { %2505 = vmatmul.mubr.bf16.gmra.mxu1 %v7823_v54  ;;  %2568 = vmatpush1.bf16.msra.mxu0 %v6290_v22  ;;  %v631_v36 = vld [vmem:[#allocation2 + $0x350] sm:$0xff]  ;;  %v6523_v43 = vcombine.high %v767_v14, %v771_v25  ;;  %v6522_v19 = vcombine.low %v767_v14, %v771_v25 }
 0x158   :  { %2401 = vmatprep.mubr.bf16.mxu0 %v7857_v0  ;;  %2514 = vmatprep.mubr.bf16.mxu1 %v7859_v63  ;;  %v635_v31 = vld [vmem:[#allocation2 + $0x370] sm:$0xff] }
 0x159   :  { %2681 = vmatpush1.bf16.msra.mxu1 %v6418_v18  ;;  %2569 = vmatprep.subr.bf16.mxu0 %v6283_v4  ;;  %v759_v27 = vld [vmem:[#allocation2 + $0x750] sm:$0xff]  ;;  %v6387_v12 = vcombine.high %v631_v36, %v635_v31  ;;  %v6386_v2 = vcombine.low %v631_v36, %v635_v31 }
 0x15a   :  { %2682 = vmatprep.subr.bf16.mxu1 %v6411_v21  ;;  %v763_v44 = vld [vmem:[#allocation2 + $0x770] sm:$0xff] }
 0x15b   :  { %2570 = vmatpush1.bf16.msra.mxu0 %v6282_v32  ;;  %v6515_v15 = vcombine.high %v759_v27, %v763_v44  ;;  %v623_v22 = vld [vmem:[#allocation2 + $0x310] sm:$0xff]  ;;  %v6514_v45 = vcombine.low %v759_v27, %v763_v44 }
 0x15c   :  { %2571 = vmatprep.subr.bf16.mxu0 %v6403_v11  ;;  %v627_v50 = vld [vmem:[#allocation2 + $0x330] sm:$0xff] }
 0x15d   :  { %2683 = vmatpush1.bf16.msra.mxu1 %v6410_v47  ;;  %v751_v18 = vld [vmem:[#allocation2 + $0x710] sm:$0xff]  ;;  %v6379_v48 = vcombine.high %v623_v22, %v627_v50  ;;  %v6378_v39 = vcombine.low %v623_v22, %v627_v50 }
 0x15e   :  { %2402 = vmatmul.mubr.bf16.gmra.mxu0 %v7865_v1  ;;  %2684 = vmatprep.subr.bf16.mxu1 %v6531_v37  ;;  %v755_v4 = vld [vmem:[#allocation2 + $0x730] sm:$0xff] }
 0x15f   :  { %2515 = vmatmul.mubr.bf16.gmra.mxu1 %v7867_v53  ;;  %2572 = vmatpush2.bf16.msra.mxu0 %v6402_v16  ;;  %v615_v21 = vld [vmem:[#allocation2 + $0x2d0] sm:$0xff]  ;;  %v6507_v26 = vcombine.high %v751_v18, %v755_v4  ;;  %v6506_v38 = vcombine.low %v751_v18, %v755_v4 }
 0x160   :  { %2411 = vmatprep.mubr.bf16.mxu0 %v7901_v17  ;;  %2524 = vmatprep.mubr.bf16.mxu1 %v7903_v13  ;;  %v619_v32 = vld [vmem:[#allocation2 + $0x2f0] sm:$0xff] }
 0x161   :  { %2685 = vmatpush2.bf16.msra.mxu1 %v6530_v35  ;;  %2573 = vmatprep.subr.bf16.mxu0 %v6395_v40  ;;  %v743_v11 = vld [vmem:[#allocation2 + $0x6d0] sm:$0xff]  ;;  %v6371_v37 = vcombine.high %v615_v21, %v619_v32  ;;  %v6370_v25 = vcombine.low %v615_v21, %v619_v32 }
 0x162   :  { %2686 = vmatprep.subr.bf16.mxu1 %v6523_v43  ;;  %v747_v47 = vld [vmem:[#allocation2 + $0x6f0] sm:$0xff] }
 0x163   :  { %2574 = vmatpush2.bf16.msra.mxu0 %v6394_v20  ;;  %v6499_v7 = vcombine.high %v743_v11, %v747_v47  ;;  %v607_v16 = vld [vmem:[#allocation2 + $0x290] sm:$0xff]  ;;  %v6498_v36 = vcombine.low %v743_v11, %v747_v47 }
 0x164   :  { %2575 = vmatprep.subr.bf16.mxu0 %v6387_v12  ;;  %v611_v14 = vld [vmem:[#allocation2 + $0x2b0] sm:$0xff] }
 0x165   :  { %2687 = vmatpush2.bf16.msra.mxu1 %v6522_v19  ;;  %v735_v35 = vld [vmem:[#allocation2 + $0x690] sm:$0xff]  ;;  %v6363_v31 = vcombine.high %v607_v16, %v611_v14  ;;  %v6362_v44 = vcombine.low %v607_v16, %v611_v14  ;;  %v576_v14 = vld [vmem:[#allocation2 + $0x198] sm:$0xff] }
 0x166   :  { %2412 = vmatmul.mubr.bf16.gmra.mxu0 %v7909_v10  ;;  %2688 = vmatprep.subr.bf16.mxu1 %v6515_v15  ;;  %v739_v40 = vld [vmem:[#allocation2 + $0x6b0] sm:$0xff] }
 0x167   :  { %2525 = vmatmul.mubr.bf16.gmra.mxu1 %v7911_v60  ;;  %2576 = vmatpush2.bf16.msra.mxu0 %v6386_v2  ;;  %v599_v43 = vld [vmem:[#allocation2 + $0x250] sm:$0xff]  ;;  %v6491_v27 = vcombine.high %v735_v35, %v739_v40  ;;  %v6490_v22 = vcombine.low %v735_v35, %v739_v40 }
 0x168   :  { %2421 = vmatprep.mubr.bf16.mxu0 %v7945_v29  ;;  %2534 = vmatprep.mubr.bf16.mxu1 %v7947_v33  ;;  %v603_v20 = vld [vmem:[#allocation2 + $0x270] sm:$0xff] }
 0x169   :  { %2689 = vmatpush2.bf16.msra.mxu1 %v6514_v45  ;;  %2577 = vmatprep.subr.bf16.mxu0 %v6379_v48  ;;  %v727_v12 = vld [vmem:[#allocation2 + $0x650] sm:$0xff]  ;;  %v6355_v15 = vcombine.high %v599_v43, %v603_v20  ;;  %v6354_v4 = vcombine.low %v599_v43, %v603_v20 }
 0x16a   :  { %2690 = vmatprep.subr.bf16.mxu1 %v6507_v26  ;;  %v731_v19 = vld [vmem:[#allocation2 + $0x670] sm:$0xff]  ;;  %v584_v26 = vld [vmem:[#allocation2 + $0x1d8] sm:$0xff] }
 0x16b   :  { %2578 = vmatpush2.bf16.msra.mxu0 %v6378_v39  ;;  %v6483_v50 = vcombine.high %v727_v12, %v731_v19  ;;  %v591_v2 = vld [vmem:[#allocation2 + $0x210] sm:$0xff]  ;;  %v6482_v21 = vcombine.low %v727_v12, %v731_v19  ;;  %v588_v39 = vld [vmem:[#allocation2 + $0x1f8] sm:$0xff] }
 0x16c   :  { %2579 = vmatprep.subr.bf16.mxu0 %v6371_v37  ;;  %v595_v18 = vld [vmem:[#allocation2 + $0x230] sm:$0xff]  ;;  %v712_v37 = vld [vmem:[#allocation2 + $0x5d8] sm:$0xff]  ;;  %v6340_v40 = vcombine.low %v584_v26, %v588_v39 }
 0x16d   :  { %2691 = vmatpush2.bf16.msra.mxu1 %v6506_v38  ;;  %v719_v45 = vld [vmem:[#allocation2 + $0x610] sm:$0xff]  ;;  %v6347_v32 = vcombine.high %v591_v2, %v595_v18  ;;  %v6346_v47 = vcombine.low %v591_v2, %v595_v18  ;;  %v716_v38 = vld [vmem:[#allocation2 + $0x5f8] sm:$0xff] }
 0x16e   :  { %2422 = vmatmul.mubr.bf16.gmra.mxu0 %v7953_v34  ;;  %2692 = vmatprep.subr.bf16.mxu1 %v6499_v7  ;;  %v723_v48 = vld [vmem:[#allocation2 + $0x630] sm:$0xff]  ;;  %v6341_v7 = vcombine.high %v584_v26, %v588_v39  ;;  %v6469_v35 = vcombine.high %v712_v37, %v716_v38  ;;  %v6468_v20 = vcombine.low %v712_v37, %v716_v38  ;;  %v560_v18 = vld [vmem:[#allocation2 + $0x118] sm:$0xff] }
 0x16f   :  { %2535 = vmatmul.mubr.bf16.gmra.mxu1 %v7955_v3  ;;  %2580 = vmatpush2.bf16.msra.mxu0 %v6370_v25  ;;  %v6475_v11 = vcombine.high %v719_v45, %v723_v48  ;;  %v6474_v16 = vcombine.low %v719_v45, %v723_v48  ;;  %v580_v25 = vld [vmem:[#allocation2 + $0x1b8] sm:$0xff] }
 0x170   :  { %2431 = vmatprep.mubr.bf16.mxu0 %v7973_v23  ;;  %2544 = vmatprep.mubr.bf16.mxu1 %v7975_v41  ;;  %v6333_v43 = vcombine.high %v576_v14, %v580_v25  ;;  %v6332_v19 = vcombine.low %v576_v14, %v580_v25 }
 0x171   :  { %2693 = vmatpush2.bf16.msra.mxu1 %v6498_v36  ;;  %2581 = vmatprep.subr.bf16.mxu0 %v6363_v31  ;;  %v704_v36 = vld [vmem:[#allocation2 + $0x598] sm:$0xff] }
 0x172   :  { %2694 = vmatprep.subr.bf16.mxu1 %v6491_v27  ;;  %v708_v31 = vld [vmem:[#allocation2 + $0x5b8] sm:$0xff] }
 0x173   :  { %2582 = vmatpush2.bf16.msra.mxu0 %v6362_v44  ;;  %v568_v27 = vld [vmem:[#allocation2 + $0x158] sm:$0xff]  ;;  %v6461_v12 = vcombine.high %v704_v36, %v708_v31  ;;  %v6460_v2 = vcombine.low %v704_v36, %v708_v31 }
 0x174   :  { %2583 = vmatprep.subr.bf16.mxu0 %v6355_v15  ;;  %v572_v44 = vld [vmem:[#allocation2 + $0x178] sm:$0xff] }
 0x175   :  { %2695 = vmatpush2.bf16.msra.mxu1 %v6490_v22  ;;  %v696_v15 = vld [vmem:[#allocation2 + $0x558] sm:$0xff]  ;;  %v6324_v48 = vcombine.low %v568_v27, %v572_v44 }
 0x176   :  { %2432 = vmatmul.mubr.bf16.gmra.mxu0 %v7977_v42  ;;  %2696 = vmatprep.subr.bf16.mxu1 %v6483_v50  ;;  %v700_v22 = vld [vmem:[#allocation2 + $0x578] sm:$0xff]  ;;  %v6325_v50 = vcombine.high %v568_v27, %v572_v44 }
 0x177   :  { %2545 = vmatmul.mubr.bf16.gmra.mxu1 %v7979_v46  ;;  %2584 = vmatpush2.bf16.msra.mxu0 %v6354_v4  ;;  %v564_v4 = vld [vmem:[#allocation2 + $0x138] sm:$0xff]  ;;  %v6453_v45 = vcombine.high %v696_v15, %v700_v22  ;;  %v6452_v39 = vcombine.low %v696_v15, %v700_v22 }
 0x178   :  { %2587 = vmatprep.mubr.bf16.mxu0 %v7675_v5  ;;  %2700 = vmatprep.mubr.bf16.mxu1 %v7677_v6  ;;  %v6317_v26 = vcombine.high %v560_v18, %v564_v4  ;;  %v6316_v38 = vcombine.low %v560_v18, %v564_v4 }
 0x179   :  { %2697 = vmatpush2.bf16.msra.mxu1 %v6482_v21  ;;  %2585 = vmatprep.subr.bf16.mxu0 %v6347_v32  ;;  %v688_v21 = vld [vmem:[#allocation2 + $0x518] sm:$0xff] }
 0x17a   :  { %2698 = vmatprep.subr.bf16.mxu1 %v6475_v11  ;;  %v692_v32 = vld [vmem:[#allocation2 + $0x538] sm:$0xff] }
 0x17b   :  { %2586 = vmatpush2.bf16.msra.mxu0 %v6346_v47  ;;  %v552_v11 = vld [vmem:[#allocation2 + $0xd8] sm:$0xff]  ;;  %v6445_v37 = vcombine.high %v688_v21, %v692_v32  ;;  %v6444_v25 = vcombine.low %v688_v21, %v692_v32 }
 0x17c   :  { %2781 = vmatprep.subr.bf16.mxu0 %v6341_v7  ;;  %v556_v47 = vld [vmem:[#allocation2 + $0xf8] sm:$0xff] }
 0x17d   :  { %2699 = vmatpush2.bf16.msra.mxu1 %v6474_v16  ;;  %v680_v7 = vld [vmem:[#allocation2 + $0x4d8] sm:$0xff]  ;;  %v6309_v14 = vcombine.high %v552_v11, %v556_v47  ;;  %v6308_v31 = vcombine.low %v552_v11, %v556_v47 }
 0x17e   :  { %2588 = vmatmul.mubr.bf16.vlgmr.msra.gmra.mxu0 %v7681_v8  ;;  %2894 = vmatprep.subr.bf16.mxu1 %v6469_v35  ;;  %v684_v16 = vld [vmem:[#allocation2 + $0x4f8] sm:$0xff] }
 0x17f   :  { %2782 = vmatpush1.bf16.msra.mxu0 %v6340_v40  ;;  %2597 = vmatprep.mubr.bf16.mxu0 %v7725_v58  ;;  %v544_v35 = vld [vmem:[#allocation2 + $0x98] sm:$0xff]  ;;  %v6437_v36 = vcombine.high %v680_v7, %v684_v16  ;;  %v6436_v44 = vcombine.low %v680_v7, %v684_v16 }
 0x180   :  { %2701 = vmatmul.mubr.bf16.vlgmr.msra.gmra.mxu1 %v7683_v9  ;;  %2783 = vmatprep.subr.bf16.mxu0 %v6333_v43  ;;  %v548_v40 = vld [vmem:[#allocation2 + $0xb8] sm:$0xff] }
 0x181   :  { %2710 = vmatprep.mubr.bf16.mxu1 %v7727_v59  ;;  %2895 = vmatpush1.bf16.msra.mxu1 %v6468_v20  ;;  %v672_v43 = vld [vmem:[#allocation2 + $0x498] sm:$0xff]  ;;  %v6301_v27 = vcombine.high %v544_v35, %v548_v40  ;;  %v6300_v22 = vcombine.low %v544_v35, %v548_v40 }
 0x182   :  { %2896 = vmatprep.subr.bf16.mxu1 %v6461_v12  ;;  %v676_v20 = vld [vmem:[#allocation2 + $0x4b8] sm:$0xff] }
 0x183   :  { %2784 = vmatpush1.bf16.msra.mxu0 %v6332_v19  ;;  %v536_v12 = vld [vmem:[#allocation2 + $0x58] sm:$0xff]  ;;  %v6429_v15 = vcombine.high %v672_v43, %v676_v20  ;;  %v6428_v4 = vcombine.low %v672_v43, %v676_v20 }
 0x184   :  { %2785 = vmatprep.subr.bf16.mxu0 %v6325_v50  ;;  %v540_v19 = vld [vmem:[#allocation2 + $0x78] sm:$0xff] }
 0x185   :  { %2897 = vmatpush1.bf16.msra.mxu1 %v6460_v2  ;;  %v664_v50 = vld [vmem:[#allocation2 + $0x458] sm:$0xff]  ;;  %v6293_v18 = vcombine.high %v536_v12, %v540_v19  ;;  %v6292_v32 = vcombine.low %v536_v12, %v540_v19 }
 0x186   :  { %2598 = vmatmul.mubr.bf16.gmra.mxu0 %v7733_v61  ;;  %2898 = vmatprep.subr.bf16.mxu1 %v6453_v45  ;;  %v668_v2 = vld [vmem:[#allocation2 + $0x478] sm:$0xff] }
 0x187   :  { %2786 = vmatpush1.bf16.msra.mxu0 %v6324_v48  ;;  %2607 = vmatprep.mubr.bf16.mxu0 %v7769_v51  ;;  %v528_v45 = vld [vmem:[#allocation2 + $0x18] sm:$0xff]  ;;  %v6421_v21 = vcombine.high %v664_v50, %v668_v2  ;;  %v6420_v47 = vcombine.low %v664_v50, %v668_v2 }
 0x188   :  { %2711 = vmatmul.mubr.bf16.gmra.mxu1 %v7735_v62  ;;  %2787 = vmatprep.subr.bf16.mxu0 %v6317_v26  ;;  %v532_v48 = vld [vmem:[#allocation2 + $0x38] sm:$0xff] }
 0x189   :  { %2720 = vmatprep.mubr.bf16.mxu1 %v7771_v52  ;;  %2899 = vmatpush1.bf16.msra.mxu1 %v6452_v39  ;;  %v656_v26 = vld [vmem:[#allocation2 + $0x418] sm:$0xff]  ;;  %v6285_v11 = vcombine.high %v528_v45, %v532_v48  ;;  %v6284_v16 = vcombine.low %v528_v45, %v532_v48 }
 0x18a   :  { %2900 = vmatprep.subr.bf16.mxu1 %v6445_v37  ;;  %v660_v39 = vld [vmem:[#allocation2 + $0x438] sm:$0xff] }
 0x18b   :  { %2788 = vmatpush1.bf16.msra.mxu0 %v6316_v38  ;;  %v648_v37 = vld [vmem:[#allocation2 + $0x3d8] sm:$0xff]  ;;  %v6413_v7 = vcombine.high %v656_v26, %v660_v39  ;;  %v6412_v40 = vcombine.low %v656_v26, %v660_v39 }
 0x18c   :  { %2789 = vmatprep.subr.bf16.mxu0 %v6309_v14  ;;  %v652_v38 = vld [vmem:[#allocation2 + $0x3f8] sm:$0xff] }
 0x18d   :  { %2901 = vmatpush1.bf16.msra.mxu1 %v6444_v25  ;;  %v776_v14 = vld [vmem:[#allocation2 + $0x7d8] sm:$0xff]  ;;  %v6405_v35 = vcombine.high %v648_v37, %v652_v38  ;;  %v6404_v20 = vcombine.low %v648_v37, %v652_v38 }
 0x18e   :  { %2608 = vmatmul.mubr.bf16.gmra.mxu0 %v7777_v55  ;;  %2902 = vmatprep.subr.bf16.mxu1 %v6437_v36  ;;  %v780_v25 = vld [vmem:[#allocation2 + $0x7f8] sm:$0xff] }
 0x18f   :  { %2790 = vmatpush1.bf16.msra.mxu0 %v6308_v31  ;;  %2617 = vmatprep.mubr.bf16.mxu0 %v7813_v24  ;;  %v640_v36 = vld [vmem:[#allocation2 + $0x398] sm:$0xff]  ;;  %v6533_v43 = vcombine.high %v776_v14, %v780_v25  ;;  %v6532_v19 = vcombine.low %v776_v14, %v780_v25 }
 0x190   :  { %2721 = vmatmul.mubr.bf16.gmra.mxu1 %v7779_v56  ;;  %2791 = vmatprep.subr.bf16.mxu0 %v6301_v27  ;;  %v644_v31 = vld [vmem:[#allocation2 + $0x3b8] sm:$0xff] }
 0x191   :  { %2730 = vmatprep.mubr.bf16.mxu1 %v7815_v49  ;;  %2903 = vmatpush1.bf16.msra.mxu1 %v6436_v44  ;;  %v768_v27 = vld [vmem:[#allocation2 + $0x798] sm:$0xff]  ;;  %v6397_v12 = vcombine.high %v640_v36, %v644_v31  ;;  %v6396_v2 = vcombine.low %v640_v36, %v644_v31 }
 0x192   :  { %2904 = vmatprep.subr.bf16.mxu1 %v6429_v15  ;;  %v772_v44 = vld [vmem:[#allocation2 + $0x7b8] sm:$0xff] }
 0x193   :  { %2792 = vmatpush1.bf16.msra.mxu0 %v6300_v22  ;;  %v632_v15 = vld [vmem:[#allocation2 + $0x358] sm:$0xff]  ;;  %v6525_v50 = vcombine.high %v768_v27, %v772_v44  ;;  %v6524_v48 = vcombine.low %v768_v27, %v772_v44 }
 0x194   :  { %2793 = vmatprep.subr.bf16.mxu0 %v6293_v18  ;;  %v636_v22 = vld [vmem:[#allocation2 + $0x378] sm:$0xff] }
 0x195   :  { %2905 = vmatpush1.bf16.msra.mxu1 %v6428_v4  ;;  %v760_v18 = vld [vmem:[#allocation2 + $0x758] sm:$0xff]  ;;  %v6389_v45 = vcombine.high %v632_v15, %v636_v22  ;;  %v6388_v39 = vcombine.low %v632_v15, %v636_v22 }
 0x196   :  { %2618 = vmatmul.mubr.bf16.gmra.mxu0 %v7821_v57  ;;  %2906 = vmatprep.subr.bf16.mxu1 %v6421_v21  ;;  %v764_v4 = vld [vmem:[#allocation2 + $0x778] sm:$0xff] }
 0x197   :  { %2794 = vmatpush1.bf16.msra.mxu0 %v6292_v32  ;;  %2627 = vmatprep.mubr.bf16.mxu0 %v7857_v0  ;;  %v624_v21 = vld [vmem:[#allocation2 + $0x318] sm:$0xff]  ;;  %v6517_v26 = vcombine.high %v760_v18, %v764_v4  ;;  %v6516_v38 = vcombine.low %v760_v18, %v764_v4 }
 0x198   :  { %2731 = vmatmul.mubr.bf16.gmra.mxu1 %v7823_v54  ;;  %2795 = vmatprep.subr.bf16.mxu0 %v6285_v11  ;;  %v628_v32 = vld [vmem:[#allocation2 + $0x338] sm:$0xff] }
 0x199   :  { %2740 = vmatprep.mubr.bf16.mxu1 %v7859_v63  ;;  %2907 = vmatpush1.bf16.msra.mxu1 %v6420_v47  ;;  %v752_v11 = vld [vmem:[#allocation2 + $0x718] sm:$0xff]  ;;  %v6381_v37 = vcombine.high %v624_v21, %v628_v32  ;;  %v6380_v25 = vcombine.low %v624_v21, %v628_v32 }
 0x19a   :  { %2908 = vmatprep.subr.bf16.mxu1 %v6413_v7  ;;  %v756_v47 = vld [vmem:[#allocation2 + $0x738] sm:$0xff] }
 0x19b   :  { %2796 = vmatpush1.bf16.msra.mxu0 %v6284_v16  ;;  %v616_v7 = vld [vmem:[#allocation2 + $0x2d8] sm:$0xff]  ;;  %v6509_v14 = vcombine.high %v752_v11, %v756_v47  ;;  %v6508_v31 = vcombine.low %v752_v11, %v756_v47 }
 0x19c   :  { %2797 = vmatprep.subr.bf16.mxu0 %v6405_v35  ;;  %v620_v16 = vld [vmem:[#allocation2 + $0x2f8] sm:$0xff] }
 0x19d   :  { %2909 = vmatpush1.bf16.msra.mxu1 %v6412_v40  ;;  %v744_v35 = vld [vmem:[#allocation2 + $0x6d8] sm:$0xff]  ;;  %v6373_v36 = vcombine.high %v616_v7, %v620_v16  ;;  %v6372_v44 = vcombine.low %v616_v7, %v620_v16 }
 0x19e   :  { %2628 = vmatmul.mubr.bf16.gmra.mxu0 %v7865_v1  ;;  %2910 = vmatprep.subr.bf16.mxu1 %v6533_v43  ;;  %v748_v40 = vld [vmem:[#allocation2 + $0x6f8] sm:$0xff] }
 0x19f   :  { %2798 = vmatpush2.bf16.msra.mxu0 %v6404_v20  ;;  %2637 = vmatprep.mubr.bf16.mxu0 %v7901_v17  ;;  %v608_v43 = vld [vmem:[#allocation2 + $0x298] sm:$0xff]  ;;  %v6501_v27 = vcombine.high %v744_v35, %v748_v40  ;;  %v6500_v22 = vcombine.low %v744_v35, %v748_v40  ;;  %v6978_v35 = vld [vmem:[#allocation5 + $0xe4] ss:$16 sps:$4 sm:$0xff]  }
 0x1a0   :  { %2741 = vmatmul.mubr.bf16.gmra.mxu1 %v7867_v53  ;;  %2799 = vmatprep.subr.bf16.mxu0 %v6397_v12  ;;  %v612_v20 = vld [vmem:[#allocation2 + $0x2b8] sm:$0xff] }
 0x1a1   :  { %2750 = vmatprep.mubr.bf16.mxu1 %v7903_v13  ;;  %2911 = vmatpush2.bf16.msra.mxu1 %v6532_v19  ;;  %v736_v12 = vld [vmem:[#allocation2 + $0x698] sm:$0xff]  ;;  %v6365_v15 = vcombine.high %v608_v43, %v612_v20  ;;  %v6364_v4 = vcombine.low %v608_v43, %v612_v20  ;;  %v6981_v43 = vld [vmem:[#allocation5 + $0xc4] ss:$16 sps:$4 sm:$0xff]   ;;  %v6991_v20 = vld [vmem:[#allocation5 + $0x2e0] ss:$16 sps:$4 sm:$0xff]  }
 0x1a2   :  { %2912 = vmatprep.subr.bf16.mxu1 %v6525_v50  ;;  %v740_v19 = vld [vmem:[#allocation2 + $0x6b8] sm:$0xff] }
 0x1a3   :  { %2800 = vmatpush2.bf16.msra.mxu0 %v6396_v2  ;;  %v600_v50 = vld [vmem:[#allocation2 + $0x258] sm:$0xff]  ;;  %v6493_v18 = vcombine.high %v736_v12, %v740_v19  ;;  %v6492_v32 = vcombine.low %v736_v12, %v740_v19 }
 0x1a4   :  { %2801 = vmatprep.subr.bf16.mxu0 %v6389_v45  ;;  %v604_v2 = vld [vmem:[#allocation2 + $0x278] sm:$0xff] }
 0x1a5   :  { %2913 = vmatpush2.bf16.msra.mxu1 %v6524_v48  ;;  %v728_v45 = vld [vmem:[#allocation2 + $0x658] sm:$0xff]  ;;  %v6357_v21 = vcombine.high %v600_v50, %v604_v2  ;;  %v6356_v47 = vcombine.low %v600_v50, %v604_v2  ;;  %v6982_v2 = vld [vmem:[#allocation5 + $0xa0] ss:$16 sps:$4 sm:$0xff]  }
 0x1a6   :  { %2638 = vmatmul.mubr.bf16.gmra.mxu0 %v7909_v10  ;;  %2914 = vmatprep.subr.bf16.mxu1 %v6517_v26  ;;  %v732_v48 = vld [vmem:[#allocation2 + $0x678] sm:$0xff] }
 0x1a7   :  { %2802 = vmatpush2.bf16.msra.mxu0 %v6388_v39  ;;  %2647 = vmatprep.mubr.bf16.mxu0 %v7945_v29  ;;  %v592_v26 = vld [vmem:[#allocation2 + $0x218] sm:$0xff]  ;;  %v6485_v11 = vcombine.high %v728_v45, %v732_v48  ;;  %v6484_v16 = vcombine.low %v728_v45, %v732_v48  ;;  %v7003_v45 = vld [vmem:[#allocation5 + $0x2a0] ss:$16 sps:$4 sm:$0xff]  }
 0x1a8   :  { %2751 = vmatmul.mubr.bf16.gmra.mxu1 %v7911_v60  ;;  %2803 = vmatprep.subr.bf16.mxu0 %v6381_v37  ;;  %v596_v39 = vld [vmem:[#allocation2 + $0x238] sm:$0xff] }
 0x1a9   :  { %2760 = vmatprep.mubr.bf16.mxu1 %v7947_v33  ;;  %2915 = vmatpush2.bf16.msra.mxu1 %v6516_v38  ;;  %v720_v37 = vld [vmem:[#allocation2 + $0x618] sm:$0xff]  ;;  %v6349_v7 = vcombine.high %v592_v26, %v596_v39 }
 0x1aa   :  { %2916 = vmatprep.subr.bf16.mxu1 %v6509_v14  ;;  %v724_v38 = vld [vmem:[#allocation2 + $0x638] sm:$0xff] }
 0x1ab   :  { %2804 = vmatpush2.bf16.msra.mxu0 %v6380_v25  ;;  %v6477_v14 = vcombine.high %v720_v37, %v724_v38  ;;  %v6348_v25 = vcombine.low %v592_v26, %v596_v39  ;;  %v6476_v40 = vcombine.low %v720_v37, %v724_v38  ;;  %v6988_v38 = vld [vmem:[#allocation5 + $0x60] ss:$16 sps:$4 sm:$0xff]  }
 0x1ac   :  { %2805 = vmatprep.subr.bf16.mxu0 %v6373_v36  ;;  %v6993_v36 = vld [vmem:[#allocation5 + $0x2e4] ss:$16 sps:$4 sm:$0xff]  }
 0x1ad   :  { %2917 = vmatpush2.bf16.msra.mxu1 %v6508_v31  ;;  %v6976_v31 = vld [vmem:[#allocation5 + $0xe0] ss:$16 sps:$4 sm:$0xff]  }
 0x1ae   :  { %2648 = vmatmul.mubr.bf16.gmra.mxu0 %v7953_v34  ;;  %2918 = vmatprep.subr.bf16.mxu1 %v6501_v27 }
 0x1af   :  { %2806 = vmatpush2.bf16.msra.mxu0 %v6372_v44  ;;  %2657 = vmatprep.mubr.bf16.mxu0 %v7973_v23  ;;  %v6999_v44 = vld [vmem:[#allocation5 + $0x2c4] ss:$16 sps:$4 sm:$0xff]  }
 0x1b0   :  { %2761 = vmatmul.mubr.bf16.gmra.mxu1 %v7955_v3  ;;  %2807 = vmatprep.subr.bf16.mxu0 %v6365_v15  ;;  %v6984_v15 = vld [vmem:[#allocation5 + $0xa4] ss:$16 sps:$4 sm:$0xff]  }
 0x1b1   :  { %2770 = vmatprep.mubr.bf16.mxu1 %v7975_v41  ;;  %2919 = vmatpush2.bf16.msra.mxu1 %v6500_v22  ;;  %v6997_v22 = vld [vmem:[#allocation5 + $0x2c0] ss:$16 sps:$4 sm:$0xff]  }
 0x1b2   :  { %2920 = vmatprep.subr.bf16.mxu1 %v6493_v18 }
 0x1b3   :  { %2808 = vmatpush2.bf16.msra.mxu0 %v6364_v4  ;;  %v6987_v4 = vld [vmem:[#allocation5 + $0x84] ss:$16 sps:$4 sm:$0xff]  }
 0x1b4   :  { %2809 = vmatprep.subr.bf16.mxu0 %v6357_v21  ;;  %v7011_v21 = vld [vmem:[#allocation5 + $0x284] ss:$16 sps:$4 sm:$0xff]  }
 0x1b5   :  { %2921 = vmatpush2.bf16.msra.mxu1 %v6492_v32  ;;  %v6985_v32 = vld [vmem:[#allocation5 + $0x80] ss:$16 sps:$4 sm:$0xff]  }
 0x1b6   :  { %2658 = vmatmul.mubr.bf16.gmra.mxu0 %v7977_v42  ;;  %2922 = vmatprep.subr.bf16.mxu1 %v6485_v11  ;;  %v6990_v11 = vld [vmem:[#allocation5 + $0x64] ss:$16 sps:$4 sm:$0xff]  }
 0x1b7   :  { %2810 = vmatpush2.bf16.msra.mxu0 %v6356_v47  ;;  %2813 = vmatprep.mubr.bf16.mxu0 %v7675_v5  ;;  %v7009_v47 = vld [vmem:[#allocation5 + $0x280] ss:$16 sps:$4 sm:$0xff]  }
 0x1b8   :  { %2771 = vmatmul.mubr.bf16.gmra.mxu1 %v7979_v46  ;;  %2811 = vmatprep.subr.bf16.mxu0 %v6349_v7 }
 0x1b9   :  { %2923 = vmatpush2.bf16.msra.mxu1 %v6484_v16  ;;  %2926 = vmatprep.mubr.bf16.mxu1 %v7677_v6  ;;  %v6979_v6 = vld [vmem:[#allocation5 + $0xc0] ss:$16 sps:$4 sm:$0xff]   ;;  %v6996_v16 = vld [vmem:[#allocation5 + $0x44] ss:$16 sps:$4 sm:$0xff]  }
 0x1ba   :  { %2924 = vmatprep.subr.bf16.mxu1 %v6477_v14  ;;  %v7015_v14 = vld [vmem:[#allocation5 + $0x260] ss:$16 sps:$4 sm:$0xff]  }
 0x1bb   :  { %2812 = vmatpush2.bf16.msra.mxu0 %v6348_v25 }
 0x1bc   :  { %4757 = vmatprep.subr.bf16.mxu0 %v6978_v35  ;;  %v7023_v35 = vld [vmem:[#allocation5 + $0x244] ss:$16 sps:$4 sm:$0xff]  }
 0x1bd   :  { %2925 = vmatpush2.bf16.msra.mxu1 %v6476_v40  ;;  %v6994_v40 = vld [vmem:[#allocation5 + $0x40] ss:$16 sps:$4 sm:$0xff]  }
 0x1be   :  { %v8051_v27 = vpop.f32.mrf.mxu0  ;;  %2814 = vmatmul.mubr.bf16.vlgmr.msra.gmra.mxu0 %v7681_v8  ;;  %4870 = vmatprep.subr.bf16.mxu1 %v6993_v36 }
 0x1bf   :  { %v8053_v5 = vpop.f32.mrf.mxu1  ;;  %2823 = vmatprep.mubr.bf16.mxu0 %v7725_v58  ;;  %4758 = vmatpush1.bf16.msra.mxu0 %v6976_v31  ;;  %v7005_v58 = vld [vmem:[#allocation5 + $0x2a4] ss:$16 sps:$4 sm:$0xff]  }
 0x1c0   :  { %2927 = vmatmul.mubr.bf16.vlgmr.msra.gmra.mxu1 %v7683_v9  ;;  %v8058_v12 = vpop.f32.mrf.mxu0  ;;  %4759 = vmatprep.subr.bf16.mxu0 %v6981_v43  ;;  %v7002_v43 = vld [vmem:[#allocation5 + $0x24] ss:$16 sps:$4 sm:$0xff]  }
 0x1c1   :  { %v8060_v19 = vpop.f32.mrf.mxu1  ;;  %2936 = vmatprep.mubr.bf16.mxu1 %v7727_v59  ;;  %4871 = vmatpush1.bf16.msra.mxu1 %v6991_v20  ;;  %v7021_v20 = vld [vmem:[#allocation5 + $0x240] ss:$16 sps:$4 sm:$0xff]  }
 0x1c2   :  { %v8063_v50 = vpop.f32.mrf.mxu0  ;;  %4872 = vmatprep.subr.bf16.mxu1 %v6999_v44 }
 0x1c3   :  { %v8065_v8 = vpop.f32.mrf.mxu1  ;;  %4760 = vmatpush1.bf16.msra.mxu0 %v6979_v6  ;;  %v7000_v6 = vld [vmem:[#allocation5 + $0x20] ss:$16 sps:$4 sm:$0xff]  }
 0x1c4   :  { %v8067_v18 = vpop.f32.mrf.mxu0  ;;  %4761 = vmatprep.subr.bf16.mxu0 %v6984_v15 }
 0x1c5   :  { %v8069_v9 = vpop.f32.mrf.mxu1  ;;  %4873 = vmatpush1.bf16.msra.mxu1 %v6997_v22  ;;  %v7008_v22 = vld [vmem:[#allocation5 + $0x4] ss:$16 sps:$4 sm:$0xff]  }
 0x1c6   :  { %v8071_v48 = vpop.f32.mrf.mxu0  ;;  %2824 = vmatmul.mubr.bf16.gmra.mxu0 %v7733_v61  ;;  %4874 = vmatprep.subr.bf16.mxu1 %v7005_v58  ;;  %v7027_v58 = vld [vmem:[#allocation5 + $0x220] ss:$16 sps:$4 sm:$0xff]  }
 0x1c7   :  { %v8073_v59 = vpop.f32.mrf.mxu1  ;;  %2833 = vmatprep.mubr.bf16.mxu0 %v7769_v51  ;;  %4762 = vmatpush1.bf16.msra.mxu0 %v6982_v2  ;;  %v7017_v51 = vld [vmem:[#allocation5 + $0x264] ss:$16 sps:$4 sm:$0xff]  }
 0x1c8   :  { %2937 = vmatmul.mubr.bf16.gmra.mxu1 %v7735_v62  ;;  %v8078_v26 = vpop.f32.mrf.mxu0  ;;  %4763 = vmatprep.subr.bf16.mxu0 %v6987_v4  ;;  %v7035_v4 = vld [vmem:[#allocation5 + $0x204] ss:$16 sps:$4 sm:$0xff]  }
 0x1c9   :  { %v8080_v39 = vpop.f32.mrf.mxu1  ;;  %2946 = vmatprep.mubr.bf16.mxu1 %v7771_v52  ;;  %4875 = vmatpush1.bf16.msra.mxu1 %v7003_v45  ;;  %v7006_v45 = vld [vmem:[#allocation5] ss:$16 sps:$4 sm:$0xff]  }
 0x1ca   :  { %v8083_v37 = vpop.f32.mrf.mxu0  ;;  %4876 = vmatprep.subr.bf16.mxu1 %v7011_v21 }
 0x1cb   :  { %v8085_v61 = vpop.f32.mrf.mxu1  ;;  %4764 = vmatpush1.bf16.msra.mxu0 %v6985_v32 }
 0x1cc   :  { %v8087_v7 = vpop.f32.mrf.mxu0  ;;  %4765 = vmatprep.subr.bf16.mxu0 %v6990_v11  ;;  %v7014_v11 = vld [vmem:[#allocation5 + $0x1e4] ss:$16 sps:$4 sm:$0xff]  }
 0x1cd   :  { %v8089_v62 = vpop.f32.mrf.mxu1  ;;  %4877 = vmatpush1.bf16.msra.mxu1 %v7009_v47  ;;  %v7033_v47 = vld [vmem:[#allocation5 + $0x200] ss:$16 sps:$4 sm:$0xff]  }
 0x1ce   :  { %v8091_v25 = vpop.f32.mrf.mxu0  ;;  %2834 = vmatmul.mubr.bf16.gmra.mxu0 %v7777_v55  ;;  %4878 = vmatprep.subr.bf16.mxu1 %v7017_v51 }
 0x1cf   :  { %v8093_v52 = vpop.f32.mrf.mxu1  ;;  %2843 = vmatprep.mubr.bf16.mxu0 %v7813_v24  ;;  %4766 = vmatpush1.bf16.msra.mxu0 %v6988_v38  ;;  %v7029_v24 = vld [vmem:[#allocation5 + $0x224] ss:$16 sps:$4 sm:$0xff]   ;;  %v7012_v38 = vld [vmem:[#allocation5 + $0x1e0] ss:$16 sps:$4 sm:$0xff]  }
 0x1d0   :  { %2947 = vmatmul.mubr.bf16.gmra.mxu1 %v7779_v56  ;;  %v8098_v36 = vpop.f32.mrf.mxu0  ;;  %4767 = vmatprep.subr.bf16.mxu0 %v6996_v16 }
 0x1d1   :  { %v8100_v31 = vpop.f32.mrf.mxu1  ;;  %2956 = vmatprep.mubr.bf16.mxu1 %v7815_v49  ;;  %4879 = vmatpush1.bf16.msra.mxu1 %v7015_v14  ;;  %v7020_v14 = vld [vmem:[#allocation5 + $0x1c4] ss:$16 sps:$4 sm:$0xff]  }
 0x1d2   :  { %v8103_v44 = vpop.f32.mrf.mxu0  ;;  %4880 = vmatprep.subr.bf16.mxu1 %v7023_v35  ;;  %v7039_v35 = vld [vmem:[#allocation5 + $0x3e0] ss:$16 sps:$4 sm:$0xff]  }
 0x1d3   :  { %v8105_v55 = vpop.f32.mrf.mxu1  ;;  %4768 = vmatpush1.bf16.msra.mxu0 %v6994_v40 }
 0x1d4   :  { %v8107_v15 = vpop.f32.mrf.mxu0  ;;  %4769 = vmatprep.subr.bf16.mxu0 %v7002_v43  ;;  %v7047_v43 = vld [vmem:[#allocation5 + $0x3c4] ss:$16 sps:$4 sm:$0xff]  }
 0x1d5   :  { %v8109_v56 = vpop.f32.mrf.mxu1  ;;  %4881 = vmatpush1.bf16.msra.mxu1 %v7021_v20  ;;  %v7018_v20 = vld [vmem:[#allocation5 + $0x1c0] ss:$16 sps:$4 sm:$0xff]  }
 0x1d6   :  { %v8111_v2 = vpop.f32.mrf.mxu0  ;;  %2844 = vmatmul.mubr.bf16.gmra.mxu0 %v7821_v57  ;;  %4882 = vmatprep.subr.bf16.mxu1 %v7029_v24 }
 0x1d7   :  { %v8113_v49 = vpop.f32.mrf.mxu1  ;;  %2853 = vmatprep.mubr.bf16.mxu0 %v7857_v0  ;;  %4770 = vmatpush1.bf16.msra.mxu0 %v7000_v6  ;;  %v7041_v0 = vld [vmem:[#allocation5 + $0x3e4] ss:$16 sps:$4 sm:$0xff]  }
 0x1d8   :  { %2957 = vmatmul.mubr.bf16.gmra.mxu1 %v7823_v54  ;;  %v8118_v21 = vpop.f32.mrf.mxu0  ;;  %4771 = vmatprep.subr.bf16.mxu0 %v7008_v22  ;;  %v7026_v22 = vld [vmem:[#allocation5 + $0x1a4] ss:$16 sps:$4 sm:$0xff]  }
 0x1d9   :  { %v8120_v32 = vpop.f32.mrf.mxu1  ;;  %2966 = vmatprep.mubr.bf16.mxu1 %v7859_v63  ;;  %4883 = vmatpush1.bf16.msra.mxu1 %v7027_v58  ;;  %v7045_v58 = vld [vmem:[#allocation5 + $0x3c0] ss:$16 sps:$4 sm:$0xff]  }
 0x1da   :  { %v8123_v51 = vpop.f32.mrf.mxu0  ;;  %4884 = vmatprep.subr.bf16.mxu1 %v7035_v4 }
 0x1db   :  { %v8125_v57 = vpop.f32.mrf.mxu1  ;;  %4772 = vmatpush1.bf16.msra.mxu0 %v7006_v45  ;;  %v7024_v45 = vld [vmem:[#allocation5 + $0x1a0] ss:$16 sps:$4 sm:$0xff]  }
 0x1dc   :  { %v8127_v16 = vpop.f32.mrf.mxu0  ;;  %4773 = vmatprep.subr.bf16.mxu0 %v7014_v11 }
 0x1dd   :  { %v8129_v54 = vpop.f32.mrf.mxu1  ;;  %4885 = vmatpush1.bf16.msra.mxu1 %v7033_v47  ;;  %v7032_v47 = vld [vmem:[#allocation5 + $0x184] ss:$16 sps:$4 sm:$0xff]  }
 0x1de   :  { %v8131_v40 = vpop.f32.mrf.mxu0  ;;  %2854 = vmatmul.mubr.bf16.gmra.mxu0 %v7865_v1  ;;  %4886 = vmatprep.subr.bf16.mxu1 %v7041_v0  ;;  %v7051_v0 = vld [vmem:[#allocation5 + $0x3a0] ss:$16 sps:$4 sm:$0xff]  }
 0x1df   :  { %v8133_v63 = vpop.f32.mrf.mxu1  ;;  %2863 = vmatprep.mubr.bf16.mxu0 %v7901_v17  ;;  %4774 = vmatpush2.bf16.msra.mxu0 %v7012_v38  ;;  %v7053_v17 = vld [vmem:[#allocation5 + $0x3a4] ss:$16 sps:$4 sm:$0xff]  }
 0x1e0   :  { %2967 = vmatmul.mubr.bf16.gmra.mxu1 %v7867_v53  ;;  %v8138_v24 = vpop.f32.mrf.mxu0  ;;  %4775 = vmatprep.subr.bf16.mxu0 %v7020_v14 }
 0x1e1   :  { %v8140_v6 = vpop.f32.mrf.mxu1  ;;  %2976 = vmatprep.mubr.bf16.mxu1 %v7903_v13  ;;  %4887 = vmatpush2.bf16.msra.mxu1 %v7039_v35  ;;  %v8154_v13 = vld [vmem:[%s9318_s4] sm:$0xff] }
 0x1e2   :  { %v8143_v4 = vpop.f32.mrf.mxu0  ;;  %4888 = vmatprep.subr.bf16.mxu1 %v7047_v43  ;;  %v7059_v35 = vld [vmem:[#allocation5 + $0x384] ss:$16 sps:$4 sm:$0xff]   ;;  %v8163_v43 = vrot.slane %v8154_v13, %v7633_v28 }
 0x1e3   :  { %v8145_v1 = vpop.f32.mrf.mxu1  ;;  %4776 = vmatpush2.bf16.msra.mxu0 %v7018_v20  ;;  %v7030_v20 = vld [vmem:[#allocation5 + $0x180] ss:$16 sps:$4 sm:$0xff]  }
 0x1e4   :  { %v8147_v11 = vpop.f32.mrf.mxu0  ;;  %4777 = vmatprep.subr.bf16.mxu0 %v7026_v22 }
 0x1e5   :  { %v8149_v53 = vpop.f32.mrf.mxu1  ;;  %4889 = vmatpush2.bf16.msra.mxu1 %v7045_v58 }
 0x1e6   :  { %v8156_v38 = vpop.f32.mrf.mxu0  ;;  %2864 = vmatmul.mubr.bf16.gmra.mxu0 %v7909_v10  ;;  %4890 = vmatprep.subr.bf16.mxu1 %v7053_v17  ;;  %v2144_v10 = vadd.f32 %v8067_v18, %v8163_v43  ;;  %v7057_v17 = vld [vmem:[#allocation5 + $0x380] ss:$16 sps:$4 sm:$0xff]   ;;  %v7044_v18 = vld [vmem:[#allocation5 + $0x144] ss:$16 sps:$4 sm:$0xff]  }
 0x1e7   :  { %9349 = vst [vmem:[#allocation17_spill] sm:$0xff] %v8156_v38  ;;  %v8158_v14 = vpop.f32.mrf.mxu1  ;;  %2873 = vmatprep.mubr.bf16.mxu0 %v7945_v29  ;;  %4778 = vmatpush2.bf16.msra.mxu0 %v7024_v45  ;;  %v7062_v45 = vld [vmem:[#allocation5 + $0x364] ss:$16 sps:$4 sm:$0xff]   ;;  %v7036_v38 = vld [vmem:[#allocation5 + $0x160] ss:$16 sps:$4 sm:$0xff]  }
 0x1e8   :  { %9350 = vst [vmem:[#allocation18_spill] sm:$0xff] %v8158_v14  ;;  %2977 = vmatmul.mubr.bf16.gmra.mxu1 %v7911_v60  ;;  %v8167_v22 = vpop.f32.mrf.mxu0  ;;  %4779 = vmatprep.subr.bf16.mxu0 %v7032_v47  ;;  %v7038_v14 = vld [vmem:[#allocation5 + $0x164] ss:$16 sps:$4 sm:$0xff]   ;;  %v2140_v60 = vadd.f32 %v8058_v12, %v8163_v43 }
 0x1e9   :  { %v8169_v58 = vpop.f32.mrf.mxu1  ;;  %2986 = vmatprep.mubr.bf16.mxu1 %v7947_v33  ;;  %4891 = vmatpush2.bf16.msra.mxu1 %v7051_v0  ;;  %v2257_v33 = vadd.f32 %v8069_v9, %v2144_v10  ;;  %v7060_v0 = vld [vmem:[#allocation5 + $0x360] ss:$16 sps:$4 sm:$0xff]   ;;  %v7065_v12 = vld [vmem:[#allocation5 + $0x344] ss:$16 sps:$4 sm:$0xff]  }
 0x1ea   :  { %9351 = vst [vmem:[#allocation19_spill] sm:$0xff] %v8169_v58  ;;  %v8174_v28 = vpop.f32.mrf.mxu0  ;;  %4892 = vmatprep.subr.bf16.mxu1 %v7059_v35  ;;  %v7042_v9 = vld [vmem:[#allocation5 + $0x140] ss:$16 sps:$4 sm:$0xff]  }
 0x1eb   :  { %9352 = vst [vmem:[#allocation20_spill] sm:$0xff] %v8174_v28  ;;  %v8176_v29 = vpop.f32.mrf.mxu1  ;;  %4780 = vmatpush2.bf16.msra.mxu0 %v7030_v20  ;;  %v2253_v20 = vadd.f32 %v8060_v19, %v2140_v60 }
 0x1ec   :  { %9353 = vst [vmem:[#allocation21_spill] sm:$0xff] %v8176_v29  ;;  %v8180_v47 = vpop.f32.mrf.mxu0  ;;  %4781 = vmatprep.subr.bf16.mxu0 %v7038_v14  ;;  %v8187_v29 = vrot.slane %v8154_v13, %v7639_v30  ;;  %v7050_v30 = vld [vmem:[#allocation5 + $0x124] ss:$16 sps:$4 sm:$0xff]  }
 0x1ed   :  { %v8182_v58 = vpop.f32.mrf.mxu1  ;;  %4893 = vmatpush2.bf16.msra.mxu1 %v7057_v17  ;;  %v3008_v60 = vmax.f32 %v2253_v20, 0.0 }
 0x1ee   :  { %v8189_v35 = vpop.f32.mrf.mxu0  ;;  %2874 = vmatmul.mubr.bf16.gmra.mxu0 %v7953_v34  ;;  %4894 = vmatprep.subr.bf16.mxu1 %v7062_v45  ;;  %v2142_v14 = vadd.f32 %v8063_v50, %v8187_v29  ;;  %v3016_v34 = vmax.f32 %v2257_v33, 0.0  ;;  %v2154_v45 = vadd.f32 %v8087_v7, %v8163_v43  ;;  %v2138_v19 = vadd.f32 %v8051_v27, %v8187_v29  ;;  %v7048_v33 = vld [vmem:[#allocation5 + $0x120] ss:$16 sps:$4 sm:$0xff]   ;;  %v7056_v27 = vld [vmem:[#allocation5 + $0x104] ss:$16 sps:$4 sm:$0xff]  }
 0x1ef   :  { %v8191_v28 = vpop.f32.mrf.mxu1  ;;  %2883 = vmatprep.mubr.bf16.mxu0 %v7973_v23  ;;  %4782 = vmatpush2.bf16.msra.mxu0 %v7036_v38  ;;  %v7063_v23 = vld [vmem:[#allocation5 + $0x340] ss:$16 sps:$4 sm:$0xff]   ;;  %v7068_v38 = vld [vmem:[#allocation5 + $0x324] ss:$16 sps:$4 sm:$0xff]  }
 0x1f0   :  { %9354 = vst [vmem:[#allocation22_spill] sm:$0xff] %v8191_v28  ;;  %2987 = vmatmul.mubr.bf16.gmra.mxu1 %v7955_v3  ;;  %v8199_v10 = vpop.f32.mrf.mxu0  ;;  %4783 = vmatprep.subr.bf16.mxu0 %v7044_v18  ;;  %v2150_v18 = vadd.f32 %v8078_v26, %v8163_v43  ;;  %v2255_v7 = vadd.f32 %v8065_v8, %v2142_v14  ;;  %v7071_v8 = vld [vmem:[#allocation5 + $0x304] ss:$16 sps:$4 sm:$0xff]  }
 0x1f1   :  { %v8201_v17 = vpop.f32.mrf.mxu1  ;;  %2996 = vmatprep.mubr.bf16.mxu1 %v7975_v41  ;;  %4895 = vmatpush2.bf16.msra.mxu1 %v7060_v0  ;;  %v2267_v28 = vadd.f32 %v8089_v62, %v2154_v45  ;;  %v2251_v20 = vadd.f32 %v8053_v5, %v2138_v19  ;;  %v2152_v14 = vadd.f32 %v8083_v37, %v8187_v29  ;;  %v7074_v45 = vld [vmem:[#allocation5 + $0x4e4] ss:$16 sps:$4 sm:$0xff]  }
 0x1f2   :  { %v8208_v50 = vpop.f32.mrf.mxu0  ;;  %4896 = vmatprep.subr.bf16.mxu1 %v7065_v12  ;;  %v7066_v12 = vld [vmem:[#allocation5 + $0x320] ss:$16 sps:$4 sm:$0xff]   ;;  %v3015_v62 = vmax.f32 %v2255_v7, 0.0  ;;  %v2164_v5 = vadd.f32 %v8107_v15, %v8163_v43  ;;  %v2160_v37 = vadd.f32 %v8098_v36, %v8163_v43  ;;  %v7077_v36 = vld [vmem:[#allocation5 + $0x4c4] ss:$16 sps:$4 sm:$0xff]  }
 0x1f3   :  { %9355 = vst [vmem:[#allocation23_spill] sm:$0xff] %v8208_v50  ;;  %v8210_v3 = vpop.f32.mrf.mxu1  ;;  %4784 = vmatpush2.bf16.msra.mxu0 %v7042_v9  ;;  %v8220_v50 = vpack.c.bf16 %v3016_v34, %v3008_v60  ;;  %v2263_v9 = vadd.f32 %v8080_v39, %v2150_v18  ;;  %v3032_v39 = vmax.f32 %v2267_v28, 0.0  ;;  %v3007_v19 = vmax.f32 %v2251_v20, 0.0 }
 0x1f4   :  { %9356 = vst [vmem:[#allocation24_spill] sm:$0xff] %v8210_v3  ;;  %v8215_v41 = vpop.f32.mrf.mxu0  ;;  %4785 = vmatprep.subr.bf16.mxu0 %v7050_v30  ;;  %v7054_v30 = vld [vmem:[#allocation5 + $0x100] ss:$16 sps:$4 sm:$0xff]   ;;  %v2265_v28 = vadd.f32 %v8085_v61, %v2152_v14  ;;  %v2162_v14 = vadd.f32 %v8103_v44, %v8187_v29 }
 0x1f5   :  { %v8217_v0 = vpop.f32.mrf.mxu1  ;;  %9357 = vst [vmem:[#allocation25_spill] sm:$0xff] %v8220_v50  ;;  %4897 = vmatpush2.bf16.msra.mxu1 %v7063_v23  ;;  %v7069_v23 = vld [vmem:[#allocation5 + $0x300] ss:$16 sps:$4 sm:$0xff]   ;;  %v3024_v18 = vmax.f32 %v2263_v9, 0.0  ;;  %v8247_v7 = vpack.c.bf16 %v3015_v62, %v3007_v19  ;;  %v7080_v19 = vld [vmem:[#allocation5 + $0x4a4] ss:$16 sps:$4 sm:$0xff]  }
 0x1f6   :  { %v8223_v3 = vpop.f32.mrf.mxu0  ;;  %2884 = vmatmul.mubr.bf16.gmra.mxu0 %v7977_v42  ;;  %4898 = vmatprep.subr.bf16.mxu1 %v7068_v38  ;;  %v2148_v38 = vadd.f32 %v8071_v48, %v8187_v29  ;;  %v9360_v61 = vld [vmem:[#allocation16_spill] sm:$0xff] }
 0x1f7   :  { %v8225_v26 = vpop.f32.mrf.mxu1  ;;  %4786 = vmatpush2.bf16.msra.mxu0 %v7048_v33  ;;  %4789 = vmatprep.mubr.bf16.mxu0 %v8220_v50  ;;  %v7072_v33 = vld [vmem:[#allocation5 + $0x4e0] ss:$16 sps:$4 sm:$0xff]   ;;  %v8255_v20 = vpack.c.bf16 %v3032_v39, %v3024_v18  ;;  %v3031_v39 = vmax.f32 %v2265_v28, 0.0  ;;  %v2275_v28 = vadd.f32 %v8105_v55, %v2162_v14  ;;  %v7083_v55 = vld [vmem:[#allocation5 + $0x484] ss:$16 sps:$4 sm:$0xff]  }
 0x1f8   :  { %2997 = vmatmul.mubr.bf16.gmra.mxu1 %v7979_v46  ;;  %v8235_v34 = vpop.f32.mrf.mxu0  ;;  %4787 = vmatprep.subr.bf16.mxu0 %v7056_v27  ;;  %v7122_v46 = vld [vmem:[#allocation5 + $0x6e4] ss:$16 sps:$4 sm:$0xff]   ;;  %v2277_v27 = vadd.f32 %v8109_v56, %v2164_v5  ;;  %v2261_v9 = vadd.f32 %v8073_v59, %v2148_v38  ;;  %v8265_v56 = vrot.slane %v8154_v13, %v9360_v61  ;;  %v7078_v61 = vld [vmem:[#allocation5 + $0x4a0] ss:$16 sps:$4 sm:$0xff]  }
 0x1f9   :  { %v8237_v42 = vpop.f32.mrf.mxu1  ;;  %4899 = vmatpush2.bf16.msra.mxu1 %v7066_v12  ;;  %9358 = vst [vmem:[#allocation26_spill] sm:$0xff] %v8255_v20  ;;  %v9359_v50 = vld [vmem:[#allocation14_spill] sm:$0xff]  ;;  %v2158_v59 = vadd.f32 %v8091_v25, %v8187_v29  ;;  %v2174_v38 = vadd.f32 %v8127_v16, %v8163_v43  ;;  %v2170_v25 = vadd.f32 %v8118_v21, %v8163_v43 }
 0x1fa   :  { %v8243_v60 = vpop.f32.mrf.mxu0  ;;  %4900 = vmatprep.subr.bf16.mxu1 %v7071_v8  ;;  %v8259_v8 = vrot.slane %v8154_v13, %v9359_v50  ;;  %v3023_v44 = vmax.f32 %v2261_v9, 0.0  ;;  %v2172_v9 = vadd.f32 %v8123_v51, %v8187_v29  ;;  %v3047_v51 = vmax.f32 %v2275_v28, 0.0 }
 0x1fb   :  { %v8245_v15 = vpop.f32.mrf.mxu1  ;;  %4788 = vmatpush2.bf16.msra.mxu0 %v7054_v30  ;;  %v2273_v30 = vadd.f32 %v8100_v31, %v2160_v37  ;;  %v3048_v31 = vmax.f32 %v2277_v27, 0.0  ;;  %v2271_v16 = vadd.f32 %v8093_v52, %v2158_v59  ;;  %v2287_v14 = vadd.f32 %v8129_v54, %v2174_v38  ;;  %v7081_v54 = vld [vmem:[#allocation5 + $0x480] ss:$16 sps:$4 sm:$0xff]  }
 0x1fc   :  { %v8251_v12 = vpop.f32.mrf.mxu0  ;;  %4983 = vmatprep.subr.bf16.mxu0 %v7074_v45  ;;  %v7075_v45 = vld [vmem:[#allocation5 + $0x4c0] ss:$16 sps:$4 sm:$0xff]   ;;  %v2283_v59 = vadd.f32 %v8120_v32, %v2170_v25 }
 0x1fd   :  { %v8253_v48 = vpop.f32.mrf.mxu1  ;;  %4901 = vmatpush2.bf16.msra.mxu1 %v7069_v23  ;;  %v3040_v18 = vmax.f32 %v2273_v30, 0.0  ;;  %v3039_v38 = vmax.f32 %v2271_v16, 0.0 }
 0x1fe   :  { %v2363_v62 = vpop.f32.mrf.mxu0  ;;  %4790 = vmatmul.mubr.bf16.vlgmr.msra.gmra.mxu0 %v8247_v7  ;;  %5096 = vmatprep.subr.bf16.mxu1 %v7122_v46 }
 0x1ff   :  { %v2476_v5 = vpop.f32.mrf.mxu1  ;;  %4799 = vmatprep.mubr.bf16.mxu0 %v8255_v20  ;;  %4984 = vmatpush1.bf16.msra.mxu0 %v7072_v33  ;;  %v2364_v50 = vadd.f32 %v2363_v62, %v8265_v56  ;;  %v8281_v20 = vpack.c.bf16 %v3031_v39, %v3023_v44  ;;  %v8286_v62 = vpack.c.bf16 %v3048_v31, %v3040_v18  ;;  %v3064_v18 = vmax.f32 %v2287_v14, 0.0 }
 0x200   :  { %v2365_v23 = vpop.f32.mrf.mxu0  ;;  %4985 = vmatprep.subr.bf16.mxu0 %v7077_v36  ;;  %v2168_v39 = vadd.f32 %v8111_v2, %v8187_v29 }
 0x201   :  { %v2366_v37 = vadd.f32 %v2365_v23, %v8259_v8  ;;  %v2478_v46 = vpop.f32.mrf.mxu1  ;;  %v2477_v44 = vadd.f32 %v2476_v5, %v2364_v50  ;;  %v7086_v5 = vld [vmem:[#allocation5 + $0x464] ss:$16 sps:$4 sm:$0xff]  }
 0x202   :  { %v2367_v33 = vpop.f32.mrf.mxu0 }
 0x203   :  { %v2368_v27 = vadd.f32 %v2367_v33, %v8265_v56  ;;  %v2480_v36 = vpop.f32.mrf.mxu1  ;;  %4986 = vmatpush1.bf16.msra.mxu0 %v7075_v45  ;;  %v2479_v21 = vadd.f32 %v2478_v46, %v2366_v37  ;;  %v2285_v37 = vadd.f32 %v8125_v57, %v2172_v9  ;;  %v2184_v46 = vadd.f32 %v8147_v11, %v8163_v43 }
 0x204   :  { %v2369_v30 = vpop.f32.mrf.mxu0  ;;  %4987 = vmatprep.subr.bf16.mxu0 %v7080_v19  ;;  %v3009_v16 = vmax.f32 %v2477_v44, 0.0  ;;  %v8303_v11 = vpack.c.bf16 %v3047_v51, %v3039_v38  ;;  %v7089_v44 = vld [vmem:[#allocation5 + $0x444] ss:$16 sps:$4 sm:$0xff]  }
 0x205   :  { %v2481_v23 = vadd.f32 %v2480_v36, %v2368_v27  ;;  %v2370_v33 = vadd.f32 %v2369_v30, %v8259_v8  ;;  %v2482_v45 = vpop.f32.mrf.mxu1  ;;  %v3010_v28 = vmax.f32 %v2479_v21, 0.0  ;;  %v2281_v36 = vadd.f32 %v8113_v49, %v2168_v39 }
 0x206   :  { %v2373_v52 = vpop.f32.mrf.mxu0  ;;  %4800 = vmatmul.mubr.bf16.gmra.mxu0 %v8281_v20  ;;  %v3056_v30 = vmax.f32 %v2283_v59, 0.0  ;;  %v2178_v49 = vadd.f32 %v8131_v40, %v8187_v29 }
 0x207   :  { %v2483_v31 = vadd.f32 %v2482_v45, %v2370_v33  ;;  %v2486_v19 = vpop.f32.mrf.mxu1  ;;  %4809 = vmatprep.mubr.bf16.mxu0 %v8286_v62  ;;  %4988 = vmatpush1.bf16.msra.mxu0 %v7078_v61  ;;  %v3017_v2 = vmax.f32 %v2481_v23, 0.0  ;;  %v2180_v61 = vadd.f32 %v8138_v24, %v8163_v43  ;;  %v2374_v57 = vadd.f32 %v2373_v52, %v8265_v56  ;;  %v7084_v23 = vld [vmem:[#allocation5 + $0x460] ss:$16 sps:$4 sm:$0xff]  }
 0x208   :  { %v2375_v50 = vpop.f32.mrf.mxu0  ;;  %4989 = vmatprep.subr.bf16.mxu0 %v7083_v55  ;;  %v3063_v33 = vmax.f32 %v2285_v37, 0.0  ;;  %v2297_v24 = vadd.f32 %v8149_v53, %v2184_v46  ;;  %v7120_v52 = vld [vmem:[#allocation5 + $0x6e0] ss:$16 sps:$4 sm:$0xff]   ;;  %v7128_v37 = vld [vmem:[#allocation5 + $0x6c4] ss:$16 sps:$4 sm:$0xff]  }
 0x209   :  { %v3018_v27 = vmax.f32 %v2483_v31, 0.0  ;;  %v2376_v32 = vadd.f32 %v2375_v50, %v8259_v8  ;;  %v2488_v25 = vpop.f32.mrf.mxu1  ;;  %v8311_v45 = vpack.c.bf16 %v3017_v2, %v3009_v16  ;;  %v3055_v50 = vmax.f32 %v2281_v36, 0.0  ;;  %v7092_v36 = vld [vmem:[#allocation5 + $0x424] ss:$16 sps:$4 sm:$0xff]  }
 0x20a   :  { %v2377_v9 = vpop.f32.mrf.mxu0  ;;  %v2293_v40 = vadd.f32 %v8140_v6, %v2180_v61  ;;  %v2487_v53 = vadd.f32 %v2486_v19, %v2374_v57  ;;  %v2182_v2 = vadd.f32 %v8143_v4, %v8187_v29  ;;  %v2194_v6 = vadd.f32 %v8180_v47, %v8163_v43  ;;  %v7126_v61 = vld [vmem:[#allocation5 + $0x6c0] ss:$16 sps:$4 sm:$0xff]  }
 0x20b   :  { %v2378_v55 = vadd.f32 %v2377_v9, %v8265_v56  ;;  %v2490_v14 = vpop.f32.mrf.mxu1  ;;  %v8306_v21 = vpack.c.bf16 %v3018_v27, %v3010_v28  ;;  %4990 = vmatpush1.bf16.msra.mxu0 %v7081_v54  ;;  %v2489_v51 = vadd.f32 %v2488_v25, %v2376_v32  ;;  %v8315_v54 = vpack.c.bf16 %v3064_v18, %v3056_v30  ;;  %v7087_v18 = vld [vmem:[#allocation5 + $0x440] ss:$16 sps:$4 sm:$0xff]  }
 0x20c   :  { %v2379_v39 = vpop.f32.mrf.mxu0  ;;  %4991 = vmatprep.subr.bf16.mxu0 %v7086_v5  ;;  %v8323_v27 = vpack.c.bf16 %v3063_v33, %v3055_v50  ;;  %v3080_v32 = vmax.f32 %v2297_v24, 0.0  ;;  %v8328_v4 = vadd.f32 %v8133_v63, %v2178_v49  ;;  %v2190_v47 = vadd.f32 %v8167_v22, %v8163_v43  ;;  %v9361_v63 = vld [vmem:[#allocation20_spill] sm:$0xff] }
 0x20d   :  { %v2491_v59 = vadd.f32 %v2490_v14, %v2378_v55  ;;  %v2380_v31 = vadd.f32 %v2379_v39, %v8259_v8  ;;  %v2492_v38 = vpop.f32.mrf.mxu1  ;;  %4902 = vmatprep.mubr.bf16.mxu1 %v8306_v21  ;;  %v3026_v16 = vmax.f32 %v2489_v51, 0.0  ;;  %v7134_v55 = vld [vmem:[#allocation5 + $0x6a4] ss:$16 sps:$4 sm:$0xff]   ;;  %v3072_v14 = vmax.f32 %v2293_v40, 0.0 }
 0x20e   :  { %v2383_v46 = vpop.f32.mrf.mxu0  ;;  %4810 = vmatmul.mubr.bf16.gmra.mxu0 %v8303_v11  ;;  %4903 = vmatmul.mubr.bf16.vlgmr.msra.gmra.mxu1 %v8311_v45  ;;  %v2295_v39 = vadd.f32 %v8145_v1, %v2182_v2  ;;  %v2192_v49 = vadd.f32 %v9361_v63, %v8187_v29  ;;  %v7095_v50 = vld [vmem:[#allocation5 + $0x404] ss:$16 sps:$4 sm:$0xff]   ;;  %v7132_v1 = vld [vmem:[#allocation5 + $0x6a0] ss:$16 sps:$4 sm:$0xff]  }
 0x20f   :  { %v2493_v5 = vadd.f32 %v2492_v38, %v2380_v31  ;;  %v2496_v28 = vpop.f32.mrf.mxu1  ;;  %4819 = vmatprep.mubr.bf16.mxu0 %v8315_v54  ;;  %4992 = vmatpush1.bf16.msra.mxu0 %v7084_v23  ;;  %v3033_v19 = vmax.f32 %v2491_v59, 0.0  ;;  %v3025_v23 = vmax.f32 %v2487_v53, 0.0  ;;  %v2384_v33 = vadd.f32 %v2383_v46, %v8265_v56  ;;  %v7090_v59 = vld [vmem:[#allocation5 + $0x420] ss:$16 sps:$4 sm:$0xff]  }
 0x210   :  { %v2385_v25 = vpop.f32.mrf.mxu0  ;;  %4993 = vmatprep.subr.bf16.mxu0 %v7089_v44  ;;  %5097 = vmatpush1.bf16.msra.mxu1 %v7120_v52  ;;  %v2307_v31 = vadd.f32 %v8182_v58, %v2194_v6 }
 0x211   :  { %v3034_v57 = vmax.f32 %v2493_v5, 0.0  ;;  %v2386_v9 = vadd.f32 %v2385_v25, %v8259_v8  ;;  %v2498_v30 = vpop.f32.mrf.mxu1  ;;  %5098 = vmatprep.subr.bf16.mxu1 %v7128_v37  ;;  %v8341_v38 = vpack.c.bf16 %v3033_v19, %v3025_v23  ;;  %v8343_v37 = vpack.c.bf16 %v3080_v32, %v3072_v14  ;;  %v7140_v5 = vld [vmem:[#allocation5 + $0x684] ss:$16 sps:$4 sm:$0xff]   ;;  %v9363_v25 = vld [vmem:[#allocation17_spill] sm:$0xff]  ;;  %v7138_v23 = vld [vmem:[#allocation5 + $0x680] ss:$16 sps:$4 sm:$0xff]  }
 0x212   :  { %v2387_v24 = vpop.f32.mrf.mxu0  ;;  %v2497_v6 = vadd.f32 %v2496_v28, %v2384_v33  ;;  %v3079_v32 = vmax.f32 %v2295_v39, 0.0  ;;  %v2204_v28 = vadd.f32 %v8215_v41, %v8163_v43  ;;  %v9364_v33 = vld [vmem:[#allocation21_spill] sm:$0xff] }
 0x213   :  { %v2388_v44 = vadd.f32 %v2387_v24, %v8265_v56  ;;  %v2500_v52 = vpop.f32.mrf.mxu1  ;;  %v8338_v51 = vpack.c.bf16 %v3034_v57, %v3026_v16  ;;  %4994 = vmatpush1.bf16.msra.mxu0 %v7087_v18  ;;  %v2499_v40 = vadd.f32 %v2498_v30, %v2386_v9  ;;  %v9362_v18 = vld [vmem:[#allocation19_spill] sm:$0xff]  ;;  %v7093_v57 = vld [vmem:[#allocation5 + $0x400] ss:$16 sps:$4 sm:$0xff]   ;;  %v7098_v9 = vld [vmem:[#allocation5 + $0x5e4] ss:$16 sps:$4 sm:$0xff]   ;;  %v3071_v30 = vmax.f32 %v8328_v4, 0.0 }
 0x214   :  { %v2389_v22 = vpop.f32.mrf.mxu0  ;;  %4995 = vmatprep.subr.bf16.mxu0 %v7092_v36  ;;  %5099 = vmatpush1.bf16.msra.mxu1 %v7126_v61  ;;  %v2303_v58 = vadd.f32 %v9362_v18, %v2190_v47  ;;  %v2188_v36 = vadd.f32 %v9363_v25, %v8187_v29  ;;  %v2305_v24 = vadd.f32 %v9364_v33, %v2192_v49 }
 0x215   :  { %v2501_v53 = vadd.f32 %v2500_v52, %v2388_v44  ;;  %v2390_v46 = vadd.f32 %v2389_v22, %v8259_v8  ;;  %v2502_v2 = vpop.f32.mrf.mxu1  ;;  %4912 = vmatprep.mubr.bf16.mxu1 %v8338_v51  ;;  %5100 = vmatprep.subr.bf16.mxu1 %v7134_v55  ;;  %v3096_v55 = vmax.f32 %v2307_v31, 0.0  ;;  %v3042_v39 = vmax.f32 %v2499_v40, 0.0 }
 0x216   :  { %v2393_v19 = vpop.f32.mrf.mxu0  ;;  %4820 = vmatmul.mubr.bf16.gmra.mxu0 %v8323_v27  ;;  %4913 = vmatmul.mubr.bf16.gmra.mxu1 %v8341_v38  ;;  %v3088_v22 = vmax.f32 %v2303_v58, 0.0  ;;  %v2200_v4 = vadd.f32 %v8199_v10, %v8163_v43  ;;  %v3041_v31 = vmax.f32 %v2497_v6, 0.0  ;;  %v2317_v18 = vadd.f32 %v8217_v0, %v2204_v28 }
 0x217   :  { %v2503_v61 = vadd.f32 %v2502_v2, %v2390_v46  ;;  %v2506_v16 = vpop.f32.mrf.mxu1  ;;  %4829 = vmatprep.mubr.bf16.mxu0 %v8343_v37  ;;  %4996 = vmatpush1.bf16.msra.mxu0 %v7090_v59  ;;  %v3049_v14 = vmax.f32 %v2501_v53, 0.0  ;;  %v7146_v59 = vld [vmem:[#allocation5 + $0x664] ss:$16 sps:$4 sm:$0xff]   ;;  %v2394_v41 = vadd.f32 %v2393_v19, %v8265_v56  ;;  %v3095_v25 = vmax.f32 %v2305_v24, 0.0 }
 0x218   :  { %v2395_v47 = vpop.f32.mrf.mxu0  ;;  %4997 = vmatprep.subr.bf16.mxu0 %v7095_v50  ;;  %5101 = vmatpush1.bf16.msra.mxu1 %v7132_v1  ;;  %v8361_v50 = vpack.c.bf16 %v3079_v32, %v3071_v30  ;;  %v9365_v1 = vld [vmem:[#allocation18_spill] sm:$0xff]  ;;  %v8370_v6 = vpack.c.bf16 %v3096_v55, %v3088_v22  ;;  %v2313_v0 = vadd.f32 %v8201_v17, %v2200_v4  ;;  %v3112_v17 = vmax.f32 %v2317_v18, 0.0 }
 0x219   :  { %v3050_v63 = vmax.f32 %v2503_v61, 0.0  ;;  %v2396_v44 = vadd.f32 %v2395_v47, %v8259_v8  ;;  %v2508_v52 = vpop.f32.mrf.mxu1  ;;  %5102 = vmatprep.subr.bf16.mxu1 %v7140_v5  ;;  %v2301_v46 = vadd.f32 %v9365_v1, %v2188_v36  ;;  %v7096_v5 = vld [vmem:[#allocation5 + $0x5e0] ss:$16 sps:$4 sm:$0xff]   ;;  %v8368_v58 = vpack.c.bf16 %v3049_v14, %v3041_v31  ;;  %v7101_v19 = vld [vmem:[#allocation5 + $0x5c4] ss:$16 sps:$4 sm:$0xff]  }
 0x21a   :  { %v2397_v53 = vpop.f32.mrf.mxu0  ;;  %v7144_v32 = vld [vmem:[#allocation5 + $0x660] ss:$16 sps:$4 sm:$0xff]   ;;  %v2507_v28 = vadd.f32 %v2506_v16, %v2394_v41  ;;  %v2198_v55 = vadd.f32 %v8189_v35, %v8187_v29  ;;  %v2214_v16 = vadd.f32 %v8251_v12, %v8163_v43  ;;  %v7158_v1 = vld [vmem:[#allocation5 + $0x624] ss:$16 sps:$4 sm:$0xff]  }
 0x21b   :  { %v2398_v49 = vadd.f32 %v2397_v53, %v8265_v56  ;;  %v2510_v40 = vpop.f32.mrf.mxu1  ;;  %v8365_v2 = vpack.c.bf16 %v3050_v63, %v3042_v39  ;;  %4998 = vmatpush1.bf16.msra.mxu0 %v7093_v57  ;;  %v2509_v36 = vadd.f32 %v2508_v52, %v2396_v44  ;;  %v7152_v57 = vld [vmem:[#allocation5 + $0x644] ss:$16 sps:$4 sm:$0xff]   ;;  %v7099_v63 = vld [vmem:[#allocation5 + $0x5c0] ss:$16 sps:$4 sm:$0xff]  }
 0x21c   :  { %v2399_v10 = vpop.f32.mrf.mxu0  ;;  %4999 = vmatprep.subr.bf16.mxu0 %v7098_v9  ;;  %5103 = vmatpush1.bf16.msra.mxu1 %v7138_v23  ;;  %v3087_v9 = vmax.f32 %v2301_v46, 0.0  ;;  %v9366_v23 = vld [vmem:[#allocation23_spill] sm:$0xff]  ;;  %v7150_v22 = vld [vmem:[#allocation5 + $0x640] ss:$16 sps:$4 sm:$0xff]   ;;  %v3104_v46 = vmax.f32 %v2313_v0, 0.0  ;;  %v3057_v12 = vmax.f32 %v2507_v28, 0.0 }
 0x21d   :  { %v2511_v61 = vadd.f32 %v2510_v40, %v2398_v49  ;;  %v2400_v30 = vadd.f32 %v2399_v10, %v8259_v8  ;;  %v2512_v47 = vpop.f32.mrf.mxu1  ;;  %4922 = vmatprep.mubr.bf16.mxu1 %v8365_v2  ;;  %5104 = vmatprep.subr.bf16.mxu1 %v7146_v59  ;;  %v2202_v33 = vadd.f32 %v9366_v23, %v8187_v29  ;;  %v7104_v59 = vld [vmem:[#allocation5 + $0x5a4] ss:$16 sps:$4 sm:$0xff]   ;;  %v3058_v4 = vmax.f32 %v2509_v36, 0.0  ;;  %v7156_v28 = vld [vmem:[#allocation5 + $0x620] ss:$16 sps:$4 sm:$0xff]  }
 0x21e   :  { %v2403_v14 = vpop.f32.mrf.mxu0  ;;  %4830 = vmatmul.mubr.bf16.gmra.mxu0 %v8361_v50  ;;  %4923 = vmatmul.mubr.bf16.gmra.mxu1 %v8368_v58  ;;  %v8384_v35 = vpack.c.bf16 %v3095_v25, %v3087_v9  ;;  %v2210_v49 = vadd.f32 %v8235_v34, %v8163_v43  ;;  %v9367_v18 = vld [vmem:[#allocation22_spill] sm:$0xff]  ;;  %v8398_v34 = vpack.c.bf16 %v3112_v17, %v3104_v46 }
 0x21f   :  { %v2513_v24 = vadd.f32 %v2512_v47, %v2400_v30  ;;  %v2516_v39 = vpop.f32.mrf.mxu1  ;;  %4839 = vmatprep.mubr.bf16.mxu0 %v8370_v6  ;;  %5000 = vmatpush2.bf16.msra.mxu0 %v7096_v5  ;;  %v3065_v44 = vmax.f32 %v2511_v61, 0.0  ;;  %v2404_v40 = vadd.f32 %v2403_v14, %v8265_v56  ;;  %v2311_v10 = vadd.f32 %v9367_v18, %v2198_v55  ;;  %v7102_v30 = vld [vmem:[#allocation5 + $0x5a0] ss:$16 sps:$4 sm:$0xff]   ;;  %v7107_v0 = vld [vmem:[#allocation5 + $0x584] ss:$16 sps:$4 sm:$0xff]  }
 0x220   :  { %v2405_v52 = vpop.f32.mrf.mxu0  ;;  %5001 = vmatprep.subr.bf16.mxu0 %v7101_v19  ;;  %5105 = vmatpush1.bf16.msra.mxu1 %v7144_v32  ;;  %v9368_v19 = vld [vmem:[#allocation24_spill] sm:$0xff]  ;;  %v2327_v47 = vadd.f32 %v8253_v48, %v2214_v16  ;;  %v2323_v48 = vadd.f32 %v8237_v42, %v2210_v49 }
 0x221   :  { %v3066_v31 = vmax.f32 %v2513_v24, 0.0  ;;  %v2406_v41 = vadd.f32 %v2405_v52, %v8259_v8  ;;  %v2518_v53 = vpop.f32.mrf.mxu1  ;;  %5106 = vmatprep.subr.bf16.mxu1 %v7152_v57  ;;  %v2315_v32 = vadd.f32 %v9368_v19, %v2202_v33  ;;  %v8396_v57 = vpack.c.bf16 %v3065_v44, %v3057_v12  ;;  %v7164_v33 = vld [vmem:[#allocation5 + $0x604] ss:$16 sps:$4 sm:$0xff]   ;;  %v7105_v52 = vld [vmem:[#allocation5 + $0x580] ss:$16 sps:$4 sm:$0xff]  }
 0x222   :  { %v2407_v5 = vpop.f32.mrf.mxu0  ;;  %v2517_v24 = vadd.f32 %v2516_v39, %v2404_v40  ;;  %v7110_v42 = vld [vmem:[#allocation5 + $0x564] ss:$16 sps:$4 sm:$0xff]   ;;  %v7162_v39 = vld [vmem:[#allocation5 + $0x600] ss:$16 sps:$4 sm:$0xff]   ;;  %v2208_v40 = vadd.f32 %v8223_v3, %v8187_v29 }
 0x223   :  { %v2408_v25 = vadd.f32 %v2407_v5, %v8265_v56  ;;  %v2520_v36 = vpop.f32.mrf.mxu1  ;;  %v8393_v61 = vpack.c.bf16 %v3066_v31, %v3058_v4  ;;  %5002 = vmatpush2.bf16.msra.mxu0 %v7099_v63  ;;  %v2519_v14 = vadd.f32 %v2518_v53, %v2406_v41  ;;  %v3111_v17 = vmax.f32 %v2315_v32, 0.0  ;;  %v7170_v12 = vld [vmem:[#allocation5 + $0x7e4] ss:$16 sps:$4 sm:$0xff]  }
 0x224   :  { %v2409_v43 = vpop.f32.mrf.mxu0  ;;  %5003 = vmatprep.subr.bf16.mxu0 %v7104_v59  ;;  %5107 = vmatpush1.bf16.msra.mxu1 %v7150_v22  ;;  %v2212_v59 = vadd.f32 %v8243_v60, %v8187_v29  ;;  %v3128_v22 = vmax.f32 %v2327_v47, 0.0  ;;  %v3103_v41 = vmax.f32 %v2311_v10, 0.0  ;;  %v3120_v5 = vmax.f32 %v2323_v48, 0.0  ;;  %v7113_v3 = vld [vmem:[#allocation5 + $0x544] ss:$16 sps:$4 sm:$0xff]  }
 0x225   :  { %v2521_v9 = vadd.f32 %v2520_v36, %v2408_v25  ;;  %v2410_v55 = vadd.f32 %v2409_v43, %v8259_v8  ;;  %v2522_v23 = vpop.f32.mrf.mxu1  ;;  %4932 = vmatprep.mubr.bf16.mxu1 %v8393_v61  ;;  %5108 = vmatprep.subr.bf16.mxu1 %v7158_v1  ;;  %v3074_v53 = vmax.f32 %v2519_v14, 0.0  ;;  %v3073_v60 = vmax.f32 %v2517_v24, 0.0 }
 0x226   :  { %v2413_v63 = vpop.f32.mrf.mxu0  ;;  %4840 = vmatmul.mubr.bf16.gmra.mxu0 %v8384_v35  ;;  %4933 = vmatmul.mubr.bf16.gmra.mxu1 %v8396_v57  ;;  %v8412_v32 = vpack.c.bf16 %v3111_v17, %v3103_v41  ;;  %v2325_v47 = vadd.f32 %v8245_v15, %v2212_v59  ;;  %v8420_v29 = vpack.c.bf16 %v3128_v22, %v3120_v5  ;;  %v7182_v41 = vld [vmem:[#allocation5 + $0x7a4] ss:$16 sps:$4 sm:$0xff]  }
 0x227   :  { %v2523_v16 = vadd.f32 %v2522_v23, %v2410_v55  ;;  %v2526_v44 = vpop.f32.mrf.mxu1  ;;  %4849 = vmatprep.mubr.bf16.mxu0 %v8398_v34  ;;  %5004 = vmatpush2.bf16.msra.mxu0 %v7102_v30  ;;  %v3081_v4 = vmax.f32 %v2521_v9, 0.0  ;;  %v2414_v18 = vadd.f32 %v2413_v63, %v8265_v56  ;;  %v7108_v30 = vld [vmem:[#allocation5 + $0x560] ss:$16 sps:$4 sm:$0xff]   ;;  %v2321_v15 = vadd.f32 %v8225_v26, %v2208_v40 }
 0x228   :  { %v2415_v31 = vpop.f32.mrf.mxu0  ;;  %5005 = vmatprep.subr.bf16.mxu0 %v7107_v0  ;;  %5109 = vmatpush1.bf16.msra.mxu1 %v7156_v28  ;;  %v7168_v28 = vld [vmem:[#allocation5 + $0x7e0] ss:$16 sps:$4 sm:$0xff]  }
 0x229   :  { %v3082_v1 = vmax.f32 %v2523_v16, 0.0  ;;  %v2416_v46 = vadd.f32 %v2415_v31, %v8259_v8  ;;  %v2528_v49 = vpop.f32.mrf.mxu1  ;;  %5110 = vmatprep.subr.bf16.mxu1 %v7164_v33  ;;  %v8418_v43 = vpack.c.bf16 %v3081_v4, %v3073_v60  ;;  %v7176_v33 = vld [vmem:[#allocation5 + $0x7c4] ss:$16 sps:$4 sm:$0xff]   ;;  %v2527_v48 = vadd.f32 %v2526_v44, %v2414_v18  ;;  %v7111_v16 = vld [vmem:[#allocation5 + $0x540] ss:$16 sps:$4 sm:$0xff]  }
 0x22a   :  { %v2417_v19 = vpop.f32.mrf.mxu0  ;;  %v7116_v4 = vld [vmem:[#allocation5 + $0x524] ss:$16 sps:$4 sm:$0xff]   ;;  %v7174_v31 = vld [vmem:[#allocation5 + $0x7c0] ss:$16 sps:$4 sm:$0xff]  }
 0x22b   :  { %v2418_v25 = vadd.f32 %v2417_v19, %v8265_v56  ;;  %v2530_v10 = vpop.f32.mrf.mxu1  ;;  %v8415_v36 = vpack.c.bf16 %v3082_v1, %v3074_v53  ;;  %5006 = vmatpush2.bf16.msra.mxu0 %v7105_v52  ;;  %v2529_v14 = vadd.f32 %v2528_v49, %v2416_v46  ;;  %v3127_v52 = vmax.f32 %v2325_v47, 0.0  ;;  %v7114_v60 = vld [vmem:[#allocation5 + $0x520] ss:$16 sps:$4 sm:$0xff]  }
 0x22c   :  { %v2419_v0 = vpop.f32.mrf.mxu0  ;;  %5007 = vmatprep.subr.bf16.mxu0 %v7110_v42  ;;  %5111 = vmatpush1.bf16.msra.mxu1 %v7162_v39  ;;  %v3119_v53 = vmax.f32 %v2321_v15, 0.0  ;;  %v3089_v1 = vmax.f32 %v2527_v48, 0.0  ;;  %v7117_v15 = vld [vmem:[#allocation5 + $0x500] ss:$16 sps:$4 sm:$0xff]  }
 0x22d   :  { %v2531_v9 = vadd.f32 %v2530_v10, %v2418_v25  ;;  %v2420_v55 = vadd.f32 %v2419_v0, %v8259_v8  ;;  %v2532_v23 = vpop.f32.mrf.mxu1  ;;  %4942 = vmatprep.mubr.bf16.mxu1 %v8415_v36  ;;  %5112 = vmatprep.subr.bf16.mxu1 %v7170_v12  ;;  %v3090_v26 = vmax.f32 %v2529_v14, 0.0  ;;  %v7119_v10 = vld [vmem:[#allocation5 + $0x504] ss:$16 sps:$4 sm:$0xff]  }
 0x22e   :  { %v2423_v24 = vpop.f32.mrf.mxu0  ;;  %4850 = vmatmul.mubr.bf16.gmra.mxu0 %v8412_v32  ;;  %4943 = vmatmul.mubr.bf16.gmra.mxu1 %v8418_v43  ;;  %v8433_v18 = vpack.c.bf16 %v3127_v52, %v3119_v53  ;;  %v7188_v14 = vld [vmem:[#allocation5 + $0x784] ss:$16 sps:$4 sm:$0xff]   ;;  %v7125_v52 = vld [vmem:[#allocation5 + $0xec] ss:$16 sps:$4 sm:$0xff]  }
 0x22f   :  { %v2533_v63 = vadd.f32 %v2532_v23, %v2420_v55  ;;  %v2536_v17 = vpop.f32.mrf.mxu1  ;;  %4859 = vmatprep.mubr.bf16.mxu0 %v8420_v29  ;;  %5008 = vmatpush2.bf16.msra.mxu0 %v7108_v30  ;;  %v3097_v59 = vmax.f32 %v2531_v9, 0.0  ;;  %v2424_v46 = vadd.f32 %v2423_v24, %v8265_v56  ;;  %v7180_v30 = vld [vmem:[#allocation5 + $0x7a0] ss:$16 sps:$4 sm:$0xff]  }
 0x230   :  { %v2425_v22 = vpop.f32.mrf.mxu0  ;;  %5009 = vmatprep.subr.bf16.mxu0 %v7113_v3  ;;  %5113 = vmatpush2.bf16.msra.mxu1 %v7168_v28 }
 0x231   :  { %v3098_v44 = vmax.f32 %v2533_v63, 0.0  ;;  %v2426_v42 = vadd.f32 %v2425_v22, %v8259_v8  ;;  %v2538_v39 = vpop.f32.mrf.mxu1  ;;  %5114 = vmatprep.subr.bf16.mxu1 %v7176_v33  ;;  %v8435_v19 = vpack.c.bf16 %v3097_v59, %v3089_v1  ;;  %v2537_v9 = vadd.f32 %v2536_v17, %v2424_v46  ;;  %v9369_v63 = vld [vmem:[#allocation12_spill] sm:$0xff] }
 0x232   :  { %v2427_v49 = vpop.f32.mrf.mxu0  ;;  %v7186_v59 = vld [vmem:[#allocation5 + $0x780] ss:$16 sps:$4 sm:$0xff]  }
 0x233   :  { %v2428_v12 = vadd.f32 %v2427_v49, %v8265_v56  ;;  %v2540_v40 = vpop.f32.mrf.mxu1  ;;  %v8431_v5 = vpack.c.bf16 %v3098_v44, %v3090_v26  ;;  %5010 = vmatpush2.bf16.msra.mxu0 %v7111_v16  ;;  %v2539_v47 = vadd.f32 %v2538_v39, %v2426_v42  ;;  %v805_v16 = vsub.s32 5, %v9369_v63  ;;  %v7194_v26 = vld [vmem:[#allocation5 + $0x764] ss:$16 sps:$4 sm:$0xff]  }
 0x234   :  { %v2429_v25 = vpop.f32.mrf.mxu0  ;;  %5011 = vmatprep.subr.bf16.mxu0 %v7116_v4  ;;  %5115 = vmatpush2.bf16.msra.mxu1 %v7174_v31  ;;  %v3105_v44 = vmax.f32 %v2537_v9, 0.0 }
 0x235   :  { %v2541_v0 = vadd.f32 %v2540_v40, %v2428_v12  ;;  %v2430_v3 = vadd.f32 %v2429_v25, %v8259_v8  ;;  %v2542_v28 = vpop.f32.mrf.mxu1  ;;  %4952 = vmatprep.mubr.bf16.mxu1 %v8431_v5  ;;  %5116 = vmatprep.subr.bf16.mxu1 %v7182_v41  ;;  %v3106_v22 = vmax.f32 %v2539_v47, 0.0  ;;  %v801_v41 = vsub.s32 4, %v9369_v63 }
 0x236   :  { %v2433_v55 = vpop.f32.mrf.mxu0  ;;  %4860 = vmatmul.mubr.bf16.gmra.mxu0 %v8433_v18  ;;  %4953 = vmatmul.mubr.bf16.gmra.mxu1 %v8435_v19  ;;  %v8451_v40 = vrot.slane %v8154_v13, %v805_v16 }
 0x237   :  { %v2543_v23 = vadd.f32 %v2542_v28, %v2430_v3  ;;  %v2546_v33 = vpop.f32.mrf.mxu1  ;;  %5012 = vmatpush2.bf16.msra.mxu0 %v7114_v60  ;;  %v3113_v48 = vmax.f32 %v2541_v0, 0.0  ;;  %v2434_v42 = vadd.f32 %v2433_v55, %v8265_v56  ;;  %v7192_v60 = vld [vmem:[#allocation5 + $0x760] ss:$16 sps:$4 sm:$0xff]  }
 0x238   :  { %v2435_v24 = vpop.f32.mrf.mxu0  ;;  %5013 = vmatprep.subr.bf16.mxu0 %v7119_v10  ;;  %5117 = vmatpush2.bf16.msra.mxu1 %v7180_v30  ;;  %v8458_v3 = vld [vmem:[%s9318_s4] sm:$0xff] }
 0x239   :  { %v3114_v4 = vmax.f32 %v2543_v23, 0.0  ;;  %v2436_v17 = vadd.f32 %v2435_v24, %v8259_v8  ;;  %v2548_v31 = vpop.f32.mrf.mxu1  ;;  %5118 = vmatprep.subr.bf16.mxu1 %v7188_v14  ;;  %v8448_v49 = vpack.c.bf16 %v3113_v48, %v3105_v44  ;;  %v2547_v0 = vadd.f32 %v2546_v33, %v2434_v42  ;;  %v7198_v23 = vld [vmem:[#allocation5 + $0x740] ss:$16 sps:$4 sm:$0xff]   ;;  %v7206_v24 = vld [vmem:[#allocation5 + $0x724] ss:$16 sps:$4 sm:$0xff]  }
 0x23a   :  { %v2437_v39 = vpop.f32.mrf.mxu0  ;;  %v8461_v13 = vrot.slane %v8458_v3, %v801_v41  ;;  %v7204_v42 = vld [vmem:[#allocation5 + $0x720] ss:$16 sps:$4 sm:$0xff]  }
 0x23b   :  { %v2438_v53 = vadd.f32 %v2437_v39, %v8265_v56  ;;  %v2550_v1 = vpop.f32.mrf.mxu1  ;;  %v8446_v46 = vpack.c.bf16 %v3114_v4, %v3106_v22  ;;  %5014 = vmatpush2.bf16.msra.mxu0 %v7117_v15  ;;  %9371 = vst [vmem:[#allocation19_spill] sm:$0xff] %v8448_v49  ;;  %v2549_v25 = vadd.f32 %v2548_v31, %v2436_v17  ;;  %v7200_v56 = vld [vmem:[#allocation5 + $0x744] ss:$16 sps:$4 sm:$0xff]   ;;  %v3121_v16 = vmax.f32 %v2547_v0, 0.0  ;;  %v7210_v0 = vld [vmem:[#allocation5 + $0x700] ss:$16 sps:$4 sm:$0xff]  }
 0x23c   :  { %v2439_v12 = vpop.f32.mrf.mxu0  ;;  %5209 = vmatprep.subr.bf16.mxu0 %v7125_v52  ;;  %5119 = vmatpush2.bf16.msra.mxu1 %v7186_v59 }
 0x23d   :  { %9370 = vst [vmem:[#allocation20_spill] sm:$0xff] %v8446_v46  ;;  %v2551_v10 = vadd.f32 %v2550_v1, %v2438_v53  ;;  %v2440_v30 = vadd.f32 %v2439_v12, %v8259_v8  ;;  %v2552_v47 = vpop.f32.mrf.mxu1  ;;  %4962 = vmatprep.mubr.bf16.mxu1 %v8446_v46  ;;  %5120 = vmatprep.subr.bf16.mxu1 %v7194_v26  ;;  %v3122_v15 = vmax.f32 %v2549_v25, 0.0  ;;  %v7212_v1 = vld [vmem:[#allocation5 + $0x704] ss:$16 sps:$4 sm:$0xff]  }
 0x23e   :  { %v2589_v28 = vpop.f32.mrf.mxu0  ;;  %4963 = vmatmul.mubr.bf16.gmra.mxu1 %v8448_v49 }
 0x23f   :  { %v2553_v14 = vadd.f32 %v2552_v47, %v2440_v30  ;;  %v3129_v9 = vmax.f32 %v2551_v10, 0.0  ;;  %v2590_v52 = vadd.f32 %v2589_v28, %v8461_v13 }
 0x240   :  { %v2702_v8 = vpop.f32.mrf.mxu1  ;;  %v2591_v55 = vpop.f32.mrf.mxu0  ;;  %5121 = vmatpush2.bf16.msra.mxu1 %v7192_v60 }
 0x241   :  { %v3130_v48 = vmax.f32 %v2553_v14, 0.0  ;;  %v2592_v33 = vadd.f32 %v2591_v55, %v8451_v40  ;;  %5122 = vmatprep.subr.bf16.mxu1 %v7200_v56  ;;  %v8469_v31 = vpack.c.bf16 %v3129_v9, %v3121_v16  ;;  %v2703_v12 = vadd.f32 %v2702_v8, %v2590_v52  ;;  %v7218_v55 = vld [vmem:[#allocation5 + $0x2ec] ss:$16 sps:$4 sm:$0xff]   ;;  %v7123_v16 = vld [vmem:[#allocation5 + $0xe8] ss:$16 sps:$4 sm:$0xff]  }
 0x242   :  { %v2704_v59 = vpop.f32.mrf.mxu1  ;;  %v2593_v22 = vpop.f32.mrf.mxu0 }
 0x243   :  { %v2594_v4 = vadd.f32 %v2593_v22, %v8461_v13  ;;  %v8467_v17 = vpack.c.bf16 %v3130_v48, %v3122_v15  ;;  %9373 = vst [vmem:[#allocation21_spill] sm:$0xff] %v8469_v31  ;;  %v2705_v39 = vadd.f32 %v2704_v59, %v2592_v33 }
 0x244   :  { %v2706_v26 = vpop.f32.mrf.mxu1  ;;  %v2595_v44 = vpop.f32.mrf.mxu0  ;;  %5123 = vmatpush2.bf16.msra.mxu1 %v7198_v23  ;;  %v3011_v23 = vmax.f32 %v2703_v12, 0.0  ;;  %v7129_v12 = vld [vmem:[#allocation5 + $0xc8] ss:$16 sps:$4 sm:$0xff]  }
 0x245   :  { %9372 = vst [vmem:[#allocation17_spill] sm:$0xff] %v8467_v17  ;;  %v2707_v41 = vadd.f32 %v2706_v26, %v2594_v4  ;;  %v2596_v53 = vadd.f32 %v2595_v44, %v8451_v40  ;;  %4972 = vmatprep.mubr.bf16.mxu1 %v8467_v17  ;;  %5124 = vmatprep.subr.bf16.mxu1 %v7206_v24  ;;  %v3012_v28 = vmax.f32 %v2705_v39, 0.0  ;;  %v7131_v4 = vld [vmem:[#allocation5 + $0xcc] ss:$16 sps:$4 sm:$0xff]  }
 0x246   :  { %v2708_v60 = vpop.f32.mrf.mxu1  ;;  %v2599_v25 = vpop.f32.mrf.mxu0  ;;  %4973 = vmatmul.mubr.bf16.gmra.mxu1 %v8469_v31 }
 0x247   :  { %v2709_v10 = vadd.f32 %v2708_v60, %v2596_v53  ;;  %v3019_v30 = vmax.f32 %v2707_v41, 0.0  ;;  %v2600_v15 = vadd.f32 %v2599_v25, %v8461_v13 }
 0x248   :  { %v2712_v47 = vpop.f32.mrf.mxu1  ;;  %v2601_v56 = vpop.f32.mrf.mxu0  ;;  %5125 = vmatpush2.bf16.msra.mxu1 %v7204_v42 }
 0x249   :  { %v3020_v14 = vmax.f32 %v2709_v10, 0.0  ;;  %v2602_v9 = vadd.f32 %v2601_v56, %v8451_v40  ;;  %5126 = vmatprep.subr.bf16.mxu1 %v7212_v1  ;;  %v8479_v52 = vpack.c.bf16 %v3019_v30, %v3011_v23  ;;  %v2713_v39 = vadd.f32 %v2712_v47, %v2600_v15  ;;  %v7137_v30 = vld [vmem:[#allocation5 + $0xac] ss:$16 sps:$4 sm:$0xff]  }
 0x24a   :  { %v2714_v8 = vpop.f32.mrf.mxu1  ;;  %v2603_v48 = vpop.f32.mrf.mxu0 }
 0x24b   :  { %v2604_v33 = vadd.f32 %v2603_v48, %v8461_v13  ;;  %v8477_v24 = vpack.c.bf16 %v3020_v14, %v3012_v28  ;;  %v2715_v26 = vadd.f32 %v2714_v8, %v2602_v9  ;;  %v3027_v14 = vmax.f32 %v2713_v39, 0.0  ;;  %v7135_v8 = vld [vmem:[#allocation5 + $0xa8] ss:$16 sps:$4 sm:$0xff]  }
 0x24c   :  { %v2716_v59 = vpop.f32.mrf.mxu1  ;;  %v2605_v22 = vpop.f32.mrf.mxu0  ;;  %5127 = vmatpush2.bf16.msra.mxu1 %v7210_v0 }
 0x24d   :  { %v2717_v44 = vadd.f32 %v2716_v59, %v2604_v33  ;;  %v2606_v42 = vadd.f32 %v2605_v22, %v8451_v40  ;;  %5015 = vmatprep.mubr.bf16.mxu0 %v8477_v24  ;;  %5322 = vmatprep.subr.bf16.mxu1 %v7218_v55  ;;  %v3028_v56 = vmax.f32 %v2715_v26, 0.0  ;;  %v7143_v59 = vld [vmem:[#allocation5 + $0x8c] ss:$16 sps:$4 sm:$0xff]  }
 0x24e   :  { %v2718_v41 = vpop.f32.mrf.mxu1  ;;  %v2609_v53 = vpop.f32.mrf.mxu0  ;;  %5016 = vmatmul.mubr.bf16.vlgmr.msra.gmra.mxu0 %v8479_v52 }
 0x24f   :  { %v2719_v1 = vadd.f32 %v2718_v41, %v2606_v42  ;;  %5210 = vmatpush1.bf16.msra.mxu0 %v7123_v16  ;;  %v3035_v60 = vmax.f32 %v2717_v44, 0.0  ;;  %v2610_v9 = vadd.f32 %v2609_v53, %v8461_v13  ;;  %v7141_v53 = vld [vmem:[#allocation5 + $0x88] ss:$16 sps:$4 sm:$0xff]  }
 0x250   :  { %v2722_v25 = vpop.f32.mrf.mxu1  ;;  %v2611_v10 = vpop.f32.mrf.mxu0  ;;  %5211 = vmatprep.subr.bf16.mxu0 %v7131_v4 }
 0x251   :  { %v3036_v0 = vmax.f32 %v2719_v1, 0.0  ;;  %v2612_v28 = vadd.f32 %v2611_v10, %v8451_v40  ;;  %v8489_v48 = vpack.c.bf16 %v3035_v60, %v3027_v14  ;;  %v2723_v44 = vadd.f32 %v2722_v25, %v2610_v9  ;;  %v7149_v10 = vld [vmem:[#allocation5 + $0x6c] ss:$16 sps:$4 sm:$0xff]  }
 0x252   :  { %v2724_v47 = vpop.f32.mrf.mxu1  ;;  %v2613_v55 = vpop.f32.mrf.mxu0 }
 0x253   :  { %v2614_v23 = vadd.f32 %v2613_v55, %v8461_v13  ;;  %5212 = vmatpush1.bf16.msra.mxu0 %v7129_v12  ;;  %v8487_v15 = vpack.c.bf16 %v3036_v0, %v3028_v56  ;;  %v2725_v22 = vadd.f32 %v2724_v47, %v2612_v28  ;;  %v3043_v28 = vmax.f32 %v2723_v44, 0.0 }
 0x254   :  { %v2726_v33 = vpop.f32.mrf.mxu1  ;;  %v2615_v16 = vpop.f32.mrf.mxu0  ;;  %5213 = vmatprep.subr.bf16.mxu0 %v7137_v30 }
 0x255   :  { %v2727_v4 = vadd.f32 %v2726_v33, %v2614_v23  ;;  %v2616_v26 = vadd.f32 %v2615_v16, %v8451_v40  ;;  %5025 = vmatprep.mubr.bf16.mxu0 %v8487_v15  ;;  %v3044_v30 = vmax.f32 %v2725_v22, 0.0  ;;  %v7147_v23 = vld [vmem:[#allocation5 + $0x68] ss:$16 sps:$4 sm:$0xff]  }
 0x256   :  { %v2728_v42 = vpop.f32.mrf.mxu1  ;;  %v2619_v39 = vpop.f32.mrf.mxu0  ;;  %5026 = vmatmul.mubr.bf16.gmra.mxu0 %v8489_v48 }
 0x257   :  { %v2729_v41 = vadd.f32 %v2728_v42, %v2616_v26  ;;  %5214 = vmatpush1.bf16.msra.mxu0 %v7135_v8  ;;  %v3051_v1 = vmax.f32 %v2727_v4, 0.0  ;;  %v2620_v14 = vadd.f32 %v2619_v39, %v8461_v13 }
 0x258   :  { %v2732_v12 = vpop.f32.mrf.mxu1  ;;  %v2621_v60 = vpop.f32.mrf.mxu0  ;;  %5215 = vmatprep.subr.bf16.mxu0 %v7143_v59  ;;  %v7155_v59 = vld [vmem:[#allocation5 + $0x4c] ss:$16 sps:$4 sm:$0xff]  }
 0x259   :  { %v3052_v56 = vmax.f32 %v2729_v41, 0.0  ;;  %v2622_v0 = vadd.f32 %v2621_v60, %v8451_v40  ;;  %v8499_v8 = vpack.c.bf16 %v3051_v1, %v3043_v28  ;;  %v2733_v44 = vadd.f32 %v2732_v12, %v2620_v14 }
 0x25a   :  { %v2734_v25 = vpop.f32.mrf.mxu1  ;;  %v2623_v9 = vpop.f32.mrf.mxu0 }
 0x25b   :  { %v2624_v47 = vadd.f32 %v2623_v9, %v8461_v13  ;;  %5216 = vmatpush1.bf16.msra.mxu0 %v7141_v53  ;;  %v8497_v55 = vpack.c.bf16 %v3052_v56, %v3044_v30  ;;  %v2735_v22 = vadd.f32 %v2734_v25, %v2622_v0  ;;  %v7153_v53 = vld [vmem:[#allocation5 + $0x48] ss:$16 sps:$4 sm:$0xff]   ;;  %v3059_v25 = vmax.f32 %v2733_v44, 0.0 }
 0x25c   :  { %v2736_v33 = vpop.f32.mrf.mxu1  ;;  %v2625_v16 = vpop.f32.mrf.mxu0  ;;  %5217 = vmatprep.subr.bf16.mxu0 %v7149_v10  ;;  %v7161_v10 = vld [vmem:[#allocation5 + $0x2c] ss:$16 sps:$4 sm:$0xff]  }
 0x25d   :  { %v2737_v4 = vadd.f32 %v2736_v33, %v2624_v47  ;;  %v2626_v26 = vadd.f32 %v2625_v16, %v8451_v40  ;;  %5035 = vmatprep.mubr.bf16.mxu0 %v8497_v55  ;;  %v3060_v56 = vmax.f32 %v2735_v22, 0.0  ;;  %v7167_v22 = vld [vmem:[#allocation5 + $0xc] ss:$16 sps:$4 sm:$0xff]  }
 0x25e   :  { %v2738_v42 = vpop.f32.mrf.mxu1  ;;  %v2629_v39 = vpop.f32.mrf.mxu0  ;;  %5036 = vmatmul.mubr.bf16.gmra.mxu0 %v8499_v8 }
 0x25f   :  { %v2739_v41 = vadd.f32 %v2738_v42, %v2626_v26  ;;  %5218 = vmatpush1.bf16.msra.mxu0 %v7147_v23  ;;  %v3067_v1 = vmax.f32 %v2737_v4, 0.0  ;;  %v2630_v9 = vadd.f32 %v2629_v39, %v8461_v13  ;;  %v7159_v23 = vld [vmem:[#allocation5 + $0x28] ss:$16 sps:$4 sm:$0xff]  }
 0x260   :  { %v2742_v60 = vpop.f32.mrf.mxu1  ;;  %v2631_v30 = vpop.f32.mrf.mxu0  ;;  %5219 = vmatprep.subr.bf16.mxu0 %v7155_v59 }
 0x261   :  { %v3068_v0 = vmax.f32 %v2739_v41, 0.0  ;;  %v2632_v28 = vadd.f32 %v2631_v30, %v8451_v40  ;;  %v8509_v16 = vpack.c.bf16 %v3067_v1, %v3059_v25  ;;  %v2743_v39 = vadd.f32 %v2742_v60, %v2630_v9 }
 0x262   :  { %v2744_v12 = vpop.f32.mrf.mxu1  ;;  %v2633_v14 = vpop.f32.mrf.mxu0 }
 0x263   :  { %v2634_v47 = vadd.f32 %v2633_v14, %v8461_v13  ;;  %5220 = vmatpush1.bf16.msra.mxu0 %v7153_v53  ;;  %v8507_v33 = vpack.c.bf16 %v3068_v0, %v3060_v56  ;;  %v2745_v26 = vadd.f32 %v2744_v12, %v2632_v28  ;;  %v7165_v56 = vld [vmem:[#allocation5 + $0x8] ss:$16 sps:$4 sm:$0xff]  }
 0x264   :  { %v2746_v4 = vpop.f32.mrf.mxu1  ;;  %v2635_v59 = vpop.f32.mrf.mxu0  ;;  %5221 = vmatprep.subr.bf16.mxu0 %v7161_v10  ;;  %v7173_v10 = vld [vmem:[#allocation5 + $0x1ec] ss:$16 sps:$4 sm:$0xff]  }
 0x265   :  { %v2747_v42 = vadd.f32 %v2746_v4, %v2634_v47  ;;  %v2636_v44 = vadd.f32 %v2635_v59, %v8451_v40  ;;  %5045 = vmatprep.mubr.bf16.mxu0 %v8507_v33  ;;  %v3076_v14 = vmax.f32 %v2745_v26, 0.0  ;;  %v3075_v47 = vmax.f32 %v2743_v39, 0.0  ;;  %v7179_v26 = vld [vmem:[#allocation5 + $0x1cc] ss:$16 sps:$4 sm:$0xff]  }
 0x266   :  { %v2748_v41 = vpop.f32.mrf.mxu1  ;;  %v2639_v30 = vpop.f32.mrf.mxu0  ;;  %5046 = vmatmul.mubr.bf16.gmra.mxu0 %v8509_v16 }
 0x267   :  { %v2749_v53 = vadd.f32 %v2748_v41, %v2636_v44  ;;  %5222 = vmatpush1.bf16.msra.mxu0 %v7159_v23  ;;  %v3083_v1 = vmax.f32 %v2747_v42, 0.0  ;;  %v2640_v4 = vadd.f32 %v2639_v30, %v8461_v13  ;;  %v7171_v23 = vld [vmem:[#allocation5 + $0x1e8] ss:$16 sps:$4 sm:$0xff]  }
 0x268   :  { %v2752_v0 = vpop.f32.mrf.mxu1  ;;  %v2641_v25 = vpop.f32.mrf.mxu0  ;;  %5223 = vmatprep.subr.bf16.mxu0 %v7167_v22 }
 0x269   :  { %v3084_v28 = vmax.f32 %v2749_v53, 0.0  ;;  %v2642_v12 = vadd.f32 %v2641_v25, %v8451_v40  ;;  %v8519_v42 = vpack.c.bf16 %v3083_v1, %v3075_v47  ;;  %v2753_v30 = vadd.f32 %v2752_v0, %v2640_v4 }
 0x26a   :  { %v2754_v60 = vpop.f32.mrf.mxu1  ;;  %v2643_v9 = vpop.f32.mrf.mxu0 }
 0x26b   :  { %v2644_v59 = vadd.f32 %v2643_v9, %v8461_v13  ;;  %5224 = vmatpush1.bf16.msra.mxu0 %v7165_v56  ;;  %v8517_v44 = vpack.c.bf16 %v3084_v28, %v3076_v14  ;;  %v2755_v53 = vadd.f32 %v2754_v60, %v2642_v12  ;;  %v7177_v14 = vld [vmem:[#allocation5 + $0x1c8] ss:$16 sps:$4 sm:$0xff]  }
 0x26c   :  { %v2756_v41 = vpop.f32.mrf.mxu1  ;;  %v2645_v22 = vpop.f32.mrf.mxu0  ;;  %5225 = vmatprep.subr.bf16.mxu0 %v7173_v10  ;;  %v7185_v10 = vld [vmem:[#allocation5 + $0x1ac] ss:$16 sps:$4 sm:$0xff]  }
 0x26d   :  { %v2757_v31 = vadd.f32 %v2756_v41, %v2644_v59  ;;  %v2646_v39 = vadd.f32 %v2645_v22, %v8451_v40  ;;  %5055 = vmatprep.mubr.bf16.mxu0 %v8517_v44  ;;  %v3092_v9 = vmax.f32 %v2755_v53, 0.0  ;;  %v3091_v59 = vmax.f32 %v2753_v30, 0.0  ;;  %v7191_v53 = vld [vmem:[#allocation5 + $0x18c] ss:$16 sps:$4 sm:$0xff]  }
 0x26e   :  { %v2758_v25 = vpop.f32.mrf.mxu1  ;;  %v2649_v17 = vpop.f32.mrf.mxu0  ;;  %5056 = vmatmul.mubr.bf16.gmra.mxu0 %v8519_v42 }
 0x26f   :  { %v2759_v56 = vadd.f32 %v2758_v25, %v2646_v39  ;;  %5226 = vmatpush2.bf16.msra.mxu0 %v7171_v23  ;;  %v3099_v1 = vmax.f32 %v2757_v31, 0.0  ;;  %v2650_v41 = vadd.f32 %v2649_v17, %v8461_v13  ;;  %v7183_v23 = vld [vmem:[#allocation5 + $0x1a8] ss:$16 sps:$4 sm:$0xff]  }
 0x270   :  { %v2762_v28 = vpop.f32.mrf.mxu1  ;;  %v2651_v47 = vpop.f32.mrf.mxu0  ;;  %5227 = vmatprep.subr.bf16.mxu0 %v7179_v26 }
 0x271   :  { %v3100_v12 = vmax.f32 %v2759_v56, 0.0  ;;  %v2652_v60 = vadd.f32 %v2651_v47, %v8451_v40  ;;  %v8529_v31 = vpack.c.bf16 %v3099_v1, %v3091_v59  ;;  %v2763_v17 = vadd.f32 %v2762_v28, %v2650_v41 }
 0x272   :  { %v2764_v0 = vpop.f32.mrf.mxu1  ;;  %v2653_v4 = vpop.f32.mrf.mxu0 }
 0x273   :  { %v2654_v22 = vadd.f32 %v2653_v4, %v8461_v13  ;;  %5228 = vmatpush2.bf16.msra.mxu0 %v7177_v14  ;;  %v8527_v39 = vpack.c.bf16 %v3100_v12, %v3092_v9  ;;  %9374 = vst [vmem:[#allocation18_spill] sm:$0xff] %v8529_v31  ;;  %v2765_v56 = vadd.f32 %v2764_v0, %v2652_v60  ;;  %v7189_v9 = vld [vmem:[#allocation5 + $0x188] ss:$16 sps:$4 sm:$0xff]  }
 0x274   :  { %v2766_v25 = vpop.f32.mrf.mxu1  ;;  %v2655_v26 = vpop.f32.mrf.mxu0  ;;  %5229 = vmatprep.subr.bf16.mxu0 %v7185_v10  ;;  %v7197_v10 = vld [vmem:[#allocation5 + $0x16c] ss:$16 sps:$4 sm:$0xff]  }
 0x275   :  { %v2767_v49 = vadd.f32 %v2766_v25, %v2654_v22  ;;  %v2656_v30 = vadd.f32 %v2655_v26, %v8451_v40  ;;  %5065 = vmatprep.mubr.bf16.mxu0 %v8527_v39  ;;  %v3108_v4 = vmax.f32 %v2765_v56, 0.0  ;;  %v813_v22 = vsub.s32 7, %v9369_v63 }
 0x276   :  { %v2768_v47 = vpop.f32.mrf.mxu1  ;;  %v2659_v46 = vpop.f32.mrf.mxu0  ;;  %5066 = vmatmul.mubr.bf16.gmra.mxu0 %v8529_v31  ;;  %v3107_v25 = vmax.f32 %v2763_v17, 0.0 }
 0x277   :  { %v2769_v14 = vadd.f32 %v2768_v47, %v2656_v30  ;;  %5230 = vmatpush2.bf16.msra.mxu0 %v7183_v23  ;;  %v3115_v1 = vmax.f32 %v2767_v49, 0.0  ;;  %v2660_v28 = vadd.f32 %v2659_v46, %v8461_v13  ;;  %v809_v30 = vsub.s32 6, %v9369_v63 }
 0x278   :  { %v2772_v12 = vpop.f32.mrf.mxu1  ;;  %v2661_v59 = vpop.f32.mrf.mxu0  ;;  %5231 = vmatprep.subr.bf16.mxu0 %v7191_v53  ;;  %v7195_v53 = vld [vmem:[#allocation5 + $0x168] ss:$16 sps:$4 sm:$0xff]   ;;  %v8546_v63 = vrot.slane %v8458_v3, %v813_v22 }
 0x279   :  { %v3116_v60 = vmax.f32 %v2769_v14, 0.0  ;;  %v2662_v0 = vadd.f32 %v2661_v59, %v8451_v40  ;;  %v8541_v47 = vpack.c.bf16 %v3115_v1, %v3107_v25  ;;  %v7203_v59 = vld [vmem:[#allocation5 + $0x14c] ss:$16 sps:$4 sm:$0xff]  }
 0x27a   :  { %v2774_v41 = vpop.f32.mrf.mxu1  ;;  %v2663_v26 = vpop.f32.mrf.mxu0 }
 0x27b   :  { %v2664_v23 = vadd.f32 %v2663_v26, %v8461_v13  ;;  %5232 = vmatpush2.bf16.msra.mxu0 %v7189_v9  ;;  %v8539_v49 = vpack.c.bf16 %v3116_v60, %v3108_v4  ;;  %9375 = vst [vmem:[#allocation23_spill] sm:$0xff] %v8541_v47  ;;  %v2775_v31 = vadd.f32 %v2774_v41, %v2662_v0 }
 0x27c   :  { %v2776_v56 = vpop.f32.mrf.mxu1  ;;  %v2665_v14 = vpop.f32.mrf.mxu0  ;;  %5233 = vmatprep.subr.bf16.mxu0 %v7197_v10  ;;  %v2773_v13 = vadd.f32 %v2772_v12, %v2660_v28  ;;  %v8549_v4 = vrot.slane %v8458_v3, %v809_v30  ;;  %v7201_v10 = vld [vmem:[#allocation5 + $0x148] ss:$16 sps:$4 sm:$0xff]  }
 0x27d   :  { %v2777_v17 = vadd.f32 %v2776_v56, %v2664_v23  ;;  %v2666_v46 = vadd.f32 %v2665_v14, %v8451_v40  ;;  %5075 = vmatprep.mubr.bf16.mxu0 %v8539_v49  ;;  %v7209_v40 = vld [vmem:[#allocation5 + $0x12c] ss:$16 sps:$4 sm:$0xff]   ;;  %v3124_v26 = vmax.f32 %v2775_v31, 0.0 }
 0x27e   :  { %v2778_v9 = vpop.f32.mrf.mxu1  ;;  %v2815_v1 = vpop.f32.mrf.mxu0  ;;  %5076 = vmatmul.mubr.bf16.gmra.mxu0 %v8541_v47  ;;  %v3123_v12 = vmax.f32 %v2773_v13, 0.0  ;;  %v7215_v31 = vld [vmem:[#allocation5 + $0x10c] ss:$16 sps:$4 sm:$0xff]  }
 0x27f   :  { %v2779_v60 = vadd.f32 %v2778_v9, %v2666_v46  ;;  %5234 = vmatpush2.bf16.msra.mxu0 %v7195_v53  ;;  %v3131_v0 = vmax.f32 %v2777_v17, 0.0  ;;  %v2816_v28 = vadd.f32 %v2815_v1, %v8549_v4  ;;  %v7207_v53 = vld [vmem:[#allocation5 + $0x128] ss:$16 sps:$4 sm:$0xff]  }
 0x280   :  { %v2928_v25 = vpop.f32.mrf.mxu1  ;;  %v2817_v41 = vpop.f32.mrf.mxu0  ;;  %5235 = vmatprep.subr.bf16.mxu0 %v7203_v59 }
 0x281   :  { %v3132_v23 = vmax.f32 %v2779_v60, 0.0  ;;  %v2818_v22 = vadd.f32 %v2817_v41, %v8546_v63  ;;  %v8557_v17 = vpack.c.bf16 %v3131_v0, %v3123_v12  ;;  %v2929_v1 = vadd.f32 %v2928_v25, %v2816_v28  ;;  %v7213_v0 = vld [vmem:[#allocation5 + $0x108] ss:$16 sps:$4 sm:$0xff]  }
 0x282   :  { %v2930_v3 = vpop.f32.mrf.mxu1  ;;  %v2819_v30 = vpop.f32.mrf.mxu0 }
 0x283   :  { %v2820_v56 = vadd.f32 %v2819_v30, %v8549_v4  ;;  %5236 = vmatpush2.bf16.msra.mxu0 %v7201_v10  ;;  %v8555_v14 = vpack.c.bf16 %v3132_v23, %v3124_v26  ;;  %9377 = vst [vmem:[#allocation24_spill] sm:$0xff] %v8557_v17  ;;  %v2931_v9 = vadd.f32 %v2930_v3, %v2818_v22  ;;  %v9378_v26 = vld [vmem:[#allocation25_spill] sm:$0xff] }
 0x284   :  { %v2932_v46 = vpop.f32.mrf.mxu1  ;;  %v2821_v59 = vpop.f32.mrf.mxu0  ;;  %5237 = vmatprep.subr.bf16.mxu0 %v7209_v40  ;;  %v7221_v22 = vld [vmem:[#allocation5 + $0x4ec] ss:$16 sps:$4 sm:$0xff]  }
 0x285   :  { %9376 = vst [vmem:[#allocation22_spill] sm:$0xff] %v8555_v14  ;;  %v2933_v60 = vadd.f32 %v2932_v46, %v2820_v56  ;;  %v2822_v13 = vadd.f32 %v2821_v59, %v8546_v63  ;;  %5085 = vmatprep.mubr.bf16.mxu0 %v8555_v14  ;;  %v3014_v3 = vmax.f32 %v2931_v9, 0.0  ;;  %v3013_v46 = vmax.f32 %v2929_v1, 0.0  ;;  %v7224_v9 = vld [vmem:[#allocation5 + $0x2cc] ss:$16 sps:$4 sm:$0xff]  }
 0x286   :  { %v2934_v41 = vpop.f32.mrf.mxu1  ;;  %v2825_v47 = vpop.f32.mrf.mxu0  ;;  %5086 = vmatmul.mubr.bf16.gmra.mxu0 %v8557_v17  ;;  %v7219_v17 = vld [vmem:[#allocation5 + $0x4e8] ss:$16 sps:$4 sm:$0xff]  }
 0x287   :  { %v2935_v10 = vadd.f32 %v2934_v41, %v2822_v13  ;;  %5238 = vmatpush2.bf16.msra.mxu0 %v7207_v53  ;;  %5241 = vmatprep.mubr.bf16.mxu0 %v9378_v26  ;;  %v3021_v23 = vmax.f32 %v2933_v60, 0.0  ;;  %v2826_v25 = vadd.f32 %v2825_v47, %v8549_v4  ;;  %v7216_v41 = vld [vmem:[#allocation5 + $0x2e8] ss:$16 sps:$4 sm:$0xff]   ;;  %v7227_v47 = vld [vmem:[#allocation5 + $0x4cc] ss:$16 sps:$4 sm:$0xff]  }
 0x288   :  { %v2938_v12 = vpop.f32.mrf.mxu1  ;;  %v2827_v40 = vpop.f32.mrf.mxu0  ;;  %5239 = vmatprep.subr.bf16.mxu0 %v7215_v31 }
 0x289   :  { %v3022_v30 = vmax.f32 %v2935_v10, 0.0  ;;  %v2828_v56 = vadd.f32 %v2827_v40, %v8546_v63  ;;  %v8568_v60 = vpack.c.bf16 %v3021_v23, %v3013_v46  ;;  %v2939_v14 = vadd.f32 %v2938_v12, %v2826_v25 }
 0x28a   :  { %v2940_v28 = vpop.f32.mrf.mxu1  ;;  %v2829_v59 = vpop.f32.mrf.mxu0 }
 0x28b   :  { %v2830_v13 = vadd.f32 %v2829_v59, %v8549_v4  ;;  %5240 = vmatpush2.bf16.msra.mxu0 %v7213_v0  ;;  %v8566_v53 = vpack.c.bf16 %v3022_v30, %v3014_v3  ;;  %9379 = vst [vmem:[#allocation12_spill] sm:$0xff] %v8568_v60  ;;  %v2941_v10 = vadd.f32 %v2940_v28, %v2828_v56  ;;  %v9380_v3 = vld [vmem:[#allocation26_spill] sm:$0xff]  ;;  %v7225_v28 = vld [vmem:[#allocation5 + $0x4c8] ss:$16 sps:$4 sm:$0xff]  }
 0x28c   :  { %v2942_v26 = vpop.f32.mrf.mxu1  ;;  %v2831_v31 = vpop.f32.mrf.mxu0  ;;  %5435 = vmatprep.subr.bf16.mxu0 %v7221_v22  ;;  %v7222_v22 = vld [vmem:[#allocation5 + $0x2c8] ss:$16 sps:$4 sm:$0xff]  }
 0x28d   :  { %v2943_v40 = vadd.f32 %v2942_v26, %v2830_v13  ;;  %v2832_v1 = vadd.f32 %v2831_v31, %v8546_v63  ;;  %5128 = vmatprep.mubr.bf16.mxu1 %v8566_v53  ;;  %v7230_v13 = vld [vmem:[#allocation5 + $0x2ac] ss:$16 sps:$4 sm:$0xff]   ;;  %v3030_v26 = vmax.f32 %v2941_v10, 0.0 }
 0x28e   :  { %v2944_v59 = vpop.f32.mrf.mxu1  ;;  %v2835_v0 = vpop.f32.mrf.mxu0  ;;  %5129 = vmatmul.mubr.bf16.vlgmr.msra.gmra.mxu1 %v8568_v60  ;;  %5242 = vmatmul.mubr.bf16.vlgmr.msra.gmra.mxu0 %v8247_v7  ;;  %v7233_v31 = vld [vmem:[#allocation5 + $0x4ac] ss:$16 sps:$4 sm:$0xff]   ;;  %v3029_v60 = vmax.f32 %v2939_v14, 0.0 }
 0x28f   :  { %v2945_v23 = vadd.f32 %v2944_v59, %v2832_v1  ;;  %5323 = vmatpush1.bf16.msra.mxu1 %v7216_v41  ;;  %5251 = vmatprep.mubr.bf16.mxu0 %v9380_v3  ;;  %v3037_v30 = vmax.f32 %v2943_v40, 0.0  ;;  %v2836_v7 = vadd.f32 %v2835_v0, %v8549_v4 }
 0x290   :  { %v2948_v56 = vpop.f32.mrf.mxu1  ;;  %5436 = vmatpush1.bf16.msra.mxu0 %v7219_v17  ;;  %v2837_v46 = vpop.f32.mrf.mxu0  ;;  %5324 = vmatprep.subr.bf16.mxu1 %v7224_v9  ;;  %v7228_v17 = vld [vmem:[#allocation5 + $0x2a8] ss:$16 sps:$4 sm:$0xff]  }
 0x291   :  { %v3038_v12 = vmax.f32 %v2945_v23, 0.0  ;;  %v2838_v25 = vadd.f32 %v2837_v46, %v8546_v63  ;;  %5437 = vmatprep.subr.bf16.mxu0 %v7227_v47  ;;  %v8580_v9 = vpack.c.bf16 %v3037_v30, %v3029_v60  ;;  %v7231_v23 = vld [vmem:[#allocation5 + $0x4a8] ss:$16 sps:$4 sm:$0xff]   ;;  %v7236_v47 = vld [vmem:[#allocation5 + $0x28c] ss:$16 sps:$4 sm:$0xff]  }
 0x292   :  { %v2950_v41 = vpop.f32.mrf.mxu1  ;;  %v2839_v1 = vpop.f32.mrf.mxu0  ;;  %v7234_v30 = vld [vmem:[#allocation5 + $0x288] ss:$16 sps:$4 sm:$0xff]  }
 0x293   :  { %v2840_v59 = vadd.f32 %v2839_v1, %v8549_v4  ;;  %5325 = vmatpush1.bf16.msra.mxu1 %v7222_v22  ;;  %v8578_v40 = vpack.c.bf16 %v3038_v12, %v3030_v26  ;;  %v2951_v46 = vadd.f32 %v2950_v41, %v2838_v25  ;;  %v7239_v1 = vld [vmem:[#allocation5 + $0x48c] ss:$16 sps:$4 sm:$0xff]   ;;  %v2949_v22 = vadd.f32 %v2948_v56, %v2836_v7  ;;  %v7237_v41 = vld [vmem:[#allocation5 + $0x488] ss:$16 sps:$4 sm:$0xff]  }
 0x294   :  { %v2952_v3 = vpop.f32.mrf.mxu1  ;;  %5438 = vmatpush1.bf16.msra.mxu0 %v7225_v28  ;;  %v2841_v10 = vpop.f32.mrf.mxu0  ;;  %5326 = vmatprep.subr.bf16.mxu1 %v7230_v13 }
 0x295   :  { %v2953_v14 = vadd.f32 %v2952_v3, %v2840_v59  ;;  %v2842_v0 = vadd.f32 %v2841_v10, %v8546_v63  ;;  %5138 = vmatprep.mubr.bf16.mxu1 %v8578_v40  ;;  %5439 = vmatprep.subr.bf16.mxu0 %v7233_v31  ;;  %v7242_v31 = vld [vmem:[#allocation5 + $0x26c] ss:$16 sps:$4 sm:$0xff]   ;;  %v3046_v59 = vmax.f32 %v2951_v46, 0.0  ;;  %v3045_v10 = vmax.f32 %v2949_v22, 0.0 }
 0x296   :  { %v2954_v26 = vpop.f32.mrf.mxu1  ;;  %v2845_v12 = vpop.f32.mrf.mxu0  ;;  %5139 = vmatmul.mubr.bf16.gmra.mxu1 %v8580_v9  ;;  %5252 = vmatmul.mubr.bf16.gmra.mxu0 %v8281_v20  ;;  %v7245_v3 = vld [vmem:[#allocation5 + $0x46c] ss:$16 sps:$4 sm:$0xff]  }
 0x297   :  { %v2955_v60 = vadd.f32 %v2954_v26, %v2842_v0  ;;  %5327 = vmatpush1.bf16.msra.mxu1 %v7228_v17  ;;  %5261 = vmatprep.mubr.bf16.mxu0 %v8286_v62  ;;  %v3053_v28 = vmax.f32 %v2953_v14, 0.0  ;;  %v2846_v20 = vadd.f32 %v2845_v12, %v8549_v4 }
 0x298   :  { %v2958_v13 = vpop.f32.mrf.mxu1  ;;  %5440 = vmatpush1.bf16.msra.mxu0 %v7231_v23  ;;  %v2847_v25 = vpop.f32.mrf.mxu0  ;;  %5328 = vmatprep.subr.bf16.mxu1 %v7236_v47  ;;  %v7240_v23 = vld [vmem:[#allocation5 + $0x268] ss:$16 sps:$4 sm:$0xff]  }
 0x299   :  { %v3054_v56 = vmax.f32 %v2955_v60, 0.0  ;;  %v2848_v7 = vadd.f32 %v2847_v25, %v8546_v63  ;;  %5441 = vmatprep.subr.bf16.mxu0 %v7239_v1  ;;  %v8592_v47 = vpack.c.bf16 %v3053_v28, %v3045_v10  ;;  %v7243_v60 = vld [vmem:[#allocation5 + $0x468] ss:$16 sps:$4 sm:$0xff]   ;;  %v7248_v1 = vld [vmem:[#allocation5 + $0x24c] ss:$16 sps:$4 sm:$0xff]  }
 0x29a   :  { %v2960_v17 = vpop.f32.mrf.mxu1  ;;  %v2849_v0 = vpop.f32.mrf.mxu0 }
 0x29b   :  { %v2850_v62 = vadd.f32 %v2849_v0, %v8549_v4  ;;  %5329 = vmatpush1.bf16.msra.mxu1 %v7234_v30  ;;  %v8590_v14 = vpack.c.bf16 %v3054_v56, %v3046_v59  ;;  %v2961_v25 = vadd.f32 %v2960_v17, %v2848_v7  ;;  %v7251_v0 = vld [vmem:[#allocation5 + $0x44c] ss:$16 sps:$4 sm:$0xff]   ;;  %v2959_v30 = vadd.f32 %v2958_v13, %v2846_v20  ;;  %v7249_v17 = vld [vmem:[#allocation5 + $0x448] ss:$16 sps:$4 sm:$0xff]  }
 0x29c   :  { %v2962_v26 = vpop.f32.mrf.mxu1  ;;  %5442 = vmatpush1.bf16.msra.mxu0 %v7237_v41  ;;  %v2851_v46 = vpop.f32.mrf.mxu0  ;;  %5330 = vmatprep.subr.bf16.mxu1 %v7242_v31  ;;  %v7246_v41 = vld [vmem:[#allocation5 + $0x248] ss:$16 sps:$4 sm:$0xff]  }
 0x29d   :  { %v2963_v22 = vadd.f32 %v2962_v26, %v2850_v62  ;;  %v2852_v12 = vadd.f32 %v2851_v46, %v8546_v63  ;;  %5148 = vmatprep.mubr.bf16.mxu1 %v8590_v14  ;;  %5443 = vmatprep.subr.bf16.mxu0 %v7245_v3  ;;  %v7254_v3 = vld [vmem:[#allocation5 + $0x22c] ss:$16 sps:$4 sm:$0xff]   ;;  %v3062_v62 = vmax.f32 %v2961_v25, 0.0  ;;  %v3061_v46 = vmax.f32 %v2959_v30, 0.0 }
 0x29e   :  { %v2964_v59 = vpop.f32.mrf.mxu1  ;;  %v2855_v56 = vpop.f32.mrf.mxu0  ;;  %5149 = vmatmul.mubr.bf16.gmra.mxu1 %v8592_v47  ;;  %5262 = vmatmul.mubr.bf16.gmra.mxu0 %v8303_v11  ;;  %v7257_v26 = vld [vmem:[#allocation5 + $0x42c] ss:$16 sps:$4 sm:$0xff]  }
 0x29f   :  { %v2965_v28 = vadd.f32 %v2964_v59, %v2852_v12  ;;  %5331 = vmatpush1.bf16.msra.mxu1 %v7240_v23  ;;  %5271 = vmatprep.mubr.bf16.mxu0 %v8315_v54  ;;  %v3069_v31 = vmax.f32 %v2963_v22, 0.0  ;;  %v2856_v11 = vadd.f32 %v2855_v56, %v8549_v4 }
 0x2a0   :  { %v2968_v7 = vpop.f32.mrf.mxu1  ;;  %5444 = vmatpush1.bf16.msra.mxu0 %v7243_v60  ;;  %v2857_v10 = vpop.f32.mrf.mxu0  ;;  %5332 = vmatprep.subr.bf16.mxu1 %v7248_v1  ;;  %v7252_v60 = vld [vmem:[#allocation5 + $0x228] ss:$16 sps:$4 sm:$0xff]  }
 0x2a1   :  { %v3070_v13 = vmax.f32 %v2965_v28, 0.0  ;;  %v2858_v20 = vadd.f32 %v2857_v10, %v8546_v63  ;;  %5445 = vmatprep.subr.bf16.mxu0 %v7251_v0  ;;  %v8604_v1 = vpack.c.bf16 %v3069_v31, %v3061_v46  ;;  %v7255_v28 = vld [vmem:[#allocation5 + $0x428] ss:$16 sps:$4 sm:$0xff]   ;;  %v7260_v0 = vld [vmem:[#allocation5 + $0x20c] ss:$16 sps:$4 sm:$0xff]  }
 0x2a2   :  { %v2970_v23 = vpop.f32.mrf.mxu1  ;;  %v2859_v12 = vpop.f32.mrf.mxu0 }
 0x2a3   :  { %v2860_v54 = vadd.f32 %v2859_v12, %v8549_v4  ;;  %5333 = vmatpush1.bf16.msra.mxu1 %v7246_v41  ;;  %v8602_v22 = vpack.c.bf16 %v3070_v13, %v3062_v62  ;;  %v2971_v10 = vadd.f32 %v2970_v23, %v2858_v20  ;;  %v7263_v12 = vld [vmem:[#allocation5 + $0x40c] ss:$16 sps:$4 sm:$0xff]   ;;  %v2969_v41 = vadd.f32 %v2968_v7, %v2856_v11  ;;  %v7261_v23 = vld [vmem:[#allocation5 + $0x408] ss:$16 sps:$4 sm:$0xff]  }
 0x2a4   :  { %v2972_v59 = vpop.f32.mrf.mxu1  ;;  %5446 = vmatpush1.bf16.msra.mxu0 %v7249_v17  ;;  %v2861_v25 = vpop.f32.mrf.mxu0  ;;  %5334 = vmatprep.subr.bf16.mxu1 %v7254_v3  ;;  %v7258_v17 = vld [vmem:[#allocation5 + $0x208] ss:$16 sps:$4 sm:$0xff]  }
 0x2a5   :  { %v2973_v30 = vadd.f32 %v2972_v59, %v2860_v54  ;;  %v2862_v56 = vadd.f32 %v2861_v25, %v8546_v63  ;;  %5158 = vmatprep.mubr.bf16.mxu1 %v8602_v22  ;;  %5447 = vmatprep.subr.bf16.mxu0 %v7257_v26  ;;  %v7266_v26 = vld [vmem:[#allocation5 + $0x3ec] ss:$16 sps:$4 sm:$0xff]   ;;  %v3078_v54 = vmax.f32 %v2971_v10, 0.0  ;;  %v3077_v25 = vmax.f32 %v2969_v41, 0.0 }
 0x2a6   :  { %v2974_v62 = vpop.f32.mrf.mxu1  ;;  %v2865_v13 = vpop.f32.mrf.mxu0  ;;  %5159 = vmatmul.mubr.bf16.gmra.mxu1 %v8604_v1  ;;  %5272 = vmatmul.mubr.bf16.gmra.mxu0 %v8323_v27  ;;  %v7269_v59 = vld [vmem:[#allocation5 + $0x5ec] ss:$16 sps:$4 sm:$0xff]  }
 0x2a7   :  { %v2975_v31 = vadd.f32 %v2974_v62, %v2862_v56  ;;  %5335 = vmatpush1.bf16.msra.mxu1 %v7252_v60  ;;  %5281 = vmatprep.mubr.bf16.mxu0 %v8343_v37  ;;  %v3085_v3 = vmax.f32 %v2973_v30, 0.0  ;;  %v2866_v27 = vadd.f32 %v2865_v13, %v8549_v4 }
 0x2a8   :  { %v2978_v20 = vpop.f32.mrf.mxu1  ;;  %5448 = vmatpush1.bf16.msra.mxu0 %v7255_v28  ;;  %v2867_v46 = vpop.f32.mrf.mxu0  ;;  %5336 = vmatprep.subr.bf16.mxu1 %v7260_v0  ;;  %v7264_v28 = vld [vmem:[#allocation5 + $0x3e8] ss:$16 sps:$4 sm:$0xff]  }
 0x2a9   :  { %v3086_v7 = vmax.f32 %v2975_v31, 0.0  ;;  %v2868_v11 = vadd.f32 %v2867_v46, %v8546_v63  ;;  %5449 = vmatprep.subr.bf16.mxu0 %v7263_v12  ;;  %v8616_v0 = vpack.c.bf16 %v3085_v3, %v3077_v25  ;;  %v7267_v31 = vld [vmem:[#allocation5 + $0x5e8] ss:$16 sps:$4 sm:$0xff]   ;;  %v7272_v12 = vld [vmem:[#allocation5 + $0x3cc] ss:$16 sps:$4 sm:$0xff]  }
 0x2aa   :  { %v2980_v60 = vpop.f32.mrf.mxu1  ;;  %v2869_v56 = vpop.f32.mrf.mxu0 }
 0x2ab   :  { %v2870_v37 = vadd.f32 %v2869_v56, %v8549_v4  ;;  %5337 = vmatpush1.bf16.msra.mxu1 %v7258_v17  ;;  %v8614_v30 = vpack.c.bf16 %v3086_v7, %v3078_v54  ;;  %v2981_v46 = vadd.f32 %v2980_v60, %v2868_v11  ;;  %v7275_v56 = vld [vmem:[#allocation5 + $0x5cc] ss:$16 sps:$4 sm:$0xff]   ;;  %v2979_v17 = vadd.f32 %v2978_v20, %v2866_v27  ;;  %v7273_v60 = vld [vmem:[#allocation5 + $0x5c8] ss:$16 sps:$4 sm:$0xff]  }
 0x2ac   :  { %v2982_v62 = vpop.f32.mrf.mxu1  ;;  %5450 = vmatpush1.bf16.msra.mxu0 %v7261_v23  ;;  %v2871_v10 = vpop.f32.mrf.mxu0  ;;  %5338 = vmatprep.subr.bf16.mxu1 %v7266_v26  ;;  %v7270_v23 = vld [vmem:[#allocation5 + $0x3c8] ss:$16 sps:$4 sm:$0xff]  }
 0x2ad   :  { %v2983_v41 = vadd.f32 %v2982_v62, %v2870_v37  ;;  %v2872_v13 = vadd.f32 %v2871_v10, %v8546_v63  ;;  %5168 = vmatprep.mubr.bf16.mxu1 %v8614_v30  ;;  %5451 = vmatprep.subr.bf16.mxu0 %v7269_v59  ;;  %v7278_v59 = vld [vmem:[#allocation5 + $0x3ac] ss:$16 sps:$4 sm:$0xff]   ;;  %v3094_v37 = vmax.f32 %v2981_v46, 0.0  ;;  %v3093_v10 = vmax.f32 %v2979_v17, 0.0 }
 0x2ae   :  { %v2984_v54 = vpop.f32.mrf.mxu1  ;;  %v2875_v7 = vpop.f32.mrf.mxu0  ;;  %5169 = vmatmul.mubr.bf16.gmra.mxu1 %v8616_v0  ;;  %5282 = vmatmul.mubr.bf16.gmra.mxu0 %v8361_v50  ;;  %v7281_v62 = vld [vmem:[#allocation5 + $0x5ac] ss:$16 sps:$4 sm:$0xff]  }
 0x2af   :  { %v2985_v3 = vadd.f32 %v2984_v54, %v2872_v13  ;;  %5339 = vmatpush2.bf16.msra.mxu1 %v7264_v28  ;;  %5291 = vmatprep.mubr.bf16.mxu0 %v8370_v6  ;;  %v3101_v26 = vmax.f32 %v2983_v41, 0.0  ;;  %v2876_v50 = vadd.f32 %v2875_v7, %v8549_v4 }
 0x2b0   :  { %v2988_v11 = vpop.f32.mrf.mxu1  ;;  %5452 = vmatpush2.bf16.msra.mxu0 %v7267_v31  ;;  %v2877_v25 = vpop.f32.mrf.mxu0  ;;  %5340 = vmatprep.subr.bf16.mxu1 %v7272_v12  ;;  %v7276_v31 = vld [vmem:[#allocation5 + $0x3a8] ss:$16 sps:$4 sm:$0xff]  }
 0x2b1   :  { %v3102_v20 = vmax.f32 %v2985_v3, 0.0  ;;  %v2878_v27 = vadd.f32 %v2877_v25, %v8546_v63  ;;  %5453 = vmatprep.subr.bf16.mxu0 %v7275_v56  ;;  %v8628_v12 = vpack.c.bf16 %v3101_v26, %v3093_v10  ;;  %v7279_v3 = vld [vmem:[#allocation5 + $0x5a8] ss:$16 sps:$4 sm:$0xff]   ;;  %v7284_v56 = vld [vmem:[#allocation5 + $0x38c] ss:$16 sps:$4 sm:$0xff]  }
 0x2b2   :  { %v2990_v28 = vpop.f32.mrf.mxu1  ;;  %v2879_v13 = vpop.f32.mrf.mxu0 }
 0x2b3   :  { %v2880_v6 = vadd.f32 %v2879_v13, %v8549_v4  ;;  %5341 = vmatpush2.bf16.msra.mxu1 %v7270_v23  ;;  %v8626_v41 = vpack.c.bf16 %v3102_v20, %v3094_v37  ;;  %v2991_v25 = vadd.f32 %v2990_v28, %v2878_v27  ;;  %v7287_v13 = vld [vmem:[#allocation5 + $0x58c] ss:$16 sps:$4 sm:$0xff]   ;;  %v2989_v23 = vadd.f32 %v2988_v11, %v2876_v50  ;;  %v7285_v28 = vld [vmem:[#allocation5 + $0x588] ss:$16 sps:$4 sm:$0xff]  }
 0x2b4   :  { %v2992_v54 = vpop.f32.mrf.mxu1  ;;  %5454 = vmatpush2.bf16.msra.mxu0 %v7273_v60  ;;  %v2881_v46 = vpop.f32.mrf.mxu0  ;;  %5342 = vmatprep.subr.bf16.mxu1 %v7278_v59  ;;  %v7282_v60 = vld [vmem:[#allocation5 + $0x388] ss:$16 sps:$4 sm:$0xff]  }
 0x2b5   :  { %v2993_v17 = vadd.f32 %v2992_v54, %v2880_v6  ;;  %v2882_v7 = vadd.f32 %v2881_v46, %v8546_v63  ;;  %5178 = vmatprep.mubr.bf16.mxu1 %v8626_v41  ;;  %5455 = vmatprep.subr.bf16.mxu0 %v7281_v62  ;;  %v7290_v62 = vld [vmem:[#allocation5 + $0x36c] ss:$16 sps:$4 sm:$0xff]   ;;  %v3110_v6 = vmax.f32 %v2991_v25, 0.0  ;;  %v3109_v46 = vmax.f32 %v2989_v23, 0.0 }
 0x2b6   :  { %v2994_v37 = vpop.f32.mrf.mxu1  ;;  %v2885_v20 = vpop.f32.mrf.mxu0  ;;  %5179 = vmatmul.mubr.bf16.gmra.mxu1 %v8628_v12  ;;  %5292 = vmatmul.mubr.bf16.gmra.mxu0 %v8384_v35  ;;  %v7293_v54 = vld [vmem:[#allocation5 + $0x56c] ss:$16 sps:$4 sm:$0xff]  }
 0x2b7   :  { %v2995_v26 = vadd.f32 %v2994_v37, %v2882_v7  ;;  %5343 = vmatpush2.bf16.msra.mxu1 %v7276_v31  ;;  %5301 = vmatprep.mubr.bf16.mxu0 %v8398_v34  ;;  %v3117_v59 = vmax.f32 %v2993_v17, 0.0  ;;  %v2886_v35 = vadd.f32 %v2885_v20, %v8549_v4 }
 0x2b8   :  { %v2998_v27 = vpop.f32.mrf.mxu1  ;;  %5456 = vmatpush2.bf16.msra.mxu0 %v7279_v3  ;;  %v2887_v10 = vpop.f32.mrf.mxu0  ;;  %5344 = vmatprep.subr.bf16.mxu1 %v7284_v56  ;;  %v7288_v3 = vld [vmem:[#allocation5 + $0x368] ss:$16 sps:$4 sm:$0xff]  }
 0x2b9   :  { %v3118_v11 = vmax.f32 %v2995_v26, 0.0  ;;  %v2888_v50 = vadd.f32 %v2887_v10, %v8546_v63  ;;  %5457 = vmatprep.subr.bf16.mxu0 %v7287_v13  ;;  %v8640_v56 = vpack.c.bf16 %v3117_v59, %v3109_v46  ;;  %v7291_v26 = vld [vmem:[#allocation5 + $0x568] ss:$16 sps:$4 sm:$0xff]   ;;  %v7296_v13 = vld [vmem:[#allocation5 + $0x34c] ss:$16 sps:$4 sm:$0xff]  }
 0x2ba   :  { %v3000_v31 = vpop.f32.mrf.mxu1  ;;  %v2889_v7 = vpop.f32.mrf.mxu0  ;;  %v7302_v46 = vld [vmem:[#allocation5 + $0x32c] ss:$16 sps:$4 sm:$0xff]  }
 0x2bb   :  { %v2890_v34 = vadd.f32 %v2889_v7, %v8549_v4  ;;  %5345 = vmatpush2.bf16.msra.mxu1 %v7282_v60  ;;  %v8638_v17 = vpack.c.bf16 %v3118_v11, %v3110_v6  ;;  %v3001_v10 = vadd.f32 %v3000_v31, %v2888_v50  ;;  %v7299_v4 = vld [vmem:[#allocation5 + $0x54c] ss:$16 sps:$4 sm:$0xff]   ;;  %v2999_v60 = vadd.f32 %v2998_v27, %v2886_v35 }
 0x2bc   :  { %v3002_v37 = vpop.f32.mrf.mxu1  ;;  %5458 = vmatpush2.bf16.msra.mxu0 %v7285_v28  ;;  %v2891_v25 = vpop.f32.mrf.mxu0  ;;  %5346 = vmatprep.subr.bf16.mxu1 %v7290_v62  ;;  %v7294_v28 = vld [vmem:[#allocation5 + $0x348] ss:$16 sps:$4 sm:$0xff]   ;;  %v7305_v27 = vld [vmem:[#allocation5 + $0x52c] ss:$16 sps:$4 sm:$0xff]  }
 0x2bd   :  { %v3003_v23 = vadd.f32 %v3002_v37, %v2890_v34  ;;  %v2892_v20 = vadd.f32 %v2891_v25, %v8546_v63  ;;  %5188 = vmatprep.mubr.bf16.mxu1 %v8638_v17  ;;  %5459 = vmatprep.subr.bf16.mxu0 %v7293_v54  ;;  %v7297_v63 = vld [vmem:[#allocation5 + $0x548] ss:$16 sps:$4 sm:$0xff]   ;;  %v3126_v54 = vmax.f32 %v3001_v10, 0.0  ;;  %v3125_v35 = vmax.f32 %v2999_v60, 0.0  ;;  %v7308_v25 = vld [vmem:[#allocation5 + $0x30c] ss:$16 sps:$4 sm:$0xff]  }
 0x2be   :  { %v3004_v6 = vpop.f32.mrf.mxu1  ;;  %v4791_v11 = vpop.f32.mrf.mxu0  ;;  %5189 = vmatmul.mubr.bf16.gmra.mxu1 %v8640_v56  ;;  %5302 = vmatmul.mubr.bf16.gmra.mxu0 %v8412_v32  ;;  %v7300_v34 = vld [vmem:[#allocation5 + $0x328] ss:$16 sps:$4 sm:$0xff]   ;;  %v7314_v60 = vld [vmem:[#allocation5 + $0x6ec] ss:$16 sps:$4 sm:$0xff]  }
 0x2bf   :  { %v3005_v59 = vadd.f32 %v3004_v6, %v2892_v20  ;;  %5347 = vmatpush2.bf16.msra.mxu1 %v7288_v3  ;;  %5311 = vmatprep.mubr.bf16.mxu0 %v8420_v29  ;;  %v3133_v62 = vmax.f32 %v3003_v23, 0.0  ;;  %v7303_v37 = vld [vmem:[#allocation5 + $0x528] ss:$16 sps:$4 sm:$0xff]  }
 0x2c0   :  { %5460 = vmatpush2.bf16.msra.mxu0 %v7291_v26  ;;  %v4793_v50 = vpop.f32.mrf.mxu0  ;;  %5348 = vmatprep.subr.bf16.mxu1 %v7296_v13  ;;  %v7311_v26 = vld [vmem:[#allocation5 + $0x50c] ss:$16 sps:$4 sm:$0xff]   ;;  %v8659_v13 = vld [vmem:[%s9320_s6] sm:$0xf]  ;;  %v7306_v23 = vld [vmem:[#allocation5 + $0x308] ss:$16 sps:$4 sm:$0xff]  }
 0x2c1   :  { %v3134_v31 = vmax.f32 %v3005_v59, 0.0  ;;  %5461 = vmatprep.subr.bf16.mxu0 %v7299_v4  ;;  %v8651_v3 = vpack.c.bf16 %v3133_v62, %v3125_v35  ;;  %9381 = vst [vmem:[#allocation25_spill] sm:$0xff] %v8659_v13  ;;  %v7309_v4 = vld [vmem:[#allocation5 + $0x508] ss:$16 sps:$4 sm:$0xff]  }
 0x2c2   :  { %v8647_v7 = vpop.f32.mrf.mxu0  ;;  %v9382_v6 = vld [vmem:[#allocation15_spill] sm:$0xff] }
 0x2c3   :  { %5349 = vmatpush2.bf16.msra.mxu1 %v7294_v28  ;;  %v8649_v32 = vpack.c.bf16 %v3134_v31, %v3126_v54  ;;  %v8667_v59 = vrot.slane %v8659_v13, %v9382_v6  ;;  %v7360_v28 = vld [vmem:[#allocation7 + $0x78] sm:$0xff]  }
 0x2c4   :  { %5462 = vmatpush2.bf16.msra.mxu0 %v7297_v63  ;;  %v8653_v29 = vpop.f32.mrf.mxu0  ;;  %5350 = vmatprep.subr.bf16.mxu1 %v7302_v46  ;;  %v7317_v54 = vld [vmem:[#allocation5 + $0x6cc] ss:$16 sps:$4 sm:$0xff]  }
 0x2c5   :  { %5198 = vmatprep.mubr.bf16.mxu1 %v8649_v32  ;;  %5463 = vmatprep.subr.bf16.mxu0 %v7305_v27  ;;  %v4792_v46 = vadd.f32 %v4791_v11, %v8667_v59  ;;  %v7361_v31 = vld [vmem:[#allocation7 + $0x38] sm:$0xff]  }
 0x2c6   :  { %v4801_v10 = vpop.f32.mrf.mxu0  ;;  %5199 = vmatmul.mubr.bf16.gmra.mxu1 %v8651_v3  ;;  %5312 = vmatmul.mubr.bf16.gmra.mxu0 %v8433_v18  ;;  %v9383_v18 = vld [vmem:[#allocation13_spill] sm:$0xff] }
 0x2c7   :  { %5351 = vmatpush2.bf16.msra.mxu1 %v7300_v34  ;;  %5354 = vmatprep.mubr.bf16.mxu1 %v8306_v21  ;;  %v8673_v63 = vrot.slane %v8659_v13, %v9383_v18  ;;  %v7312_v21 = vld [vmem:[#allocation5 + $0x6e8] ss:$16 sps:$4 sm:$0xff]   ;;  %v7362_v34 = vld [vmem:[#allocation7 + $0x70] sm:$0xff]  }
 0x2c8   :  { %5464 = vmatpush2.bf16.msra.mxu0 %v7303_v37  ;;  %5467 = vmatprep.mubr.bf16.mxu0 %v8477_v24  ;;  %v4803_v20 = vpop.f32.mrf.mxu0  ;;  %v7327_v13 = vld [vmem:[#allocation5 + $0x648] ss:$16 sps:$4 sm:$0xff]  }
 0x2c9   :  { %5352 = vmatprep.subr.bf16.mxu1 %v7308_v25  ;;  %5465 = vmatprep.subr.bf16.mxu0 %v7311_v26  ;;  %v4794_v37 = vadd.f32 %v4793_v50, %v8673_v63  ;;  %v7315_v26 = vld [vmem:[#allocation5 + $0x6c8] ss:$16 sps:$4 sm:$0xff]  }
 0x2ca   :  { %v8669_v62 = vpop.f32.mrf.mxu0 }
 0x2cb   :  { %5353 = vmatpush2.bf16.msra.mxu1 %v7306_v23 }
 0x2cc   :  { %5466 = vmatpush2.bf16.msra.mxu0 %v7309_v4  ;;  %v8675_v24 = vpop.f32.mrf.mxu0  ;;  %5548 = vmatprep.subr.bf16.mxu1 %v7314_v60  ;;  %v7320_v4 = vld [vmem:[#allocation5 + $0x6ac] ss:$16 sps:$4 sm:$0xff]  }
 0x2cd   :  { %6823 = vmatprep.subr.bf16.mxu0 %v7360_v28  ;;  %v7318_v28 = vld [vmem:[#allocation5 + $0x6a8] ss:$16 sps:$4 sm:$0xff]  }
 0x2ce   :  { %v4811_v27 = vpop.f32.mrf.mxu0  ;;  %v4904_v35 = vpop.f32.mrf.mxu1  ;;  %5355 = vmatmul.mubr.bf16.vlgmr.msra.gmra.mxu1 %v8311_v45  ;;  %v7363_v45 = vld [vmem:[#allocation7 + $0x30] sm:$0xff]  }
 0x2cf   :  { %v8680_v25 = vadd.f32 %v4904_v35, %v4792_v46  ;;  %5468 = vmatmul.mubr.bf16.vlgmr.msra.gmra.mxu0 %v8479_v52  ;;  %5549 = vmatpush1.bf16.msra.mxu1 %v7312_v21  ;;  %v7364_v52 = vld [vmem:[#allocation7 + $0x68] sm:$0xff]   ;;  %v7366_v35 = vld [vmem:[#allocation7 + $0x60] sm:$0xff]  }
 0x2d0   :  { %5364 = vmatprep.mubr.bf16.mxu1 %v8338_v51  ;;  %5477 = vmatprep.mubr.bf16.mxu0 %v8487_v15  ;;  %v4813_v11 = vpop.f32.mrf.mxu0  ;;  %v4906_v23 = vpop.f32.mrf.mxu1  ;;  %v4802_v15 = vadd.f32 %v4801_v10, %v8667_v59  ;;  %v7323_v21 = vld [vmem:[#allocation5 + $0x68c] ss:$16 sps:$4 sm:$0xff]  }
 0x2d1   :  { %v8685_v60 = vadd.f32 %v4906_v23, %v4794_v37  ;;  %5550 = vmatprep.subr.bf16.mxu1 %v7317_v54  ;;  %6824 = vmatpush3.bf16.msra.mxu0 %v7361_v31  ;;  %v7365_v46 = vld [vmem:[#allocation7 + $0x28] sm:$0xff]  }
 0x2d2   :  { %v8687_v6 = vpop.f32.mrf.mxu0  ;;  %v8689_v50 = vpop.f32.mrf.mxu1  ;;  %6825 = vmatprep.subr.bf16.mxu0 %v7362_v34  ;;  %v4804_v34 = vadd.f32 %v4803_v20, %v8673_v63 }
 0x2d3   :  { %5551 = vmatpush1.bf16.msra.mxu1 %v7315_v26  ;;  %v7321_v26 = vld [vmem:[#allocation5 + $0x688] ss:$16 sps:$4 sm:$0xff]  }
 0x2d4   :  { %v8691_v18 = vpop.f32.mrf.mxu0  ;;  %v8693_v51 = vpop.f32.mrf.mxu1  ;;  %5552 = vmatprep.subr.bf16.mxu1 %v7320_v4  ;;  %v7326_v4 = vld [vmem:[#allocation5 + $0x66c] ss:$16 sps:$4 sm:$0xff]  }
 0x2d5   :  { %6826 = vmatpush3.bf16.msra.mxu0 %v7363_v45 }
 0x2d6   :  { %v4821_v54 = vpop.f32.mrf.mxu0  ;;  %v4914_v31 = vpop.f32.mrf.mxu1  ;;  %5365 = vmatmul.mubr.bf16.gmra.mxu1 %v8341_v38  ;;  %6827 = vmatprep.subr.bf16.mxu0 %v7364_v52  ;;  %v7367_v38 = vld [vmem:[#allocation7 + $0x20] sm:$0xff]  }
 0x2d7   :  { %v8698_v37 = vadd.f32 %v4914_v31, %v4802_v15  ;;  %5478 = vmatmul.mubr.bf16.gmra.mxu0 %v8489_v48  ;;  %5553 = vmatpush1.bf16.msra.mxu1 %v7318_v28  ;;  %v7368_v48 = vld [vmem:[#allocation7 + $0x58] sm:$0xff]  }
 0x2d8   :  { %5374 = vmatprep.mubr.bf16.mxu1 %v8365_v2  ;;  %5487 = vmatprep.mubr.bf16.mxu0 %v8497_v55  ;;  %v4823_v10 = vpop.f32.mrf.mxu0  ;;  %v4916_v23 = vpop.f32.mrf.mxu1  ;;  %v7324_v28 = vld [vmem:[#allocation5 + $0x668] ss:$16 sps:$4 sm:$0xff]   ;;  %v4812_v55 = vadd.f32 %v4811_v27, %v8667_v59  ;;  %v7329_v31 = vld [vmem:[#allocation5 + $0x64c] ss:$16 sps:$4 sm:$0xff]  }
 0x2d9   :  { %v8703_v45 = vadd.f32 %v4916_v23, %v4804_v34  ;;  %5554 = vmatprep.subr.bf16.mxu1 %v7323_v21  ;;  %6828 = vmatpush3.bf16.msra.mxu0 %v7365_v46  ;;  %v7369_v21 = vld [vmem:[#allocation7 + $0x18] sm:$0xff]   ;;  %v7370_v23 = vld [vmem:[#allocation7 + $0x50] sm:$0xff]  }
 0x2da   :  { %v8705_v52 = vpop.f32.mrf.mxu0  ;;  %v8707_v20 = vpop.f32.mrf.mxu1  ;;  %6829 = vmatprep.subr.bf16.mxu0 %v7366_v35  ;;  %v4814_v35 = vadd.f32 %v4813_v11, %v8673_v63 }
 0x2db   :  { %5555 = vmatpush1.bf16.msra.mxu1 %v7321_v26 }
 0x2dc   :  { %v8709_v15 = vpop.f32.mrf.mxu0  ;;  %v8711_v2 = vpop.f32.mrf.mxu1  ;;  %5556 = vmatprep.subr.bf16.mxu1 %v7326_v4 }
 0x2dd   :  { %9384 = vst [vmem:[#allocation26_spill] sm:$0xff] %v8709_v15  ;;  %6830 = vmatpush3.bf16.msra.mxu0 %v7367_v38  ;;  %v7332_v38 = vld [vmem:[#allocation5 + $0x62c] ss:$16 sps:$4 sm:$0xff]  }
 0x2de   :  { %v4831_v46 = vpop.f32.mrf.mxu0  ;;  %v4924_v34 = vpop.f32.mrf.mxu1  ;;  %5375 = vmatmul.mubr.bf16.gmra.mxu1 %v8368_v58  ;;  %6831 = vmatprep.subr.bf16.mxu0 %v7368_v48  ;;  %v7371_v58 = vld [vmem:[#allocation7 + $0x10] sm:$0xff]  }
 0x2df   :  { %v8716_v26 = vadd.f32 %v4924_v34, %v4812_v55  ;;  %5488 = vmatmul.mubr.bf16.gmra.mxu0 %v8499_v8  ;;  %5557 = vmatpush1.bf16.msra.mxu1 %v7324_v28  ;;  %v7372_v8 = vld [vmem:[#allocation7 + $0x48] sm:$0xff]  }
 0x2e0   :  { %5384 = vmatprep.mubr.bf16.mxu1 %v8393_v61  ;;  %5497 = vmatprep.mubr.bf16.mxu0 %v8507_v33  ;;  %v4833_v27 = vpop.f32.mrf.mxu0  ;;  %v4926_v4 = vpop.f32.mrf.mxu1  ;;  %v7330_v28 = vld [vmem:[#allocation5 + $0x628] ss:$16 sps:$4 sm:$0xff]   ;;  %v4822_v33 = vadd.f32 %v4821_v54, %v8667_v59  ;;  %v7335_v34 = vld [vmem:[#allocation5 + $0x60c] ss:$16 sps:$4 sm:$0xff]  }
 0x2e1   :  { %v8721_v15 = vadd.f32 %v4926_v4, %v4814_v35  ;;  %5558 = vmatprep.subr.bf16.mxu1 %v7329_v31  ;;  %6832 = vmatpush3.bf16.msra.mxu0 %v7369_v21  ;;  %v7373_v31 = vld [vmem:[#allocation7 + $0x8] sm:$0xff]   ;;  %v7374_v4 = vld [vmem:[#allocation7 + $0x40] sm:$0xff]  }
 0x2e2   :  { %v8723_v48 = vpop.f32.mrf.mxu0  ;;  %v8725_v11 = vpop.f32.mrf.mxu1  ;;  %6833 = vmatprep.subr.bf16.mxu0 %v7370_v23  ;;  %v4824_v23 = vadd.f32 %v4823_v10, %v8673_v63 }
 0x2e3   :  { %9385 = vst [vmem:[#allocation15_spill] sm:$0xff] %v8723_v48  ;;  %5559 = vmatpush1.bf16.msra.mxu1 %v7327_v13 }
 0x2e4   :  { %v8727_v55 = vpop.f32.mrf.mxu0  ;;  %v8729_v61 = vpop.f32.mrf.mxu1  ;;  %5560 = vmatprep.subr.bf16.mxu1 %v7332_v38 }
 0x2e5   :  { %9386 = vst [vmem:[#allocation13_spill] sm:$0xff] %v8727_v55  ;;  %6834 = vmatpush3.bf16.msra.mxu0 %v7371_v58  ;;  %v7333_v55 = vld [vmem:[#allocation5 + $0x608] ss:$16 sps:$4 sm:$0xff]   ;;  %v7338_v58 = vld [vmem:[#allocation5 + $0x7ec] ss:$16 sps:$4 sm:$0xff]  }
 0x2e6   :  { %v4841_v21 = vpop.f32.mrf.mxu0  ;;  %v4934_v35 = vpop.f32.mrf.mxu1  ;;  %5385 = vmatmul.mubr.bf16.gmra.mxu1 %v8396_v57  ;;  %6835 = vmatprep.subr.bf16.mxu0 %v7372_v8  ;;  %v7375_v57 = vld [vmem:[#allocation7] sm:$0xff]  }
 0x2e7   :  { %v8734_v13 = vadd.f32 %v4934_v35, %v4822_v33  ;;  %5498 = vmatmul.mubr.bf16.gmra.mxu0 %v8509_v16  ;;  %5561 = vmatpush1.bf16.msra.mxu1 %v7330_v28  ;;  %v7336_v16 = vld [vmem:[#allocation5 + $0x7e8] ss:$16 sps:$4 sm:$0xff]   ;;  %v7341_v33 = vld [vmem:[#allocation5 + $0x7cc] ss:$16 sps:$4 sm:$0xff]  }
 0x2e8   :  { %5394 = vmatprep.mubr.bf16.mxu1 %v8415_v36  ;;  %5507 = vmatprep.mubr.bf16.mxu0 %v8517_v44  ;;  %v4843_v54 = vpop.f32.mrf.mxu0  ;;  %v4936_v38 = vpop.f32.mrf.mxu1  ;;  %v4832_v44 = vadd.f32 %v4831_v46, %v8667_v59  ;;  %v7344_v46 = vld [vmem:[#allocation5 + $0x7ac] ss:$16 sps:$4 sm:$0xff]  }
 0x2e9   :  { %v8739_v48 = vadd.f32 %v4936_v38, %v4824_v23  ;;  %5562 = vmatprep.subr.bf16.mxu1 %v7335_v34  ;;  %6836 = vmatpush3.bf16.msra.mxu0 %v7373_v31  ;;  %v4834_v34 = vadd.f32 %v4833_v27, %v8673_v63 }
 0x2ea   :  { %v8741_v8 = vpop.f32.mrf.mxu0  ;;  %v8743_v10 = vpop.f32.mrf.mxu1  ;;  %6837 = vmatprep.subr.bf16.mxu0 %v7374_v4 }
 0x2eb   :  { %5563 = vmatpush1.bf16.msra.mxu1 %v7333_v55  ;;  %v7339_v55 = vld [vmem:[#allocation5 + $0x7c8] ss:$16 sps:$4 sm:$0xff]  }
 0x2ec   :  { %v8745_v28 = vpop.f32.mrf.mxu0  ;;  %v8747_v36 = vpop.f32.mrf.mxu1  ;;  %5564 = vmatprep.subr.bf16.mxu1 %v7338_v58 }
 0x2ed   :  { %6838 = vmatpush3.bf16.msra.mxu0 %v7375_v57 }
 0x2ee   :  { %v4944_v35 = vpop.f32.mrf.mxu1  ;;  %5395 = vmatmul.mubr.bf16.gmra.mxu1 %v8418_v43  ;;  %v4851_v4 = vpop.f32.mrf.mxu0  ;;  %v7342_v43 = vld [vmem:[#allocation5 + $0x7a8] ss:$16 sps:$4 sm:$0xff]  }
 0x2ef   :  { %v8752_v31 = vadd.f32 %v4944_v35, %v4832_v44  ;;  %5508 = vmatmul.mubr.bf16.gmra.mxu0 %v8519_v42  ;;  %5565 = vmatpush2.bf16.msra.mxu1 %v7336_v16  ;;  %v4842_v42 = vadd.f32 %v4841_v21, %v8667_v59  ;;  %v7347_v16 = vld [vmem:[#allocation5 + $0x78c] ss:$16 sps:$4 sm:$0xff]   ;;  %v9388_v35 = vld [vmem:[#allocation18_spill] sm:$0xff] }
 0x2f0   :  { %5404 = vmatprep.mubr.bf16.mxu1 %v8431_v5  ;;  %5517 = vmatprep.mubr.bf16.mxu0 %v8527_v39  ;;  %v4946_v23 = vpop.f32.mrf.mxu1  ;;  %v4853_v27 = vpop.f32.mrf.mxu0  ;;  %v4844_v5 = vadd.f32 %v4843_v54, %v8673_v63  ;;  %v7350_v21 = vld [vmem:[#allocation5 + $0x76c] ss:$16 sps:$4 sm:$0xff]   ;;  %v7348_v54 = vld [vmem:[#allocation5 + $0x768] ss:$16 sps:$4 sm:$0xff]  }
 0x2f1   :  { %v8757_v38 = vadd.f32 %v4946_v23, %v4834_v34  ;;  %5566 = vmatprep.subr.bf16.mxu1 %v7341_v33  ;;  %v7345_v33 = vld [vmem:[#allocation5 + $0x788] ss:$16 sps:$4 sm:$0xff]  }
 0x2f2   :  { %v8759_v58 = vpop.f32.mrf.mxu1  ;;  %v8769_v34 = vpop.f32.mrf.mxu0 }
 0x2f3   :  { %5567 = vmatpush2.bf16.msra.mxu1 %v7339_v55  ;;  %9389 = vst [vmem:[#allocation18_spill] sm:$0xff] %v8769_v34  ;;  %v9390_v55 = vld [vmem:[#allocation20_spill] sm:$0xff]  ;;  %v9395_v34 = vld [vmem:[#allocation19_spill] sm:$0xff] }
 0x2f4   :  { %v8761_v57 = vpop.f32.mrf.mxu1  ;;  %5568 = vmatprep.subr.bf16.mxu1 %v7344_v46 }
 0x2f6   :  { %v4954_v44 = vpop.f32.mrf.mxu1  ;;  %5405 = vmatmul.mubr.bf16.gmra.mxu1 %v8435_v19 }
 0x2f7   :  { %v8766_v39 = vadd.f32 %v4954_v44, %v4842_v42  ;;  %5518 = vmatmul.mubr.bf16.gmra.mxu0 %v9388_v35  ;;  %5569 = vmatpush2.bf16.msra.mxu1 %v7342_v43  ;;  %v8777_v42 = vpop.f32.mrf.mxu0  ;;  %v4852_v43 = vadd.f32 %v4851_v4, %v8667_v59  ;;  %v7353_v35 = vld [vmem:[#allocation5 + $0x74c] ss:$16 sps:$4 sm:$0xff]  }
 0x2f8   :  { %5414 = vmatprep.mubr.bf16.mxu1 %v9390_v55  ;;  %5527 = vmatprep.mubr.bf16.mxu0 %v8539_v49  ;;  %v4956_v23 = vpop.f32.mrf.mxu1  ;;  %9393 = vst [vmem:[#allocation29_spill] sm:$0xff] %v8777_v42  ;;  %v4854_v49 = vadd.f32 %v4853_v27, %v8673_v63  ;;  %v9399_v42 = vld [vmem:[#allocation22_spill] sm:$0xff]  ;;  %v7354_v27 = vld [vmem:[#allocation5 + $0x728] ss:$16 sps:$4 sm:$0xff]  }
 0x2f9   :  { %9387 = vst [vmem:[#allocation27_spill] sm:$0xff] %v8766_v39  ;;  %v8773_v46 = vadd.f32 %v4956_v23, %v4844_v5  ;;  %5570 = vmatprep.subr.bf16.mxu1 %v7347_v16  ;;  %v9397_v16 = vld [vmem:[#allocation23_spill] sm:$0xff]  ;;  %v4861_v23 = vpop.f32.mrf.mxu0  ;;  %v9398_v39 = vld [vmem:[#allocation17_spill] sm:$0xff] }
 0x2fa   :  { %v8775_v19 = vpop.f32.mrf.mxu1 }
 0x2fb   :  { %9391 = vst [vmem:[#allocation20_spill] sm:$0xff] %v8773_v46  ;;  %9392 = vst [vmem:[#allocation28_spill] sm:$0xff] %v8775_v19  ;;  %5571 = vmatpush2.bf16.msra.mxu1 %v7345_v33  ;;  %v7351_v33 = vld [vmem:[#allocation5 + $0x748] ss:$16 sps:$4 sm:$0xff]   ;;  %v7356_v46 = vld [vmem:[#allocation5 + $0x72c] ss:$16 sps:$4 sm:$0xff]  }
 0x2fc   :  { %v8779_v44 = vpop.f32.mrf.mxu1  ;;  %5572 = vmatprep.subr.bf16.mxu1 %v7350_v21 }
 0x2fd   :  { %9394 = vst [vmem:[#allocation30_spill] sm:$0xff] %v8779_v44 }
 0x2fe   :  { %v4964_v55 = vpop.f32.mrf.mxu1  ;;  %5415 = vmatmul.mubr.bf16.gmra.mxu1 %v9395_v34  ;;  %v4863_v34 = vpop.f32.mrf.mxu0 }
 0x2ff   :  { %v8784_v5 = vadd.f32 %v4964_v55, %v4852_v43  ;;  %5528 = vmatmul.mubr.bf16.gmra.mxu0 %v9397_v16  ;;  %5573 = vmatpush2.bf16.msra.mxu1 %v7348_v54  ;;  %v7359_v54 = vld [vmem:[#allocation5 + $0x70c] ss:$16 sps:$4 sm:$0xff]   ;;  %v4862_v55 = vadd.f32 %v4861_v23, %v8667_v59 }
 0x300   :  { %5424 = vmatprep.mubr.bf16.mxu1 %v9398_v39  ;;  %5537 = vmatprep.mubr.bf16.mxu0 %v9399_v42  ;;  %v4966_v21 = vpop.f32.mrf.mxu1  ;;  %v9403_v39 = vld [vmem:[#allocation21_spill] sm:$0xff]  ;;  %v4864_v42 = vadd.f32 %v4863_v34, %v8673_v63  ;;  %v9409_v34 = vld [vmem:[#allocation12_spill] sm:$0xff] }
 0x301   :  { %9396 = vst [vmem:[#allocation19_spill] sm:$0xff] %v8784_v5  ;;  %v8789_v4 = vadd.f32 %v4966_v21, %v4854_v49  ;;  %5574 = vmatprep.subr.bf16.mxu1 %v7353_v35  ;;  %v9405_v49 = vld [vmem:[#allocation24_spill] sm:$0xff]  ;;  %v7357_v35 = vld [vmem:[#allocation5 + $0x708] ss:$16 sps:$4 sm:$0xff]  }
 0x302   :  { %v8791_v44 = vpop.f32.mrf.mxu1 }
 0x303   :  { %9400 = vst [vmem:[#allocation23_spill] sm:$0xff] %v8789_v4  ;;  %9401 = vst [vmem:[#allocation17_spill] sm:$0xff] %v8791_v44  ;;  %5575 = vmatpush2.bf16.msra.mxu1 %v7351_v33  ;;  %v8801_v33 = vpop.f32.mrf.mxu0 }
 0x304   :  { %v8793_v43 = vpop.f32.mrf.mxu1  ;;  %5576 = vmatprep.subr.bf16.mxu1 %v7356_v46  ;;  %9406 = vst [vmem:[#allocation24_spill] sm:$0xff] %v8801_v33 }
 0x305   :  { %9402 = vst [vmem:[#allocation22_spill] sm:$0xff] %v8793_v43  ;;  %v8806_v23 = vpop.f32.mrf.mxu0 }
 0x306   :  { %v4974_v16 = vpop.f32.mrf.mxu1  ;;  %5425 = vmatmul.mubr.bf16.gmra.mxu1 %v9403_v39  ;;  %9408 = vst [vmem:[#allocation32_spill] sm:$0xff] %v8806_v23 }
 0x307   :  { %v8798_v5 = vadd.f32 %v4974_v16, %v4862_v55  ;;  %5538 = vmatmul.mubr.bf16.gmra.mxu0 %v9405_v49  ;;  %5577 = vmatpush2.bf16.msra.mxu1 %v7354_v27 }
 0x308   :  { %5580 = vmatprep.mubr.bf16.mxu1 %v8566_v53  ;;  %v4976_v21 = vpop.f32.mrf.mxu1  ;;  %5578 = vmatprep.subr.bf16.mxu1 %v7359_v54 }
 0x309   :  { %9404 = vst [vmem:[#allocation21_spill] sm:$0xff] %v8798_v5  ;;  %v8804_v46 = vadd.f32 %v4976_v21, %v4864_v42  ;;  %v7377_v21 = vld [vmem:[#allocation7 + $0xb8] sm:$0xff]   ;;  %v7378_v5 = vld [vmem:[#allocation7 + $0xf0] sm:$0xff]  }
 0x30b   :  { %9407 = vst [vmem:[#allocation31_spill] sm:$0xff] %v8804_v46  ;;  %5579 = vmatpush2.bf16.msra.mxu1 %v7357_v35  ;;  %v7376_v35 = vld [vmem:[#allocation7 + $0xf8] sm:$0xff]  }
 0x30c   :  { %6887 = vmatprep.subr.bf16.mxu1 %v7376_v35 }
 0x30e   :  { %v8808_v39 = vpop.f32.mrf.mxu0  ;;  %5581 = vmatmul.mubr.bf16.vlgmr.msra.gmra.mxu1 %v9409_v34 }
 0x30f   :  { %5590 = vmatprep.mubr.bf16.mxu1 %v8578_v40  ;;  %6888 = vmatpush3.bf16.msra.mxu1 %v7377_v21  ;;  %v7380_v21 = vld [vmem:[#allocation7 + $0xe8] sm:$0xff]  }
 0x310   :  { %v8812_v55 = vpop.f32.mrf.mxu0  ;;  %6889 = vmatprep.subr.bf16.mxu1 %v7378_v5 }
 0x312   :  { %v8814_v27 = vpop.f32.mrf.mxu0 }
 0x314   :  { %v8816_v16 = vpop.f32.mrf.mxu0 }
 0x316   :  { %v8818_v53 = vpop.f32.mrf.mxu0  ;;  %5591 = vmatmul.mubr.bf16.gmra.mxu1 %v8580_v9 }
 0x317   :  { %5600 = vmatprep.mubr.bf16.mxu1 %v8590_v14 }
 0x318   :  { %v8822_v54 = vpop.f32.mrf.mxu0 }
 0x31a   :  { %v8824_v42 = vpop.f32.mrf.mxu0 }
 0x31c   :  { %v8826_v49 = vpop.f32.mrf.mxu0 }
 0x31e   :  { %v8828_v40 = vpop.f32.mrf.mxu0  ;;  %5601 = vmatmul.mubr.bf16.gmra.mxu1 %v8592_v47  ;;  %v7379_v47 = vld [vmem:[#allocation7 + $0xb0] sm:$0xff]  }
 0x31f   :  { %5610 = vmatprep.mubr.bf16.mxu1 %v8602_v22  ;;  %6890 = vmatpush3.bf16.msra.mxu1 %v7379_v47  ;;  %v7382_v47 = vld [vmem:[#allocation7 + $0xe0] sm:$0xff]  }
 0x320   :  { %v8832_v34 = vpop.f32.mrf.mxu0  ;;  %6891 = vmatprep.subr.bf16.mxu1 %v7380_v21 }
 0x322   :  { %v8834_v9 = vpop.f32.mrf.mxu0 }
 0x324   :  { %v8836_v14 = vpop.f32.mrf.mxu0 }
 0x326   :  { %v8838_v46 = vpop.f32.mrf.mxu0  ;;  %5611 = vmatmul.mubr.bf16.gmra.mxu1 %v8604_v1  ;;  %v7381_v1 = vld [vmem:[#allocation7 + $0xa8] sm:$0xff]  }
 0x327   :  { %5620 = vmatprep.mubr.bf16.mxu1 %v8614_v30  ;;  %6892 = vmatpush3.bf16.msra.mxu1 %v7381_v1  ;;  %v7384_v1 = vld [vmem:[#allocation7 + $0xd8] sm:$0xff]  }
 0x328   :  { %v8842_v23 = vpop.f32.mrf.mxu0  ;;  %6893 = vmatprep.subr.bf16.mxu1 %v7382_v47 }
 0x32a   :  { %v8844_v22 = vpop.f32.mrf.mxu0 }
 0x32c   :  { %v8846_v35 = vpop.f32.mrf.mxu0 }
 0x32e   :  { %v8848_v33 = vpop.f32.mrf.mxu0  ;;  %5621 = vmatmul.mubr.bf16.gmra.mxu1 %v8616_v0  ;;  %v7383_v0 = vld [vmem:[#allocation7 + $0xa0] sm:$0xff]  }
 0x32f   :  { %5630 = vmatprep.mubr.bf16.mxu1 %v8626_v41  ;;  %6894 = vmatpush3.bf16.msra.mxu1 %v7383_v0  ;;  %v7386_v0 = vld [vmem:[#allocation7 + $0xd0] sm:$0xff]  }
 0x330   :  { %v8852_v4 = vpop.f32.mrf.mxu0  ;;  %6895 = vmatprep.subr.bf16.mxu1 %v7384_v1 }
 0x332   :  { %v8854_v30 = vpop.f32.mrf.mxu0 }
 0x334   :  { %v8856_v5 = vpop.f32.mrf.mxu0 }
 0x336   :  { %v8858_v43 = vpop.f32.mrf.mxu0  ;;  %5631 = vmatmul.mubr.bf16.gmra.mxu1 %v8628_v12  ;;  %v7385_v12 = vld [vmem:[#allocation7 + $0x98] sm:$0xff]  }
 0x337   :  { %9410 = vst [vmem:[#allocation12_spill] sm:$0xff] %v8858_v43  ;;  %5640 = vmatprep.mubr.bf16.mxu1 %v8638_v17  ;;  %6896 = vmatpush3.bf16.msra.mxu1 %v7385_v12 }
 0x338   :  { %v8862_v44 = vpop.f32.mrf.mxu0  ;;  %6897 = vmatprep.subr.bf16.mxu1 %v7386_v0 }
 0x339   :  { %9411 = vst [vmem:[#allocation33_spill] sm:$0xff] %v8862_v44 }
 0x33a   :  { %v8864_v41 = vpop.f32.mrf.mxu0 }
 0x33b   :  { %9412 = vst [vmem:[#allocation34_spill] sm:$0xff] %v8864_v41 }
 0x33c   :  { %v8866_v21 = vpop.f32.mrf.mxu0 }
 0x33d   :  { %9413 = vst [vmem:[#allocation35_spill] sm:$0xff] %v8866_v21  ;;  %v8881_v21 = vpop.f32.mrf.mxu1 }
 0x33e   :  { %v8868_v19 = vpop.f32.mrf.mxu0  ;;  %5641 = vmatmul.mubr.bf16.gmra.mxu1 %v8640_v56  ;;  %9419 = vst [vmem:[#allocation41_spill] sm:$0xff] %v8881_v21 }
 0x33f   :  { %9414 = vst [vmem:[#allocation36_spill] sm:$0xff] %v8868_v19  ;;  %5650 = vmatprep.mubr.bf16.mxu1 %v8649_v32  ;;  %v7387_v19 = vld [vmem:[#allocation7 + $0x90] sm:$0xff]   ;;  %v8887_v1 = vpop.f32.mrf.mxu1 }
 0x340   :  { %v8872_v43 = vpop.f32.mrf.mxu0  ;;  %6898 = vmatpush3.bf16.msra.mxu1 %v7387_v19  ;;  %9422 = vst [vmem:[#allocation44_spill] sm:$0xff] %v8887_v1  ;;  %v5018_v19 = vadd.f32 %v8808_v39, %v8680_v25 }
 0x341   :  { %9415 = vst [vmem:[#allocation37_spill] sm:$0xff] %v8872_v43 }
 0x342   :  { %v8874_v17 = vpop.f32.mrf.mxu0 }
 0x343   :  { %9416 = vst [vmem:[#allocation38_spill] sm:$0xff] %v8874_v17  ;;  %v7388_v17 = vld [vmem:[#allocation7 + $0xc8] sm:$0xff]  }
 0x344   :  { %v8876_v47 = vpop.f32.mrf.mxu0  ;;  %6899 = vmatprep.subr.bf16.mxu1 %v7388_v17  ;;  %v4806_v17 = vadd.f32 %v8669_v62, %v8667_v59 }
 0x345   :  { %9417 = vst [vmem:[#allocation39_spill] sm:$0xff] %v8876_v47  ;;  %v4796_v47 = vadd.f32 %v8647_v7, %v8667_v59  ;;  %v5020_v7 = vadd.f32 %v8812_v55, %v8685_v60  ;;  %v4808_v55 = vadd.f32 %v8675_v24, %v8673_v63  ;;  %v5030_v24 = vadd.f32 %v8822_v54, %v8703_v45 }
 0x346   :  { %v8878_v41 = vpop.f32.mrf.mxu0  ;;  %5651 = vmatmul.mubr.bf16.gmra.mxu1 %v8651_v3  ;;  %v4798_v3 = vadd.f32 %v8653_v29, %v8673_v63 }
 0x347   :  { %9418 = vst [vmem:[#allocation40_spill] sm:$0xff] %v8878_v41  ;;  %v4909_v0 = vadd.f32 %v8689_v50, %v4796_v47 }
 0x348   :  { %v8883_v56 = vpop.f32.mrf.mxu0 }
 0x349   :  { %9420 = vst [vmem:[#allocation42_spill] sm:$0xff] %v8883_v56 }
 0x34a   :  { %v8885_v32 = vpop.f32.mrf.mxu0 }
 0x34b   :  { %9421 = vst [vmem:[#allocation43_spill] sm:$0xff] %v8885_v32  ;;  %v7389_v32 = vld [vmem:[#allocation7 + $0x88] sm:$0xff]  }
 0x34c   :  { %v8889_v12 = vpop.f32.mrf.mxu0  ;;  %6900 = vmatpush3.bf16.msra.mxu1 %v7389_v32 }
 0x34d   :  { %9423 = vst [vmem:[#allocation45_spill] sm:$0xff] %v8889_v12  ;;  %v4911_v12 = vadd.f32 %v8693_v51, %v4798_v3 }
 0x34e   :  { %v5130_v41 = vpop.f32.mrf.mxu1  ;;  %v8893_v43 = vpop.f32.mrf.mxu0 }
 0x34f   :  { %9424 = vst [vmem:[#allocation46_spill] sm:$0xff] %v8893_v43  ;;  %v5022_v43 = vadd.f32 %v8814_v27, %v4909_v0  ;;  %v5131_v21 = vadd.f32 %v5130_v41, %v5018_v19  ;;  %v5024_v50 = vadd.f32 %v8816_v16, %v4911_v12  ;;  %v4919_v27 = vadd.f32 %v8707_v20, %v4806_v17  ;;  %v7390_v12 = vld [vmem:[#allocation7 + $0xc0] sm:$0xff]  }
 0x350   :  { %v5132_v56 = vpop.f32.mrf.mxu1  ;;  %v8900_v1 = vpop.f32.mrf.mxu0  ;;  %v4921_v0 = vadd.f32 %v8711_v2, %v4808_v55  ;;  %6901 = vmatprep.subr.bf16.mxu1 %v7390_v12  ;;  %v4816_v2 = vadd.f32 %v8687_v6, %v8667_v59  ;;  %v5040_v12 = vadd.f32 %v8832_v34, %v8721_v15 }
 0x351   :  { %9425 = vst [vmem:[#allocation47_spill] sm:$0xff] %v8900_v1  ;;  %v5133_v25 = vadd.f32 %v5132_v56, %v5020_v7  ;;  %v5661_v51 = vmax.f32 %v5131_v21, 0.0  ;;  %v5032_v20 = vadd.f32 %v8824_v42, %v4919_v27  ;;  %v5038_v27 = vadd.f32 %v8828_v40, %v8716_v26 }
 0x352   :  { %v5134_v29 = vpop.f32.mrf.mxu1  ;;  %v8906_v44 = vpop.f32.mrf.mxu0 }
 0x353   :  { %v5135_v39 = vadd.f32 %v5134_v29, %v5022_v43  ;;  %v5028_v43 = vadd.f32 %v8818_v53, %v8698_v37  ;;  %v5662_v16 = vmax.f32 %v5133_v25, 0.0  ;;  %v5034_v53 = vadd.f32 %v8826_v49, %v4921_v0 }
 0x354   :  { %v5136_v47 = vpop.f32.mrf.mxu1  ;;  %v8911_v1 = vpop.f32.mrf.mxu0 }
 0x355   :  { %v5665_v3 = vmax.f32 %v5135_v39, 0.0  ;;  %v5137_v60 = vadd.f32 %v5136_v47, %v5024_v50  ;;  %v7391_v50 = vld [vmem:[#allocation7 + $0x80] sm:$0xff]  }
 0x356   :  { %v5140_v41 = vpop.f32.mrf.mxu1  ;;  %v8916_v32 = vpop.f32.mrf.mxu0  ;;  %6902 = vmatpush3.bf16.msra.mxu1 %v7391_v50  ;;  %v9426_v50 = vld [vmem:[#allocation26_spill] sm:$0xff] }
 0x357   :  { %v5725_v56 = vpack.c.bf16 %v5665_v3, %v5661_v51  ;;  %v5666_v62 = vmax.f32 %v5137_v60, 0.0  ;;  %v5141_v7 = vadd.f32 %v5140_v41, %v5028_v43  ;;  %v4818_v3 = vadd.f32 %v8691_v18, %v8673_v63 }
 0x358   :  { %v5142_v21 = vpop.f32.mrf.mxu1  ;;  %v8921_v19 = vpop.f32.mrf.mxu0  ;;  %v4929_v60 = vadd.f32 %v8725_v11, %v4816_v2 }
 0x359   :  { %v5726_v29 = vpack.c.bf16 %v5666_v62, %v5662_v16  ;;  %v5143_v25 = vadd.f32 %v5142_v21, %v5030_v24  ;;  %v5669_v54 = vmax.f32 %v5141_v7, 0.0  ;;  %v4931_v16 = vadd.f32 %v8729_v61, %v4818_v3 }
 0x35a   :  { %v5144_v39 = vpop.f32.mrf.mxu1  ;;  %v8926_v37 = vpop.f32.mrf.mxu0  ;;  %v5042_v18 = vadd.f32 %v8834_v9, %v4929_v60  ;;  %v4826_v61 = vadd.f32 %v8705_v52, %v8667_v59  ;;  %v5050_v3 = vadd.f32 %v8842_v23, %v8739_v48 }
 0x35b   :  { %v5145_v17 = vadd.f32 %v5144_v39, %v5032_v20  ;;  %6052 = vmatprep.mubr.bf16.mxu0 %v5726_v29  ;;  %v5670_v41 = vmax.f32 %v5143_v25, 0.0  ;;  %v5044_v26 = vadd.f32 %v8836_v14, %v4931_v16  ;;  %v4828_v39 = vadd.f32 %v9426_v50, %v8673_v63  ;;  %v9427_v16 = vld [vmem:[#allocation15_spill] sm:$0xff] }
 0x35c   :  { %v5146_v47 = vpop.f32.mrf.mxu1  ;;  %v8931_v45 = vpop.f32.mrf.mxu0  ;;  %6053 = vmatmul.mubr.bf16.vlgmr.msra.gmra.mxu0 %v5725_v56  ;;  %v5058_v50 = vadd.f32 %v8848_v33, %v8752_v31  ;;  %v4848_v33 = vadd.f32 %v8745_v28, %v8673_v63 }
 0x35d   :  { %v5673_v42 = vmax.f32 %v5145_v17, 0.0  ;;  %v5147_v51 = vadd.f32 %v5146_v47, %v5034_v53  ;;  %v4939_v53 = vadd.f32 %v8743_v10, %v4826_v61  ;;  %v5048_v17 = vadd.f32 %v8838_v46, %v8734_v13 }
 0x35e   :  { %v5150_v49 = vpop.f32.mrf.mxu1  ;;  %v8936_v55 = vpop.f32.mrf.mxu0 }
 0x35f   :  { %v5729_v6 = vpack.c.bf16 %v5673_v42, %v5669_v54  ;;  %v5674_v43 = vmax.f32 %v5147_v51, 0.0  ;;  %v5151_v11 = vadd.f32 %v5150_v49, %v5038_v27  ;;  %v4941_v54 = vadd.f32 %v8747_v36, %v4828_v39 }
 0x360   :  { %v5152_v56 = vpop.f32.mrf.mxu1  ;;  %v8941_v62 = vpop.f32.mrf.mxu0  ;;  %v5052_v60 = vadd.f32 %v8844_v22, %v4939_v53 }
 0x361   :  { %v5730_v0 = vpack.c.bf16 %v5674_v43, %v5670_v41  ;;  %v5153_v40 = vadd.f32 %v5152_v56, %v5040_v12  ;;  %v5677_v15 = vmax.f32 %v5151_v11, 0.0  ;;  %v5054_v13 = vadd.f32 %v8846_v35, %v4941_v54  ;;  %v9428_v12 = vld [vmem:[#allocation13_spill] sm:$0xff] }
 0x362   :  { %v5154_v21 = vpop.f32.mrf.mxu1  ;;  %v8946_v24 = vpop.f32.mrf.mxu0  ;;  %v4836_v56 = vadd.f32 %v9427_v16, %v8667_v59 }
 0x363   :  { %v5155_v20 = vadd.f32 %v5154_v21, %v5042_v18  ;;  %6060 = vmatprep.mubr.bf16.mxu0 %v5730_v0  ;;  %v5678_v2 = vmax.f32 %v5153_v40, 0.0  ;;  %v4838_v18 = vadd.f32 %v9428_v12, %v8673_v63 }
 0x364   :  { %v5156_v7 = vpop.f32.mrf.mxu1  ;;  %v8951_v29 = vpop.f32.mrf.mxu0  ;;  %6061 = vmatmul.mubr.bf16.gmra.mxu0 %v5729_v6  ;;  %v4949_v35 = vadd.f32 %v8759_v58, %v4836_v56 }
 0x365   :  { %v5681_v34 = vmax.f32 %v5155_v20, 0.0  ;;  %v5157_v9 = vadd.f32 %v5156_v7, %v5044_v26  ;;  %v4951_v7 = vadd.f32 %v8761_v57, %v4838_v18 }
 0x366   :  { %v5160_v25 = vpop.f32.mrf.mxu1  ;;  %v8956_v14 = vpop.f32.mrf.mxu0 }
 0x367   :  { %v5733_v52 = vpack.c.bf16 %v5681_v34, %v5677_v15  ;;  %v5682_v47 = vmax.f32 %v5157_v9, 0.0  ;;  %v5161_v10 = vadd.f32 %v5160_v25, %v5048_v17  ;;  %v5060_v15 = vadd.f32 %v8852_v4, %v8757_v38 }
 0x368   :  { %v5162_v42 = vpop.f32.mrf.mxu1  ;;  %v8961_v51 = vpop.f32.mrf.mxu0  ;;  %v5062_v34 = vadd.f32 %v8854_v30, %v4949_v35  ;;  %v5064_v58 = vadd.f32 %v8856_v5, %v4951_v7  ;;  %v4846_v38 = vadd.f32 %v8741_v8, %v8667_v59  ;;  %v9429_v5 = vld [vmem:[#allocation28_spill] sm:$0xff]  ;;  %v9432_v8 = vld [vmem:[#allocation33_spill] sm:$0xff] }
 0x369   :  { %v5734_v49 = vpack.c.bf16 %v5682_v47, %v5678_v2  ;;  %v5163_v46 = vadd.f32 %v5162_v42, %v5050_v3  ;;  %v5685_v48 = vmax.f32 %v5161_v10, 0.0 }
 0x36a   :  { %v5164_v27 = vpop.f32.mrf.mxu1  ;;  %v8966_v41 = vpop.f32.mrf.mxu0  ;;  %v4959_v54 = vadd.f32 %v9429_v5, %v4846_v38  ;;  %v9441_v5 = vld [vmem:[#allocation22_spill] sm:$0xff] }
 0x36b   :  { %v5165_v6 = vadd.f32 %v5164_v27, %v5052_v60  ;;  %6068 = vmatprep.mubr.bf16.mxu0 %v5734_v49  ;;  %v5686_v21 = vmax.f32 %v5163_v46, 0.0  ;;  %v9430_v27 = vld [vmem:[#allocation30_spill] sm:$0xff]  ;;  %v9431_v46 = vld [vmem:[#allocation20_spill] sm:$0xff] }
 0x36c   :  { %v5166_v43 = vpop.f32.mrf.mxu1  ;;  %v8969_v36 = vpop.f32.mrf.mxu0  ;;  %6069 = vmatmul.mubr.bf16.gmra.mxu0 %v5733_v52 }
 0x36d   :  { %v5689_v23 = vmax.f32 %v5165_v6, 0.0  ;;  %v5167_v22 = vadd.f32 %v5166_v43, %v5054_v13  ;;  %v4961_v13 = vadd.f32 %v9430_v27, %v4848_v33  ;;  %v5070_v6 = vadd.f32 %v9432_v8, %v9431_v46  ;;  %v9433_v43 = vld [vmem:[#allocation34_spill] sm:$0xff]  ;;  %v9445_v46 = vld [vmem:[#allocation19_spill] sm:$0xff]  ;;  %v9446_v8 = vld [vmem:[#allocation36_spill] sm:$0xff] }
 0x36e   :  { %v5170_v11 = vpop.f32.mrf.mxu1  ;;  %v8975_v0 = vpop.f32.mrf.mxu0  ;;  %v5072_v16 = vadd.f32 %v9433_v43, %v4959_v54 }
 0x36f   :  { %v5737_v26 = vpack.c.bf16 %v5689_v23, %v5685_v48  ;;  %v5690_v40 = vmax.f32 %v5167_v22, 0.0  ;;  %v5171_v2 = vadd.f32 %v5170_v11, %v5058_v50  ;;  %v9434_v48 = vld [vmem:[#allocation27_spill] sm:$0xff]  ;;  %v9435_v23 = vld [vmem:[#allocation12_spill] sm:$0xff] }
 0x370   :  { %v5172_v20 = vpop.f32.mrf.mxu1  ;;  %v8978_v61 = vpop.f32.mrf.mxu0  ;;  %v5068_v22 = vadd.f32 %v9435_v23, %v9434_v48  ;;  %v9436_v11 = vld [vmem:[#allocation35_spill] sm:$0xff] }
 0x371   :  { %v5738_v9 = vpack.c.bf16 %v5690_v40, %v5686_v21  ;;  %v5173_v25 = vadd.f32 %v5172_v20, %v5060_v15  ;;  %v5693_v60 = vmax.f32 %v5171_v2, 0.0  ;;  %v5074_v35 = vadd.f32 %v9436_v11, %v4961_v13  ;;  %v9438_v15 = vld [vmem:[#allocation18_spill] sm:$0xff]  ;;  %v9440_v2 = vld [vmem:[#allocation17_spill] sm:$0xff]  ;;  %v9448_v48 = vld [vmem:[#allocation39_spill] sm:$0xff] }
 0x372   :  { %v5174_v39 = vpop.f32.mrf.mxu1  ;;  %v8986_v53 = vpop.f32.mrf.mxu0 }
 0x373   :  { %v5175_v17 = vadd.f32 %v5174_v39, %v5062_v34  ;;  %6076 = vmatprep.mubr.bf16.mxu0 %v5738_v9  ;;  %v5694_v42 = vmax.f32 %v5173_v25, 0.0  ;;  %v4856_v34 = vadd.f32 %v9438_v15, %v8667_v59  ;;  %v9439_v25 = vld [vmem:[#allocation29_spill] sm:$0xff] }
 0x374   :  { %v5176_v52 = vpop.f32.mrf.mxu1  ;;  %v8989_v57 = vpop.f32.mrf.mxu0  ;;  %6077 = vmatmul.mubr.bf16.gmra.mxu0 %v5737_v26 }
 0x375   :  { %v5177_v4 = vadd.f32 %v5176_v52, %v5064_v58  ;;  %v5697_v30 = vmax.f32 %v5175_v17, 0.0  ;;  %v4858_v17 = vadd.f32 %v9439_v25, %v8673_v63  ;;  %v4969_v52 = vadd.f32 %v9440_v2, %v4856_v34  ;;  %v9452_v25 = vld [vmem:[#allocation41_spill] sm:$0xff] }
 0x376   :  { %v5180_v47 = vpop.f32.mrf.mxu1  ;;  %v8993_v31 = vpop.f32.mrf.mxu0 }
 0x377   :  { %v5698_v3 = vmax.f32 %v5177_v4, 0.0  ;;  %v5741_v28 = vpack.c.bf16 %v5697_v30, %v5693_v60  ;;  %v5181_v40 = vadd.f32 %v5180_v47, %v5068_v22  ;;  %v4971_v54 = vadd.f32 %v9441_v5, %v4858_v17 }
 0x378   :  { %v5182_v10 = vpop.f32.mrf.mxu1  ;;  %v8998_v49 = vpop.f32.mrf.mxu0 }
 0x379   :  { %v5742_v56 = vpack.c.bf16 %v5698_v3, %v5694_v42  ;;  %v5183_v21 = vadd.f32 %v5182_v10, %v5070_v6  ;;  %v5701_v30 = vmax.f32 %v5181_v40, 0.0  ;;  %v9442_v42 = vld [vmem:[#allocation23_spill] sm:$0xff]  ;;  %v9443_v3 = vld [vmem:[#allocation37_spill] sm:$0xff]  ;;  %v9444_v10 = vld [vmem:[#allocation38_spill] sm:$0xff]  ;;  %v5078_v6 = vadd.f32 %v9446_v8, %v9445_v46 }
 0x37a   :  { %v5184_v12 = vpop.f32.mrf.mxu1  ;;  %v9006_v18 = vpop.f32.mrf.mxu0  ;;  %v5080_v60 = vadd.f32 %v9443_v3, %v9442_v42  ;;  %v5082_v27 = vadd.f32 %v9444_v10, %v4969_v52  ;;  %v5084_v23 = vadd.f32 %v9448_v48, %v4971_v54  ;;  %v9456_v42 = vld [vmem:[#allocation31_spill] sm:$0xff]  ;;  %v9457_v3 = vld [vmem:[#allocation42_spill] sm:$0xff]  ;;  %v9460_v46 = vld [vmem:[#allocation40_spill] sm:$0xff] }
 0x37b   :  { %v5185_v26 = vadd.f32 %v5184_v12, %v5072_v16  ;;  %6084 = vmatprep.mubr.bf16.mxu0 %v5742_v56  ;;  %v5702_v38 = vmax.f32 %v5183_v21, 0.0  ;;  %v9450_v21 = vld [vmem:[#allocation24_spill] sm:$0xff]  ;;  %v9458_v10 = vld [vmem:[#allocation43_spill] sm:$0xff]  ;;  %v9462_v48 = vld [vmem:[#allocation45_spill] sm:$0xff] }
 0x37c   :  { %v5186_v20 = vpop.f32.mrf.mxu1  ;;  %v9009_v7 = vpop.f32.mrf.mxu0  ;;  %6085 = vmatmul.mubr.bf16.gmra.mxu0 %v5741_v28 }
 0x37d   :  { %9437 = vst [vmem:[#allocation26_spill] sm:$0xff] %v9009_v7  ;;  %v5187_v9 = vadd.f32 %v5186_v20, %v5074_v35  ;;  %v5705_v50 = vmax.f32 %v5185_v26, 0.0  ;;  %v4866_v26 = vadd.f32 %v9450_v21, %v8667_v59  ;;  %v9455_v59 = vld [vmem:[#allocation44_spill] sm:$0xff] }
 0x37e   :  { %v5190_v39 = vpop.f32.mrf.mxu1  ;;  %v9013_v58 = vpop.f32.mrf.mxu0 }
 0x37f   :  { %v5706_v4 = vmax.f32 %v5187_v9, 0.0  ;;  %v5745_v43 = vpack.c.bf16 %v5705_v50, %v5701_v30  ;;  %v5191_v12 = vadd.f32 %v5190_v39, %v5078_v6  ;;  %v9451_v9 = vld [vmem:[#allocation32_spill] sm:$0xff]  ;;  %v4979_v17 = vadd.f32 %v9452_v25, %v4866_v26 }
 0x380   :  { %v5192_v47 = vpop.f32.mrf.mxu1  ;;  %v9018_v33 = vpop.f32.mrf.mxu0  ;;  %v4868_v50 = vadd.f32 %v9451_v9, %v8673_v63  ;;  %v9453_v39 = vld [vmem:[#allocation16_spill] sm:$0xff] }
 0x381   :  { %v5746_v13 = vpack.c.bf16 %v5706_v4, %v5702_v38  ;;  %v5193_v22 = vadd.f32 %v5192_v47, %v5080_v60  ;;  %v9454_v38 = vld [vmem:[#allocation25_spill] sm:$0xff]  ;;  %v5709_v30 = vmax.f32 %v5191_v12, 0.0  ;;  %v5090_v60 = vadd.f32 %v9457_v3, %v9456_v42 }
 0x382   :  { %v5194_v16 = vpop.f32.mrf.mxu1  ;;  %v9026_v56 = vpop.f32.mrf.mxu0  ;;  %v9040_v4 = vrot.slane %v9454_v38, %v9453_v39  ;;  %v4981_v54 = vadd.f32 %v9455_v59, %v4868_v50 }
 0x383   :  { %9447 = vst [vmem:[#allocation15_spill] sm:$0xff] %v9026_v56  ;;  %v5195_v28 = vadd.f32 %v5194_v16, %v5082_v27  ;;  %6092 = vmatprep.mubr.bf16.mxu0 %v5746_v13  ;;  %v5710_v2 = vmax.f32 %v5193_v22, 0.0  ;;  %v5092_v27 = vadd.f32 %v9458_v10, %v4979_v17  ;;  %v9459_v13 = vld [vmem:[#allocation21_spill] sm:$0xff]  ;;  %v7393_v22 = vld [vmem:[%s9320_s6] sm:$0xf] }
 0x384   :  { %v5196_v11 = vpop.f32.mrf.mxu1  ;;  %v9029_v35 = vpop.f32.mrf.mxu0  ;;  %6093 = vmatmul.mubr.bf16.gmra.mxu0 %v5745_v43  ;;  %v5088_v8 = vadd.f32 %v9460_v46, %v9459_v13  ;;  %v5254_v13 = vadd.f32 %v8916_v32, %v9040_v4  ;;  %v5264_v32 = vadd.f32 %v8936_v55, %v9040_v4  ;;  %v5274_v55 = vadd.f32 %v8956_v14, %v9040_v4 }
 0x385   :  { %9449 = vst [vmem:[#allocation13_spill] sm:$0xff] %v9029_v35  ;;  %v5197_v40 = vadd.f32 %v5196_v11, %v5084_v23  ;;  %v5713_v20 = vmax.f32 %v5195_v28, 0.0  ;;  %v5094_v23 = vadd.f32 %v9462_v48, %v4981_v54  ;;  %v9463_v28 = vld [vmem:[#allocation14_spill] sm:$0xff]  ;;  %v5284_v14 = vadd.f32 %v8975_v0, %v9040_v4 }
 0x386   :  { %v5200_v15 = vpop.f32.mrf.mxu1  ;;  %v9033_v34 = vpop.f32.mrf.mxu0  ;;  %v9057_v12 = vrot.slane %v7393_v22, %v9463_v28  ;;  %v5294_v0 = vadd.f32 %v8993_v31, %v9040_v4  ;;  %v5304_v31 = vadd.f32 %v9013_v58, %v9040_v4 }
 0x387   :  { %v5714_v52 = vmax.f32 %v5197_v40, 0.0  ;;  %v5749_v6 = vpack.c.bf16 %v5713_v20, %v5709_v30  ;;  %v5201_v26 = vadd.f32 %v5200_v15, %v5088_v8  ;;  %v9465_v20 = vld [vmem:[#allocation46_spill] sm:$0xff]  ;;  %v5314_v58 = vadd.f32 %v9033_v34, %v9040_v4 }
 0x388   :  { %v5202_v47 = vpop.f32.mrf.mxu1  ;;  %v9042_v5 = vpop.f32.mrf.mxu0  ;;  %v5244_v50 = vadd.f32 %v9465_v20, %v9040_v4  ;;  %v5250_v34 = vadd.f32 %v8911_v1, %v9057_v12  ;;  %v5258_v1 = vadd.f32 %v8926_v37, %v9040_v4 }
 0x389   :  { %v5750_v63 = vpack.c.bf16 %v5714_v52, %v5710_v2  ;;  %v5203_v11 = vadd.f32 %v5202_v47, %v5090_v60  ;;  %v9466_v52 = vld [vmem:[#allocation47_spill] sm:$0xff]  ;;  %v5717_v15 = vmax.f32 %v5201_v26, 0.0 }
 0x38a   :  { %v5204_v43 = vpop.f32.mrf.mxu1  ;;  %v9050_v16 = vpop.f32.mrf.mxu0  ;;  %v5246_v39 = vadd.f32 %v9466_v52, %v9057_v12 }
 0x38b   :  { %9461 = vst [vmem:[#allocation28_spill] sm:$0xff] %v9050_v16  ;;  %v5205_v21 = vadd.f32 %v5204_v43, %v5092_v27  ;;  %6100 = vmatprep.mubr.bf16.mxu0 %v5750_v63  ;;  %v5718_v38 = vmax.f32 %v5203_v11, 0.0 }
 0x38c   :  { %v5206_v40 = vpop.f32.mrf.mxu1  ;;  %v9059_v9 = vpop.f32.mrf.mxu0  ;;  %6101 = vmatmul.mubr.bf16.gmra.mxu0 %v5749_v6  ;;  %v5256_v6 = vadd.f32 %v8921_v19, %v9057_v12  ;;  %v5266_v19 = vadd.f32 %v8941_v62, %v9057_v12  ;;  %v5276_v62 = vadd.f32 %v8961_v51, %v9057_v12  ;;  %v5286_v51 = vadd.f32 %v8978_v61, %v9057_v12 }
 0x38d   :  { %9464 = vst [vmem:[#allocation30_spill] sm:$0xff] %v9059_v9  ;;  %v5207_v25 = vadd.f32 %v5206_v40, %v5094_v23  ;;  %v5721_v17 = vmax.f32 %v5205_v21, 0.0  ;;  %v5296_v61 = vadd.f32 %v8998_v49, %v9057_v12  ;;  %v5306_v49 = vadd.f32 %v9018_v33, %v9057_v12 }
 0x38e   :  { %v5356_v2 = vpop.f32.mrf.mxu1  ;;  %v5316_v33 = vadd.f32 %v9042_v5, %v9057_v12 }
 0x38f   :  { %v5722_v30 = vmax.f32 %v5207_v25, 0.0  ;;  %v9065_v59 = vadd.f32 %v5356_v2, %v5244_v50  ;;  %v9067_v47 = vpop.f32.mrf.mxu0  ;;  %v5753_v60 = vpack.c.bf16 %v5721_v17, %v5717_v15 }
 0x390   :  { %v5358_v54 = vpop.f32.mrf.mxu1 }
 0x391   :  { %v5754_v42 = vpack.c.bf16 %v5722_v30, %v5718_v38  ;;  %v9069_v3 = vadd.f32 %v5358_v54, %v5246_v39  ;;  %v9071_v10 = vpop.f32.mrf.mxu0 }
 0x392   :  { %v9073_v27 = vpop.f32.mrf.mxu1 }
 0x393   :  { %6108 = vmatprep.mubr.bf16.mxu0 %v5754_v42  ;;  %v9079_v46 = vpop.f32.mrf.mxu0 }
 0x394   :  { %v9075_v63 = vpop.f32.mrf.mxu1  ;;  %6109 = vmatmul.mubr.bf16.gmra.mxu0 %v5753_v60 }
 0x395   :  { %v9087_v22 = vpop.f32.mrf.mxu0 }
 0x396   :  { %v5366_v8 = vpop.f32.mrf.mxu1 }
 0x397   :  { %v9083_v43 = vadd.f32 %v5366_v8, %v5254_v13  ;;  %v9095_v21 = vpop.f32.mrf.mxu0 }
 0x398   :  { %v5368_v48 = vpop.f32.mrf.mxu1 }
 0x399   :  { %v9085_v23 = vadd.f32 %v5368_v48, %v5256_v6  ;;  %v9103_v25 = vpop.f32.mrf.mxu0 }
 0x39a   :  { %v9089_v28 = vpop.f32.mrf.mxu1 }
 0x39b   :  { %v9111_v52 = vpop.f32.mrf.mxu0 }
 0x39c   :  { %v9091_v11 = vpop.f32.mrf.mxu1 }
 0x39d   :  { %v9119_v54 = vpop.f32.mrf.mxu0 }
 0x39e   :  { %v5376_v26 = vpop.f32.mrf.mxu1 }
 0x39f   :  { %v9099_v40 = vadd.f32 %v5376_v26, %v5264_v32  ;;  %v9127_v13 = vpop.f32.mrf.mxu0 }
 0x3a0   :  { %v5378_v20 = vpop.f32.mrf.mxu1 }
 0x3a1   :  { %v9101_v50 = vadd.f32 %v5378_v20, %v5266_v19  ;;  %v9135_v26 = vpop.f32.mrf.mxu0 }
 0x3a2   :  { %v9105_v17 = vpop.f32.mrf.mxu1 }
 0x3a4   :  { %v9107_v2 = vpop.f32.mrf.mxu1 }
 0x3a6   :  { %v5386_v39 = vpop.f32.mrf.mxu1 }
 0x3a7   :  { %v9115_v38 = vadd.f32 %v5386_v39, %v5274_v55  ;;  %v9143_v55 = vpop.f32.mrf.mxu0 }
 0x3a8   :  { %v5388_v30 = vpop.f32.mrf.mxu1 }
 0x3a9   :  { %v9117_v15 = vadd.f32 %v5388_v30, %v5276_v62 }
 0x3aa   :  { %v9121_v42 = vpop.f32.mrf.mxu1 }
 0x3ac   :  { %v9123_v60 = vpop.f32.mrf.mxu1 }
 0x3ae   :  { %v5396_v8 = vpop.f32.mrf.mxu1 }
 0x3af   :  { %v9131_v6 = vadd.f32 %v5396_v8, %v5284_v14  ;;  %v9151_v8 = vpop.f32.mrf.mxu0 }
 0x3b0   :  { %v5398_v48 = vpop.f32.mrf.mxu1 }
 0x3b1   :  { %v9133_v32 = vadd.f32 %v5398_v48, %v5286_v51  ;;  %v9159_v9 = vpop.f32.mrf.mxu0 }
 0x3b2   :  { %v9137_v19 = vpop.f32.mrf.mxu1 }
 0x3b4   :  { %v9139_v20 = vpop.f32.mrf.mxu1 }
 0x3b6   :  { %v5406_v39 = vpop.f32.mrf.mxu1 }
 0x3b7   :  { %v9147_v62 = vadd.f32 %v5406_v39, %v5294_v0 }
 0x3b8   :  { %v5408_v30 = vpop.f32.mrf.mxu1 }
 0x3b9   :  { %9467 = vst [vmem:[#allocation20_spill] sm:$0xff] %v9147_v62  ;;  %v9149_v14 = vadd.f32 %v5408_v30, %v5296_v61  ;;  %v9167_v30 = vpop.f32.mrf.mxu0 }
 0x3ba   :  { %v9153_v51 = vpop.f32.mrf.mxu1 }
 0x3bb   :  { %9468 = vst [vmem:[#allocation33_spill] sm:$0xff] %v9149_v14  ;;  %9469 = vst [vmem:[#allocation34_spill] sm:$0xff] %v9153_v51  ;;  %v9175_v62 = vpop.f32.mrf.mxu0 }
 0x3bc   :  { %v9155_v48 = vpop.f32.mrf.mxu1 }
 0x3bd   :  { %9470 = vst [vmem:[#allocation27_spill] sm:$0xff] %v9155_v48 }
 0x3be   :  { %v5416_v16 = vpop.f32.mrf.mxu1 }
 0x3bf   :  { %v9163_v0 = vadd.f32 %v5416_v16, %v5304_v31 }
 0x3c0   :  { %v5418_v39 = vpop.f32.mrf.mxu1 }
 0x3c1   :  { %9471 = vst [vmem:[#allocation12_spill] sm:$0xff] %v9163_v0  ;;  %v9165_v61 = vadd.f32 %v5418_v39, %v5306_v49  ;;  %v9183_v39 = vpop.f32.mrf.mxu0 }
 0x3c2   :  { %v9169_v35 = vpop.f32.mrf.mxu1 }
 0x3c3   :  { %9472 = vst [vmem:[#allocation35_spill] sm:$0xff] %v9165_v61  ;;  %9473 = vst [vmem:[#allocation18_spill] sm:$0xff] %v9169_v35  ;;  %v5248_v61 = vadd.f32 %v8906_v44, %v9040_v4  ;;  %v9194_v5 = vpop.f32.mrf.mxu0  ;;  %v5470_v44 = vadd.f32 %v9067_v47, %v9065_v59 }
 0x3c4   :  { %v9171_v56 = vpop.f32.mrf.mxu1 }
 0x3c5   :  { %9474 = vst [vmem:[#allocation29_spill] sm:$0xff] %v9171_v56  ;;  %v5361_v35 = vadd.f32 %v9073_v27, %v5248_v61 }
 0x3c6   :  { %v5426_v14 = vpop.f32.mrf.mxu1 }
 0x3c7   :  { %v9179_v16 = vadd.f32 %v5426_v14, %v5314_v58  ;;  %v5363_v58 = vadd.f32 %v9075_v63, %v5250_v34 }
 0x3c8   :  { %v5428_v31 = vpop.f32.mrf.mxu1 }
 0x3c9   :  { %9475 = vst [vmem:[#allocation17_spill] sm:$0xff] %v9179_v16  ;;  %v9181_v49 = vadd.f32 %v5428_v31, %v5316_v33  ;;  %v5472_v31 = vadd.f32 %v9071_v10, %v9069_v3  ;;  %v5474_v16 = vadd.f32 %v9079_v46, %v5361_v35  ;;  %v5476_v27 = vadd.f32 %v9087_v22, %v5363_v58 }
 0x3ca   :  { %v9185_v0 = vpop.f32.mrf.mxu1  ;;  %v5260_v3 = vadd.f32 %v8931_v45, %v9057_v12  ;;  %v5371_v35 = vadd.f32 %v9089_v28, %v5258_v1  ;;  %v5480_v45 = vadd.f32 %v9095_v21, %v9083_v43 }
 0x3cb   :  { %9476 = vst [vmem:[#allocation22_spill] sm:$0xff] %v9181_v49  ;;  %9477 = vst [vmem:[#allocation23_spill] sm:$0xff] %v9185_v0  ;;  %v9202_v49 = vpop.f32.mrf.mxu0 }
 0x3cc   :  { %v9189_v56 = vpop.f32.mrf.mxu1  ;;  %v5373_v48 = vadd.f32 %v9091_v11, %v5260_v3  ;;  %v5268_v11 = vadd.f32 %v8946_v24, %v9040_v4 }
 0x3cd   :  { %9478 = vst [vmem:[#allocation37_spill] sm:$0xff] %v9189_v56  ;;  %v9210_v46 = vpop.f32.mrf.mxu0 }
 0x3ce   :  { %v5582_v14 = vpop.f32.mrf.mxu1  ;;  %v5381_v43 = vadd.f32 %v9105_v17, %v5268_v11 }
 0x3cf   :  { %v5583_v63 = vadd.f32 %v5582_v14, %v5470_v44  ;;  %v9218_v28 = vpop.f32.mrf.mxu0 }
 0x3d0   :  { %v5584_v33 = vpop.f32.mrf.mxu1 }
 0x3d1   :  { %v5585_v61 = vadd.f32 %v5584_v33, %v5472_v31  ;;  %v5663_v7 = vmax.f32 %v5583_v63, 0.0  ;;  %v5486_v33 = vadd.f32 %v9119_v54, %v5373_v48  ;;  %v5492_v63 = vadd.f32 %v9135_v26, %v9101_v50 }
 0x3d2   :  { %v5586_v56 = vpop.f32.mrf.mxu1  ;;  %v5280_v26 = vadd.f32 %v8969_v36, %v9057_v12  ;;  %v5500_v36 = vadd.f32 %v9159_v9, %v9115_v38 }
 0x3d3   :  { %v5587_v0 = vadd.f32 %v5586_v56, %v5474_v16  ;;  %v5664_v51 = vmax.f32 %v5585_v61, 0.0  ;;  %v5482_v56 = vadd.f32 %v9103_v25, %v9085_v23  ;;  %v5484_v16 = vadd.f32 %v9111_v52, %v5371_v35  ;;  %v9226_v52 = vpop.f32.mrf.mxu0 }
 0x3d4   :  { %v5588_v34 = vpop.f32.mrf.mxu1  ;;  %v5270_v25 = vadd.f32 %v8951_v29, %v9057_v12  ;;  %v5490_v29 = vadd.f32 %v9127_v13, %v9099_v40 }
 0x3d5   :  { %v5589_v10 = vadd.f32 %v5588_v34, %v5476_v27  ;;  %v5667_v59 = vmax.f32 %v5587_v0, 0.0  ;;  %v5494_v34 = vadd.f32 %v9143_v55, %v5381_v43  ;;  %v9234_v17 = vpop.f32.mrf.mxu0 }
 0x3d6   :  { %v5592_v47 = vpop.f32.mrf.mxu1  ;;  %v5383_v24 = vadd.f32 %v9107_v2, %v5270_v25  ;;  %v5278_v2 = vadd.f32 %v8966_v41, %v9040_v4 }
 0x3d7   :  { %v5668_v37 = vmax.f32 %v5589_v10, 0.0  ;;  %v5727_v58 = vpack.c.bf16 %v5667_v59, %v5663_v7  ;;  %v5593_v1 = vadd.f32 %v5592_v47, %v5480_v45  ;;  %v5523_v55 = vpop.f32.mrf.mxu0 }
 0x3d8   :  { %v5594_v22 = vpop.f32.mrf.mxu1  ;;  %v5496_v59 = vadd.f32 %v9151_v8, %v5383_v24  ;;  %v5391_v40 = vadd.f32 %v9121_v42, %v5278_v2 }
 0x3d9   :  { %v5728_v14 = vpack.c.bf16 %v5668_v37, %v5664_v51  ;;  %v5595_v31 = vadd.f32 %v5594_v22, %v5482_v56  ;;  %v5671_v48 = vmax.f32 %v5593_v1, 0.0  ;;  %v5525_v42 = vpop.f32.mrf.mxu0  ;;  %v5288_v1 = vadd.f32 %v8986_v53, %v9040_v4 }
 0x3da   :  { %v5596_v0 = vpop.f32.mrf.mxu1  ;;  %v5504_v11 = vadd.f32 %v9175_v62, %v5391_v40 }
 0x3db   :  { %v5597_v44 = vadd.f32 %v5596_v0, %v5484_v16  ;;  %6149 = vmatprep.mubr.bf16.mxu1 %v5728_v14  ;;  %v5672_v27 = vmax.f32 %v5595_v31, 0.0  ;;  %v5393_v14 = vadd.f32 %v9123_v60, %v5280_v26  ;;  %v5502_v0 = vadd.f32 %v9167_v30, %v9117_v15  ;;  %v9254_v38 = vpop.f32.mrf.mxu0 }
 0x3dc   :  { %v5598_v23 = vpop.f32.mrf.mxu1  ;;  %6150 = vmatmul.mubr.bf16.vlgmr.msra.gmra.mxu1 %v5727_v58  ;;  %v5290_v15 = vadd.f32 %v8989_v57, %v9057_v12  ;;  %v5401_v62 = vadd.f32 %v9137_v19, %v5288_v1  ;;  %v5510_v57 = vadd.f32 %v9194_v5, %v9131_v6 }
 0x3dd   :  { %v5599_v21 = vadd.f32 %v5598_v23, %v5486_v33  ;;  %v5675_v7 = vmax.f32 %v5597_v44, 0.0  ;;  %v5506_v60 = vadd.f32 %v9183_v39, %v5393_v14  ;;  %v5531_v19 = vpop.f32.mrf.mxu0 }
 0x3de   :  { %v5602_v51 = vpop.f32.mrf.mxu1  ;;  %v5403_v53 = vadd.f32 %v9139_v20, %v5290_v15 }
 0x3df   :  { %v5676_v54 = vmax.f32 %v5599_v21, 0.0  ;;  %v5731_v35 = vpack.c.bf16 %v5675_v7, %v5671_v48  ;;  %v5603_v22 = vadd.f32 %v5602_v51, %v5490_v29  ;;  %v5514_v48 = vadd.f32 %v9210_v46, %v5401_v62  ;;  %v9480_v46 = vld [vmem:[#allocation34_spill] sm:$0xff]  ;;  %v5533_v5 = vpop.f32.mrf.mxu0  ;;  %v9487_v62 = vld [vmem:[#allocation29_spill] sm:$0xff] }
 0x3e0   :  { %v5604_v61 = vpop.f32.mrf.mxu1  ;;  %v5516_v20 = vadd.f32 %v9218_v28, %v5403_v53 }
 0x3e1   :  { %v5732_v3 = vpack.c.bf16 %v5676_v54, %v5672_v27  ;;  %v5605_v47 = vadd.f32 %v5604_v61, %v5492_v63  ;;  %v5679_v8 = vmax.f32 %v5603_v22, 0.0  ;;  %v5512_v54 = vadd.f32 %v9202_v49, %v9133_v32  ;;  %v9479_v32 = vld [vmem:[#allocation26_spill] sm:$0xff]  ;;  %v9481_v22 = vld [vmem:[#allocation27_spill] sm:$0xff] }
 0x3e2   :  { %v5606_v10 = vpop.f32.mrf.mxu1  ;;  %v5300_v49 = vadd.f32 %v9479_v32, %v9057_v12 }
 0x3e3   :  { %v5607_v37 = vadd.f32 %v5606_v10, %v5494_v34  ;;  %6157 = vmatprep.mubr.bf16.mxu1 %v5732_v3  ;;  %v5680_v41 = vmax.f32 %v5605_v47, 0.0  ;;  %v5298_v3 = vadd.f32 %v9006_v18, %v9040_v4 }
 0x3e4   :  { %v5608_v50 = vpop.f32.mrf.mxu1  ;;  %6158 = vmatmul.mubr.bf16.gmra.mxu1 %v5731_v35 }
 0x3e5   :  { %v5609_v13 = vadd.f32 %v5608_v50, %v5496_v59  ;;  %v5683_v56 = vmax.f32 %v5607_v37, 0.0  ;;  %v5411_v59 = vadd.f32 %v9480_v46, %v5298_v3  ;;  %v5413_v50 = vadd.f32 %v9481_v22, %v5300_v49  ;;  %v9492_v49 = vld [vmem:[#allocation23_spill] sm:$0xff] }
 0x3e6   :  { %v5612_v16 = vpop.f32.mrf.mxu1 }
 0x3e7   :  { %v5684_v45 = vmax.f32 %v5609_v13, 0.0  ;;  %v5735_v31 = vpack.c.bf16 %v5683_v56, %v5679_v8  ;;  %v5613_v43 = vadd.f32 %v5612_v16, %v5500_v36  ;;  %v9482_v13 = vld [vmem:[#allocation33_spill] sm:$0xff]  ;;  %v5524_v16 = vadd.f32 %v5523_v55, %v5411_v59  ;;  %v5535_v8 = vpop.f32.mrf.mxu0 }
 0x3e8   :  { %v5614_v58 = vpop.f32.mrf.mxu1  ;;  %v5522_v56 = vadd.f32 %v9234_v17, %v9482_v13  ;;  %v5526_v36 = vadd.f32 %v5525_v42, %v5413_v50  ;;  %v9485_v17 = vld [vmem:[#allocation13_spill] sm:$0xff] }
 0x3e9   :  { %v5736_v33 = vpack.c.bf16 %v5684_v45, %v5680_v41  ;;  %v5615_v23 = vadd.f32 %v5614_v58, %v5502_v0  ;;  %v5687_v24 = vmax.f32 %v5613_v43, 0.0  ;;  %v9483_v41 = vld [vmem:[#allocation20_spill] sm:$0xff]  ;;  %v5310_v55 = vadd.f32 %v9485_v17, %v9057_v12 }
 0x3ea   :  { %v5616_v44 = vpop.f32.mrf.mxu1  ;;  %v5520_v45 = vadd.f32 %v9226_v52, %v9483_v41  ;;  %v5539_v52 = vpop.f32.mrf.mxu0 }
 0x3eb   :  { %v5617_v25 = vadd.f32 %v5616_v44, %v5504_v11  ;;  %6165 = vmatprep.mubr.bf16.mxu1 %v5736_v33  ;;  %v5688_v51 = vmax.f32 %v5615_v23, 0.0  ;;  %v9484_v11 = vld [vmem:[#allocation15_spill] sm:$0xff]  ;;  %v9486_v23 = vld [vmem:[#allocation18_spill] sm:$0xff] }
 0x3ec   :  { %v5618_v21 = vpop.f32.mrf.mxu1  ;;  %6166 = vmatmul.mubr.bf16.gmra.mxu1 %v5735_v31  ;;  %v5308_v33 = vadd.f32 %v9484_v11, %v9040_v4 }
 0x3ed   :  { %v5619_v9 = vadd.f32 %v5618_v21, %v5506_v60  ;;  %v5691_v30 = vmax.f32 %v5617_v25, 0.0 }
 0x3ee   :  { %v5622_v7 = vpop.f32.mrf.mxu1  ;;  %v5421_v25 = vadd.f32 %v9486_v23, %v5308_v33 }
 0x3ef   :  { %v5692_v39 = vmax.f32 %v5619_v9, 0.0  ;;  %v5739_v63 = vpack.c.bf16 %v5691_v30, %v5687_v24  ;;  %v5623_v10 = vadd.f32 %v5622_v7, %v5510_v57  ;;  %v5423_v9 = vadd.f32 %v9487_v62, %v5310_v55 }
 0x3f0   :  { %v5624_v27 = vpop.f32.mrf.mxu1  ;;  %v5534_v24 = vadd.f32 %v5533_v5, %v5421_v25 }
 0x3f1   :  { %v5740_v61 = vpack.c.bf16 %v5692_v39, %v5688_v51  ;;  %v5625_v29 = vadd.f32 %v5624_v27, %v5512_v54  ;;  %v5695_v28 = vmax.f32 %v5623_v10, 0.0  ;;  %v9488_v51 = vld [vmem:[#allocation35_spill] sm:$0xff]  ;;  %v9489_v54 = vld [vmem:[#allocation12_spill] sm:$0xff] }
 0x3f2   :  { %v5626_v34 = vpop.f32.mrf.mxu1  ;;  %v5532_v39 = vadd.f32 %v5531_v19, %v9488_v51  ;;  %v9491_v19 = vld [vmem:[#allocation30_spill] sm:$0xff] }
 0x3f3   :  { %v5627_v35 = vadd.f32 %v5626_v34, %v5514_v48  ;;  %6173 = vmatprep.mubr.bf16.mxu1 %v5740_v61  ;;  %v5696_v18 = vmax.f32 %v5625_v29, 0.0  ;;  %v5530_v48 = vadd.f32 %v9254_v38, %v9489_v54  ;;  %v5541_v61 = vpop.f32.mrf.mxu0  ;;  %v9490_v34 = vld [vmem:[#allocation28_spill] sm:$0xff]  ;;  %v5320_v32 = vadd.f32 %v9491_v19, %v9057_v12 }
 0x3f4   :  { %v5628_v2 = vpop.f32.mrf.mxu1  ;;  %6174 = vmatmul.mubr.bf16.gmra.mxu1 %v5739_v63  ;;  %v5318_v3 = vadd.f32 %v9490_v34, %v9040_v4 }
 0x3f5   :  { %v5629_v6 = vadd.f32 %v5628_v2, %v5516_v20  ;;  %v5699_v47 = vmax.f32 %v5627_v35, 0.0  ;;  %v5536_v20 = vadd.f32 %v5535_v8, %v5423_v9  ;;  %v5543_v38 = vpop.f32.mrf.mxu0 }
 0x3f6   :  { %v5632_v37 = vpop.f32.mrf.mxu1  ;;  %v5431_v46 = vadd.f32 %v9492_v49, %v5318_v3 }
 0x3f7   :  { %v5700_v26 = vmax.f32 %v5629_v6, 0.0  ;;  %v5743_v58 = vpack.c.bf16 %v5699_v47, %v5695_v28  ;;  %v5633_v1 = vadd.f32 %v5632_v37, %v5520_v45  ;;  %v9493_v47 = vld [vmem:[#allocation37_spill] sm:$0xff] }
 0x3f8   :  { %v5634_v40 = vpop.f32.mrf.mxu1  ;;  %v5433_v37 = vadd.f32 %v9493_v47, %v5320_v32 }
 0x3f9   :  { %v5744_v14 = vpack.c.bf16 %v5700_v26, %v5696_v18  ;;  %v5635_v31 = vadd.f32 %v5634_v40, %v5522_v56  ;;  %v5703_v42 = vmax.f32 %v5633_v1, 0.0  ;;  %v9494_v26 = vld [vmem:[#allocation22_spill] sm:$0xff]  ;;  %v5544_v40 = vadd.f32 %v5543_v38, %v5431_v46  ;;  %v9495_v56 = vld [vmem:[#allocation17_spill] sm:$0xff] }
 0x3fa   :  { %v5636_v0 = vpop.f32.mrf.mxu1  ;;  %v5542_v28 = vadd.f32 %v5541_v61, %v9494_v26 }
 0x3fb   :  { %v5637_v44 = vadd.f32 %v5636_v0, %v5524_v16  ;;  %6181 = vmatprep.mubr.bf16.mxu1 %v5744_v14  ;;  %v5704_v30 = vmax.f32 %v5635_v31, 0.0  ;;  %v5540_v16 = vadd.f32 %v5539_v52, %v9495_v56  ;;  %v5545_v14 = vpop.f32.mrf.mxu0 }
 0x3fc   :  { %v5638_v60 = vpop.f32.mrf.mxu1  ;;  %6182 = vmatmul.mubr.bf16.gmra.mxu1 %v5743_v58  ;;  %v5546_v45 = vadd.f32 %v5545_v14, %v5433_v37 }
 0x3fd   :  { %v5639_v43 = vadd.f32 %v5638_v60, %v5526_v36  ;;  %v5707_v21 = vmax.f32 %v5637_v44, 0.0 }
 0x3fe   :  { %v5642_v15 = vpop.f32.mrf.mxu1 }
 0x3ff   :  { %v5708_v7 = vmax.f32 %v5639_v43, 0.0  ;;  %v5747_v57 = vpack.c.bf16 %v5707_v21, %v5703_v42  ;;  %v5643_v10 = vadd.f32 %v5642_v15, %v5530_v48  ;;  %v9293_v48 = vld [vmem:[%s9322_s8] ss:$0 sm:$0xff]  ;;  %s7490_s8 = smov [#allocation8]  }
 0x400   :  { %v5644_v53 = vpop.f32.mrf.mxu1  ;;  %s6235_s10 = sshll.u32 %s7490_s8, 4  ;;  %s6236_s10 = int_to_ptr.vmem [resolvable:$true] %s6235_s10 }
 0x401   :  { %v5748_v27 = vpack.c.bf16 %v5708_v7, %v5704_v30  ;;  %v5645_v29 = vadd.f32 %v5644_v53, %v5532_v39  ;;  %v5711_v50 = vmax.f32 %v5643_v10, 0.0  ;;  %s7454_s7 = scalar_lea.vmem %s6236_s10, 2048  ;;  %p7459_p2 = scmp.lt.s32.totalorder %s6236_s10, %s6236_s10 }
 0x402   :  { %v5646_v63 = vpop.f32.mrf.mxu1  ;;  %p7455_p1 = scmp.ne.s32.totalorder %s6236_s10, %s7454_s7  ;;  %p7460_p3 = scmp.lt.s32.totalorder %s7454_s7, %s7454_s7 }
 0x403   :  { %v5647_v35 = vadd.f32 %v5646_v63, %v5534_v24  ;;  %6189 = vmatprep.mubr.bf16.mxu1 %v5748_v27  ;;  %v5712_v22 = vmax.f32 %v5645_v29, 0.0 }
 0x404   :  { %v5648_v2 = vpop.f32.mrf.mxu1  ;;  %6190 = vmatmul.mubr.bf16.gmra.mxu1 %v5747_v57  ;;  %p7461_p4 = por %p7460_p3, %p7459_p2 }
 0x405   :  { %v5649_v59 = vadd.f32 %v5648_v2, %v5536_v20  ;;  %v5715_v6 = vmax.f32 %v5647_v35, 0.0 }
 0x406   :  { %v5652_v5 = vpop.f32.mrf.mxu1  ;;  %p7462_p5 = pnand %p7461_p4, %p7455_p1 }
 0x407   :  { %v5716_v4 = vmax.f32 %v5649_v59, 0.0  ;;  %v5751_v12 = vpack.c.bf16 %v5715_v6, %v5711_v50  ;;  %v5653_v0 = vadd.f32 %v5652_v5, %v5540_v16 }
 0x408   :  { %v5654_v18 = vpop.f32.mrf.mxu1 }
 0x409   :  { %v5752_v13 = vpack.c.bf16 %v5716_v4, %v5712_v22  ;;  %v5655_v8 = vadd.f32 %v5654_v18, %v5542_v28  ;;  %v5719_v1 = vmax.f32 %v5653_v0, 0.0 }
 0x40a   :  { %v5656_v41 = vpop.f32.mrf.mxu1 }
 0x40b   :  { %v5657_v58 = vadd.f32 %v5656_v41, %v5544_v40  ;;  %6197 = vmatprep.mubr.bf16.mxu1 %v5752_v13  ;;  %v5720_v31 = vmax.f32 %v5655_v8, 0.0 }
 0x40c   :  { %v5658_v11 = vpop.f32.mrf.mxu1  ;;  %6198 = vmatmul.mubr.bf16.gmra.mxu1 %v5751_v12 }
 0x40d   :  { %v5659_v33 = vadd.f32 %v5658_v11, %v5546_v45  ;;  %v5723_v36 = vmax.f32 %v5657_v58, 0.0 }
 0x40f   :  { %v5724_v44 = vmax.f32 %v5659_v33, 0.0  ;;  %v5755_v17 = vpack.c.bf16 %v5723_v36, %v5719_v1 }
 0x411   :  { %v5756_v60 = vpack.c.bf16 %v5724_v44, %v5720_v31 }
 0x413   :  { %6205 = vmatprep.mubr.bf16.mxu1 %v5756_v60 }
 0x414   :  { %6206 = vmatmul.mubr.bf16.gmra.mxu1 %v5755_v17 }
 0x41c   :  { %v6839_v55 = vpop.f32.mrf.mxu0 }
 0x41e   :  { %v6840_v23 = vpop.f32.mrf.mxu0 }
 0x41f   :  { %v6841_v54 = vadd.f32 %v6840_v23, %v6839_v55 }
 0x420   :  { %v6842_v25 = vpop.f32.mrf.mxu0 }
 0x421   :  { %v6055_v34 = vadd.f32 %v6841_v54, %v9293_v48 }
 0x422   :  { %v6843_v43 = vpop.f32.mrf.mxu0 }
 0x423   :  { %v6844_v3 = vadd.f32 %v6843_v43, %v6842_v25 }
 0x424   :  { %v6845_v52 = vpop.f32.mrf.mxu0 }
 0x425   :  { %v6058_v19 = vadd.f32 %v6844_v3, %v9293_v48 }
 0x426   :  { %v6846_v21 = vpop.f32.mrf.mxu0 }
 0x427   :  { %v6847_v32 = vadd.f32 %v6846_v21, %v6845_v52 }
 0x428   :  { %v6848_v15 = vpop.f32.mrf.mxu0 }
 0x429   :  { %v6063_v5 = vadd.f32 %v6847_v32, %v9293_v48 }
 0x42a   :  { %v6849_v62 = vpop.f32.mrf.mxu0 }
 0x42b   :  { %v6850_v47 = vadd.f32 %v6849_v62, %v6848_v15 }
 0x42c   :  { %v6851_v9 = vpop.f32.mrf.mxu0 }
 0x42d   :  { %v6066_v26 = vadd.f32 %v6850_v47, %v9293_v48 }
 0x42e   :  { %v6852_v30 = vpop.f32.mrf.mxu0 }
 0x42f   :  { %v6853_v28 = vadd.f32 %v6852_v30, %v6851_v9 }
 0x430   :  { %v6854_v7 = vpop.f32.mrf.mxu0 }
 0x431   :  { %v6071_v12 = vadd.f32 %v6853_v28, %v9293_v48 }
 0x432   :  { %v6855_v42 = vpop.f32.mrf.mxu0 }
 0x433   :  { %v6856_v41 = vadd.f32 %v6855_v42, %v6854_v7 }
 0x434   :  { %v6857_v53 = vpop.f32.mrf.mxu0 }
 0x435   :  { %v6074_v33 = vadd.f32 %v6856_v41, %v9293_v48 }
 0x436   :  { %v6858_v51 = vpop.f32.mrf.mxu0 }
 0x437   :  { %v6859_v36 = vadd.f32 %v6858_v51, %v6857_v53 }
 0x438   :  { %v6860_v39 = vpop.f32.mrf.mxu0 }
 0x439   :  { %v6079_v55 = vadd.f32 %v6859_v36, %v9293_v48 }
 0x43a   :  { %v6861_v24 = vpop.f32.mrf.mxu0 }
 0x43b   :  { %v6862_v23 = vadd.f32 %v6861_v24, %v6860_v39 }
 0x43c   :  { %v6863_v27 = vpop.f32.mrf.mxu0 }
 0x43d   :  { %v6082_v62 = vadd.f32 %v6862_v23, %v9293_v48 }
 0x43e   :  { %v6864_v61 = vpop.f32.mrf.mxu0 }
 0x43f   :  { %v6865_v9 = vadd.f32 %v6864_v61, %v6863_v27 }
 0x440   :  { %v6866_v29 = vpop.f32.mrf.mxu0 }
 0x441   :  { %v6087_v54 = vadd.f32 %v6865_v9, %v9293_v48 }
 0x442   :  { %v6867_v46 = vpop.f32.mrf.mxu0 }
 0x444   :  { %v6869_v22 = vpop.f32.mrf.mxu0 }
 0x446   :  { %v6870_v13 = vpop.f32.mrf.mxu0 }
 0x448   :  { %v6872_v8 = vpop.f32.mrf.mxu0 }
 0x44a   :  { %v6873_v44 = vpop.f32.mrf.mxu0 }
 0x44c   :  { %v6875_v43 = vpop.f32.mrf.mxu0 }
 0x44e   :  { %v6876_v7 = vpop.f32.mrf.mxu0 }
 0x44f   :  { %v6877_v47 = vadd.f32 %v6876_v7, %v6875_v43 }
 0x450   :  { %v6878_v24 = vpop.f32.mrf.mxu0 }
 0x452   :  { %v6879_v61 = vpop.f32.mrf.mxu0 }
 0x453   :  { %v6880_v28 = vadd.f32 %v6879_v61, %v6878_v24 }
 0x49c   :  { %v6903_v57 = vpop.f32.mrf.mxu1 }
 0x49e   :  { %v6904_v63 = vpop.f32.mrf.mxu1 }
 0x49f   :  { %v6905_v20 = vadd.f32 %v6904_v63, %v6903_v57  ;;  %v6868_v57 = vadd.f32 %v6867_v46, %v6866_v29  ;;  %v6881_v46 = vpop.f32.mrf.mxu0 }
 0x4a0   :  { %v6906_v35 = vpop.f32.mrf.mxu1 }
 0x4a1   :  { %v6152_v10 = vadd.f32 %v6905_v20, %v6055_v34  ;;  %v6090_v20 = vadd.f32 %v6868_v57, %v9293_v48 }
 0x4a2   :  { %v6907_v2 = vpop.f32.mrf.mxu1 }
 0x4a3   :  { %6214 = vst [vmem:[#allocation8] sm:$0xff] %v6152_v10  ;;  %v6908_v49 = vadd.f32 %v6907_v2, %v6906_v35  ;;  %v6871_v35 = vadd.f32 %v6870_v13, %v6869_v22  ;;  %v6882_v22 = vpop.f32.mrf.mxu0 }
 0x4a4   :  { %v6909_v59 = vpop.f32.mrf.mxu1  ;;  %v6883_v41 = vadd.f32 %v6882_v22, %v6881_v46 }
 0x4a5   :  { %v6155_v38 = vadd.f32 %v6908_v49, %v6058_v19  ;;  %v6095_v32 = vadd.f32 %v6871_v35, %v9293_v48  ;;  %v6874_v49 = vadd.f32 %v6873_v44, %v6872_v8  ;;  %v6884_v13 = vpop.f32.mrf.mxu0 }
 0x4a6   :  { %v6910_v6 = vpop.f32.mrf.mxu1 }
 0x4a7   :  { %6215 = vst [vmem:[#allocation8 + $0x8] sm:$0xff] %v6155_v38  ;;  %v6911_v37 = vadd.f32 %v6910_v6, %v6909_v59  ;;  %v6885_v8 = vpop.f32.mrf.mxu0 }
 0x4a8   :  { %v6912_v4 = vpop.f32.mrf.mxu1  ;;  %v6886_v36 = vadd.f32 %v6885_v8, %v6884_v13 }
 0x4a9   :  { %v6160_v50 = vadd.f32 %v6911_v37, %v6063_v5  ;;  %v6098_v5 = vadd.f32 %v6874_v49, %v9293_v48 }
 0x4aa   :  { %v6913_v18 = vpop.f32.mrf.mxu1 }
 0x4ab   :  { %6216 = vst [vmem:[#allocation8 + $0x10] sm:$0xff] %v6160_v50  ;;  %v6914_v40 = vadd.f32 %v6913_v18, %v6912_v4 }
 0x4ac   :  { %v6915_v56 = vpop.f32.mrf.mxu1 }
 0x4ad   :  { %v6163_v16 = vadd.f32 %v6914_v40, %v6066_v26  ;;  %v6103_v26 = vadd.f32 %v6877_v47, %v9293_v48 }
 0x4ae   :  { %v6916_v14 = vpop.f32.mrf.mxu1 }
 0x4af   :  { %6217 = vst [vmem:[#allocation8 + $0x18] sm:$0xff] %v6163_v16  ;;  %v6917_v45 = vadd.f32 %v6916_v14, %v6915_v56 }
 0x4b0   :  { %v6918_v58 = vpop.f32.mrf.mxu1 }
 0x4b1   :  { %v6168_v0 = vadd.f32 %v6917_v45, %v6071_v12  ;;  %v6106_v12 = vadd.f32 %v6880_v28, %v9293_v48 }
 0x4b2   :  { %v6919_v11 = vpop.f32.mrf.mxu1 }
 0x4b3   :  { %6218 = vst [vmem:[#allocation8 + $0x20] sm:$0xff] %v6168_v0  ;;  %v6920_v31 = vadd.f32 %v6919_v11, %v6918_v58 }
 0x4b4   :  { %v6921_v1 = vpop.f32.mrf.mxu1 }
 0x4b5   :  { %v6171_v60 = vadd.f32 %v6920_v31, %v6074_v33  ;;  %v6111_v33 = vadd.f32 %v6883_v41, %v9293_v48 }
 0x4b6   :  { %v6922_v17 = vpop.f32.mrf.mxu1 }
 0x4b7   :  { %6219 = vst [vmem:[#allocation8 + $0x28] sm:$0xff] %v6171_v60  ;;  %v6923_v25 = vadd.f32 %v6922_v17, %v6921_v1  ;;  %v6114_v17 = vadd.f32 %v6886_v36, %v9293_v48 }
 0x4b8   :  { %v6924_v52 = vpop.f32.mrf.mxu1 }
 0x4b9   :  { %v6176_v21 = vadd.f32 %v6923_v25, %v6079_v55 }
 0x4ba   :  { %v6925_v15 = vpop.f32.mrf.mxu1 }
 0x4bb   :  { %6220 = vst [vmem:[#allocation8 + $0x30] sm:$0xff] %v6176_v21  ;;  %v6926_v30 = vadd.f32 %v6925_v15, %v6924_v52 }
 0x4bc   :  { %v6927_v42 = vpop.f32.mrf.mxu1 }
 0x4bd   :  { %v6179_v53 = vadd.f32 %v6926_v30, %v6082_v62 }
 0x4be   :  { %v6928_v51 = vpop.f32.mrf.mxu1 }
 0x4bf   :  { %6221 = vst [vmem:[#allocation8 + $0x38] sm:$0xff] %v6179_v53  ;;  %v6929_v39 = vadd.f32 %v6928_v51, %v6927_v42 }
 0x4c0   :  { %v6930_v63 = vpop.f32.mrf.mxu1 }
 0x4c1   :  { %v6184_v34 = vadd.f32 %v6929_v39, %v6087_v54 }
 0x4c2   :  { %v6931_v3 = vpop.f32.mrf.mxu1 }
 0x4c3   :  { %6222 = vst [vmem:[#allocation8 + $0x40] sm:$0xff] %v6184_v34  ;;  %v6932_v27 = vadd.f32 %v6931_v3, %v6930_v63 }
 0x4c4   :  { %v6933_v10 = vpop.f32.mrf.mxu1 }
 0x4c5   :  { %v6187_v2 = vadd.f32 %v6932_v27, %v6090_v20 }
 0x4c6   :  { %v6934_v19 = vpop.f32.mrf.mxu1 }
 0x4c7   :  { %6223 = vst [vmem:[#allocation8 + $0x48] sm:$0xff] %v6187_v2  ;;  %v6935_v29 = vadd.f32 %v6934_v19, %v6933_v10 }
 0x4c8   :  { %v6936_v59 = vpop.f32.mrf.mxu1 }
 0x4c9   :  { %v6192_v38 = vadd.f32 %v6935_v29, %v6095_v32 }
 0x4ca   :  { %v6937_v6 = vpop.f32.mrf.mxu1 }
 0x4cb   :  { %6224 = vst [vmem:[#allocation8 + $0x50] sm:$0xff] %v6192_v38  ;;  %v6938_v37 = vadd.f32 %v6937_v6, %v6936_v59 }
 0x4cc   :  { %v6939_v4 = vpop.f32.mrf.mxu1 }
 0x4cd   :  { %v6195_v50 = vadd.f32 %v6938_v37, %v6098_v5 }
 0x4ce   :  { %v6940_v18 = vpop.f32.mrf.mxu1 }
 0x4cf   :  { %6225 = vst [vmem:[#allocation8 + $0x58] sm:$0xff] %v6195_v50  ;;  %v6941_v40 = vadd.f32 %v6940_v18, %v6939_v4 }
 0x4d0   :  { %v6942_v56 = vpop.f32.mrf.mxu1 }
 0x4d1   :  { %v6200_v16 = vadd.f32 %v6941_v40, %v6103_v26 }
 0x4d2   :  { %v6943_v14 = vpop.f32.mrf.mxu1 }
 0x4d3   :  { %6226 = vst [vmem:[#allocation8 + $0x60] sm:$0xff] %v6200_v16  ;;  %v6944_v45 = vadd.f32 %v6943_v14, %v6942_v56 }
 0x4d4   :  { %v6945_v58 = vpop.f32.mrf.mxu1 }
 0x4d5   :  { %v6203_v0 = vadd.f32 %v6944_v45, %v6106_v12 }
 0x4d6   :  { %v6946_v11 = vpop.f32.mrf.mxu1 }
 0x4d7   :  { %6227 = vst [vmem:[#allocation8 + $0x68] sm:$0xff] %v6203_v0  ;;  %v6947_v31 = vadd.f32 %v6946_v11, %v6945_v58 }
 0x4d8   :  { %v6948_v44 = vpop.f32.mrf.mxu1 }
 0x4d9   :  { %v6208_v1 = vadd.f32 %v6947_v31, %v6111_v33 }
 0x4da   :  { %v6949_v60 = vpop.f32.mrf.mxu1 }
 0x4db   :  { %6228 = vst [vmem:[#allocation8 + $0x70] sm:$0xff] %v6208_v1  ;;  %v6950_v55 = vadd.f32 %v6949_v60, %v6948_v44 }
 0x4dd   :  { %v6211_v23 = vadd.f32 %v6950_v55, %v6114_v17 }
 0x4df   :  { %6229 = vst [vmem:[#allocation8 + $0x78] sm:$0xff] %v6211_v23 }
 0x4e0   :  { %7465 = shalt.err (!%p7462_p5)
}
 0x4e1   :  { %s7491_s11 = smov 128   ;;  %s7492_s1 = smov 8  }
 0x4e2   :  { %6241 = dma.vmem_to_hbm [thread:$0]  %s6236_s10, 2048, %s9323_s9, [#allocation4], %s7491_s11, %s7491_s11, %s7492_s1  }
 0x4e3   :  { %7478 = dma.done.wait [#allocation4], 2048  }
 0x4e4   :  { %7479 = vsyncadd [#allocation4], 4294965248 }
 0x4e5   :  { %6245 = vsyncpa [#allocation3], 1 }
 0x4e6   :  { %6246 = vsyncpa [#allocation6], 1 }
 0x4e7   :  { %6247 = vsyncpa [#allocation4], 1 }

</bundles_post_ra>
